<compile_context>
chip_gen: v6e
topology: v6e:2x2x1
jax: 0.10.0
libtpu: 0.0.40
codegen_flags: <defaults>
</compile_context>

<pallas_src>
import jax
import jax.numpy as jnp
from jax.experimental import pallas as pl
from jax.experimental.pallas import tpu as pltpu

EPS = 1e-5      # nn.LayerNorm default
_N_IN = 17      # number of tensor operands fed to the kernel


# --------------------------------- kernel ------------------------------------
def _txl_body(q_ref, qhm_ref, vhm_ref, mask_ref,
              lnq_g_ref, lnq_b_ref, lnkv_g_ref, lnkv_b_ref,
              lnattn_g_ref, lnattn_b_ref,
              wq_ref, wk_ref, wv_ref, wout_ref, bout_ref,
              wproj_ref, bproj_ref,
              out_ref, attn_ref, kh_scr, vh_scr, ctx_scr):
    """attn_ref is None when the attention-weights output is disabled."""
    bf16 = jnp.bfloat16
    f32 = jnp.float32
    t = pl.program_id(1)

    q_in = q_ref[0]            # (TQ, D)     f32  (residual + LN statistics)
    q_hm = qhm_ref[0]          # (H, TQ, hs) f32  head-major query view
    H, TQ, hs = q_hm.shape
    D = q_in.shape[-1]
    S = vh_scr.shape[1]
    scale = f32(1.0 / (D ** 0.5))
    inv_d = f32(1.0 / D)

    # ---- K/V LayerNorm + projections: once per batch element (t == 0) ------
    # The scratch persists across the t axis; t is the innermost grid axis so
    # it is recomputed whenever the batch index changes.
    @pl.when(t == 0)
    def _compute_kv():
        v_hm = vhm_ref[0]                                             # (H, S, hs)
        v_mu = jnp.sum(jnp.sum(v_hm, axis=-1, keepdims=True),
                       axis=0, keepdims=True) * inv_d                 # (1, S, 1)
        v_c = v_hm - v_mu
        v_var = jnp.sum(jnp.sum(v_c * v_c, axis=-1, keepdims=True),
                        axis=0, keepdims=True) * inv_d
        vn = v_c * jax.lax.rsqrt(v_var + EPS) * lnkv_g_ref[...] + lnkv_b_ref[...]
        # The reference forward overwrites key with the normalized value.
        vn2 = vn.astype(bf16).reshape(H * S, hs)        # leading-dim collapse only
        kh_scr[...] = jnp.dot(vn2, wk_ref[...],
                              preferred_element_type=f32
                              ).astype(bf16).reshape(H, S, hs)
        vh_scr[...] = jnp.dot(vn2, wv_ref[...],
                              preferred_element_type=f32
                              ).astype(bf16).reshape(H, S, hs)

    # ---- query LayerNorm (stats from seq-major view, applied head-major) ----
    q_mu = jnp.mean(q_in, axis=-1, keepdims=True)                     # (TQ, 1)
    q_var = jnp.mean((q_in - q_mu) ** 2, axis=-1, keepdims=True)
    q_inv = jax.lax.rsqrt(q_var + EPS)
    qn = (q_hm - q_mu[None]) * q_inv[None] * lnq_g_ref[...] + lnq_b_ref[...]

    # ---- Q projection: one tall matmul; 1/sqrt(D) folded into Q once -------
    qh = jnp.dot((qn * scale).astype(bf16).reshape(H * TQ, hs), wq_ref[...],
                 preferred_element_type=f32).astype(bf16).reshape(H, TQ, hs)

    # ---- attention, all heads batched; mask bias hoisted out of head math ---
    energy = jnp.einsum('hqd,hkd->hqk', qh, kh_scr[...],
                        preferred_element_type=f32)                   # (H, TQ, S)
    mask = mask_ref[0]                                                # (1, S)
    bias = jnp.where(mask == 0.0, f32(-1e20), f32(0.0))
    energy = energy + bias[None]
    m = jnp.max(energy, axis=-1, keepdims=True)
    # f32 exp keeps the kernel portable to v5e (no bf16 EUP).
    # TODO(synk): use a bf16 exp on v6e/v7x if the EUP turns out to saturate.
    p = jnp.exp(energy - m)
    attn = p * pl.reciprocal(jnp.sum(p, axis=-1, keepdims=True), approx=True)
    attn_b = attn.astype(bf16)                 # single cast, reused twice below
    if attn_ref is not None:
        attn_ref[0] = attn_b                   # optional O(H*S^2) bf16 writeback

    ctx = jnp.einsum('hqk,hkd->hqd', attn_b, vh_scr[...],
                     preferred_element_type=f32)                      # (H, TQ, hs)

    # ---- fc_out: head-concat into (TQ, D), then ONE full-D matmul ----------
    for h in range(H):                         # H static lane-offset stores
        ctx_scr[:, h * hs:(h + 1) * hs] = ctx[h].astype(bf16)
    att = jnp.dot(ctx_scr[...], wout_ref[...],
                  preferred_element_type=f32) + bout_ref[...]         # (TQ, D)

    # ---- residual + post-attention LN + Linear/ReLU projection + residual ---
    x = att + q_in
    mu = jnp.mean(x, axis=-1, keepdims=True)
    var = jnp.mean((x - mu) ** 2, axis=-1, keepdims=True)
    x_ = (x - mu) * jax.lax.rsqrt(var + EPS) * lnattn_g_ref[...] + lnattn_b_ref[...]
    fwd = jnp.maximum(
        jnp.dot(x_.astype(bf16), wproj_ref[...],
                preferred_element_type=f32) + bproj_ref[...], 0.0)
    out_ref[0] = (fwd + x).astype(out_ref.dtype)


def _kernel_with_attn(*refs):
    ins = refs[:_N_IN]
    out_ref, attn_ref, kh_scr, vh_scr, ctx_scr = refs[_N_IN:]
    _txl_body(*ins, out_ref, attn_ref, kh_scr, vh_scr, ctx_scr)


def _kernel_no_attn(*refs):
    ins = refs[:_N_IN]
    out_ref, kh_scr, vh_scr, ctx_scr = refs[_N_IN:]
    _txl_body(*ins, out_ref, None, kh_scr, vh_scr, ctx_scr)


# ------------------------------ sizing helpers --------------------------------
def _vmem_limit_bytes():
    """Scoped-VMEM budget: ~3/4 of the device's VMEM, capped at 100 MiB."""
    try:
        cap = pltpu.get_tpu_info().vmem_capacity_bytes
    except Exception:
        cap = 64 * 1024 * 1024
    return int(max(32 * 1024 * 1024, min(0.75 * cap, 100 * 1024 * 1024)))


def _auto_q_tile(S, D, H, hs, budget, with_attn):
    """Largest query tile whose per-tile VMEM footprint fits the budget."""
    candidates = (8, 16, 32, 64, 128, 256, 512)
    fixed = 2 * H * S * hs * 2                             # persistent bf16 K/V scratch
    fixed += 2 * H * S * hs * 4                            # double-buffered f32 value block
    fixed += (3 * hs * hs + 2 * D * D) * 2 + 12 * D * 4    # weights + LN params/biases
    best = None
    for tq in candidates:
        if tq > S or S % tq:
            continue
        per = 3 * 2 * tq * D * 4                           # q (seq+head-major) + out, x2 bufs
        per += 3 * H * tq * S * 4                          # live f32 energy / p / attn temps
        per += tq * D * 2                                  # (TQ, D) bf16 context scratch
        if with_attn:
            per += 2 * H * tq * S * 2                      # double-buffered bf16 attn output
        if fixed + per <= budget:
            best = tq
    if best is None:
        best = next((tq for tq in candidates if tq <= S and S % tq == 0), S)
    return best


# --------------------------------- wrapper ------------------------------------
def transformer_layer_xl(value, key, query, mask, params, num_heads,
                         q_tile=None, return_attn_weights=True):
    """value/key/query: (N, S, D); mask: (N, S).

    Returns (out f32, attn bf16), or (out f32, None) if return_attn_weights is
    False (which drops the O(H*S^2) attention-weights HBM writeback entirely).
    """
    del key  # the reference forward overwrites key with the normalized value
    N, S, D = query.shape
    H = num_heads
    hs = D // H
    f32, bf16 = jnp.float32, jnp.bfloat16

    vmem_limit = _vmem_limit_bytes()
    TQ = q_tile if q_tile is not None else _auto_q_tile(
        S, D, H, hs, vmem_limit, return_attn_weights)
    assert S % TQ == 0, "sequence length must be a multiple of the query tile"

    # Layout plumbing in the wrapper (plain XLA): head-major views keep every
    # in-kernel access lane-dense and avoid minor-dim splits inside the kernel.
    q_sd = query.astype(f32)                                           # (N, S, D)
    q_hm = q_sd.reshape(N, S, H, hs).transpose(0, 2, 1, 3)             # (N, H, S, hs)
    v_hm = value.astype(f32).reshape(N, S, H, hs).transpose(0, 2, 1, 3)
    mask3 = mask.reshape(N, 1, S).astype(f32)

    def hm(p):   # (D,) LayerNorm param -> head-major (H, 1, hs)
        return p.astype(f32).reshape(H, 1, hs)

    def row(p):  # (D,) -> (1, D)
        return p.astype(f32).reshape(1, D)

    # bf16 weights in kernel-ready layout (nn.Linear computes y = x @ W^T + b);
    # the shared per-head (hs, hs) weights are NOT broadcast to (H, hs, hs).
    wq = params["w_q"].T.astype(bf16)
    wk = params["w_k"].T.astype(bf16)
    wv = params["w_v"].T.astype(bf16)
    wout = params["w_out"].T.astype(bf16)                              # (D, D)
    wproj = params["w_proj"].T.astype(bf16)                            # (D, D)

    operands = (q_sd, q_hm, v_hm, mask3,
                hm(params["lnq_g"]), hm(params["lnq_b"]),
                hm(params["lnkv_g"]), hm(params["lnkv_b"]),
                row(params["lnattn_g"]), row(params["lnattn_b"]),
                wq, wk, wv, wout, row(params["b_out"]),
                wproj, row(params["b_proj"]))

    def build_and_call(single_buffer):
        def inv_spec(shape):
            # Grid-invariant operand: single-buffer when supported (saves VMEM).
            if single_buffer:
                return pl.BlockSpec(shape, lambda n, t: (0,) * len(shape),
                                    pipeline_mode=pl.Buffered(1))
            return pl.BlockSpec(shape, lambda n, t: (0,) * len(shape))

        in_specs = [
            pl.BlockSpec((1, TQ, D), lambda n, t: (n, t, 0)),           # query, seq-major
            pl.BlockSpec((1, H, TQ, hs), lambda n, t: (n, 0, t, 0)),    # query, head-major
            pl.BlockSpec((1, H, S, hs), lambda n, t: (n, 0, 0, 0)),     # value, head-major
            pl.BlockSpec((1, 1, S), lambda n, t: (n, 0, 0)),            # mask
            inv_spec((H, 1, hs)), inv_spec((H, 1, hs)),                 # lnq_g / lnq_b
            inv_spec((H, 1, hs)), inv_spec((H, 1, hs)),                 # lnkv_g / lnkv_b
            inv_spec((1, D)), inv_spec((1, D)),                         # lnattn_g / lnattn_b
            inv_spec((hs, hs)), inv_spec((hs, hs)), inv_spec((hs, hs)), # wq / wk / wv
            inv_spec((D, D)), inv_spec((1, D)),                         # w_out / b_out
            inv_spec((D, D)), inv_spec((1, D)),                         # w_proj / b_proj
        ]
        out_spec_main = pl.BlockSpec((1, TQ, D), lambda n, t: (n, t, 0))
        scratch = [pltpu.VMEM((H, S, hs), bf16),     # projected K (persistent over t)
                   pltpu.VMEM((H, S, hs), bf16),     # projected V (persistent over t)
                   pltpu.VMEM((TQ, D), bf16)]        # head-concat context

        if return_attn_weights:
            kernel = _kernel_with_attn
            out_shape = (jax.ShapeDtypeStruct((N, S, D), f32),
                         jax.ShapeDtypeStruct((N, H, S, S), bf16))
            out_specs = (out_spec_main,
                         pl.BlockSpec((1, H, TQ, S), lambda n, t: (n, 0, t, 0)))
        else:
            kernel = _kernel_no_attn
            out_shape = jax.ShapeDtypeStruct((N, S, D), f32)
            out_specs = out_spec_main

        return pl.pallas_call(
            kernel,
            out_shape=out_shape,
            grid=(N, S // TQ),
            in_specs=in_specs,
            out_specs=out_specs,
            scratch_shapes=scratch,
            compiler_params=pltpu.CompilerParams(
                # The K/V hoist requires the query-tile axis to stay on one
                # core ("arbitrary"); the batch axis remains parallel.
                dimension_semantics=("parallel", "arbitrary"),
                vmem_limit_bytes=vmem_limit),
        )(*operands)

    try:
        result = build_and_call(single_buffer=True)
    except Exception:
        # pipeline_mode=pl.Buffered(1) not supported by this jax: fall back to
        # default double-buffering of the invariant operands.
        result = build_and_call(single_buffer=False)

    if return_attn_weights:
        out, attn = result
        return out, attn
    return result, None


# ----------------------------- pure-JAX reference ----------------------------
def reference(value, key, query, mask, p, num_heads):
    del key
    N, S, D = query.shape
    hs = D // num_heads

    def ln(x, g, b):
        mu = jnp.mean(x, -1, keepdims=True)
        var = jnp.mean((x - mu) ** 2, -1, keepdims=True)
        return (x - mu) / jnp.sqrt(var + EPS) * g + b

    q_ = ln(query, p["lnq_g"], p["lnq_b"])
    v_ = ln(value, p["lnkv_g"], p["lnkv_b"])
    k_ = v_

    def split(x):
        return x.reshape(N, S, num_heads, hs)

    V = jnp.einsum("nlhd,ed->nlhe", split(v_), p["w_v"])
    K = jnp.einsum("nlhd,ed->nlhe", split(k_), p["w_k"])
    Q = jnp.einsum("nlhd,ed->nlhe", split(q_), p["w_q"])
    energy = jnp.einsum("nqhd,nkhd->nhqk", Q, K)
    energy = jnp.where(mask[:, None, None, :] == 0, -1e20, energy)
    attn = jax.nn.softmax(energy / jnp.sqrt(jnp.float32(D)), axis=3)
    out = jnp.einsum("nhql,nlhd->nqhd", attn, V).reshape(N, S, D)
    att = out @ p["w_out"].T + p["b_out"]
    x = att + query
    x_ = ln(x, p["lnattn_g"], p["lnattn_b"])
    fwd = jax.nn.relu(x_ @ p["w_proj"].T + p["b_proj"])
    return fwd + x, attn


# ------------------------------- param builder --------------------------------
def make_params(rng, dim, num_heads):
    hs = dim // num_heads
    ks = jax.random.split(rng, 12)
    sd = 0.05
    return {
        "w_v": jax.random.normal(ks[0], (hs, hs), jnp.float32) * sd,
        "w_k": jax.random.normal(ks[1], (hs, hs), jnp.float32) * sd,
        "w_q": jax.random.normal(ks[2], (hs, hs), jnp.float32) * sd,
        "w_out": jax.random.normal(ks[3], (dim, dim), jnp.float32) * sd,
        "b_out": jax.random.normal(ks[4], (dim,), jnp.float32) * sd,
        "w_proj": jax.random.normal(ks[5], (dim, dim), jnp.float32) * sd,
        "b_proj": jax.random.normal(ks[6], (dim,), jnp.float32) * sd,
        "lnq_g": 1.0 + 0.1 * jax.random.normal(ks[7], (dim,), jnp.float32),
        "lnkv_g": 1.0 + 0.1 * jax.random.normal(ks[8], (dim,), jnp.float32),
        "lnattn_g": 1.0 + 0.1 * jax.random.normal(ks[9], (dim,), jnp.float32),
        "lnq_b": 0.1 * jax.random.normal(ks[10], (dim,), jnp.float32),
        "lnkv_b": 0.1 * jax.random.normal(ks[11], (dim,), jnp.float32),
        "lnattn_b": jnp.zeros((dim,), jnp.float32),
    }


if __name__ == "__main__":
    N, S, DIM, HEADS = 2, 8, 32, 4
    root = jax.random.PRNGKey(0)
    kq, kv, kk, kp = jax.random.split(root, 4)

    query = jax.random.normal(kq, (N, S, DIM), jnp.float32)
    value = jax.random.normal(kv, (N, S, DIM), jnp.float32)
    key = jax.random.normal(kk, (N, S, DIM), jnp.float32)  # ignored by the forward
    mask = jnp.ones((N, S), jnp.float32).at[1, -2:].set(0.0)
    params = make_params(kp, DIM, HEADS)

    out, attn_w = transformer_layer_xl(value, key, query, mask, params, HEADS)
    out = jax.block_until_ready(out)
    attn_w = jax.block_until_ready(attn_w)

    ref_out, ref_attn = reference(value, key, query, mask, params, HEADS)
    assert out.shape == (N, S, DIM) and attn_w.shape == (N, HEADS, S, S)
    # bf16 matmul operands + bf16 attention writeback => relaxed tolerances.
    assert jnp.allclose(out, ref_out, atol=3e-2, rtol=3e-2), \
        float(jnp.max(jnp.abs(out - ref_out)))
    assert jnp.allclose(attn_w.astype(jnp.float32), ref_attn, atol=1.5e-2, rtol=5e-2), \
        float(jnp.max(jnp.abs(attn_w.astype(jnp.float32) - ref_attn)))

    # Fast path: drop the O(H*S^2) attention-weights HBM writeback entirely.
    out2, no_attn = transformer_layer_xl(value, key, query, mask, params, HEADS,
                                         return_attn_weights=False)
    out2 = jax.block_until_ready(out2)
    assert no_attn is None
    assert jnp.allclose(out2, ref_out, atol=3e-2, rtol=3e-2)

    print("KERNEL_OK")
</pallas_src>

<mosaic_0001>
module attributes {stable_mosaic.version = 11 : i64} {
  func.func @_kernel_with_attn(%arg0: i32, %arg1: i32, %arg2: memref<1x8x32xf32, #tpu.memory_space<vmem>>, %arg3: memref<1x4x8x8xf32, #tpu.memory_space<vmem>>, %arg4: memref<1x4x8x8xf32, #tpu.memory_space<vmem>>, %arg5: memref<1x1x8xf32, #tpu.memory_space<vmem>>, %arg6: memref<4x1x8xf32, #tpu.memory_space<vmem>>, %arg7: memref<4x1x8xf32, #tpu.memory_space<vmem>>, %arg8: memref<4x1x8xf32, #tpu.memory_space<vmem>>, %arg9: memref<4x1x8xf32, #tpu.memory_space<vmem>>, %arg10: memref<1x32xf32, #tpu.memory_space<vmem>>, %arg11: memref<1x32xf32, #tpu.memory_space<vmem>>, %arg12: memref<8x8xbf16, #tpu.memory_space<vmem>>, %arg13: memref<8x8xbf16, #tpu.memory_space<vmem>>, %arg14: memref<8x8xbf16, #tpu.memory_space<vmem>>, %arg15: memref<32x32xbf16, #tpu.memory_space<vmem>>, %arg16: memref<1x32xf32, #tpu.memory_space<vmem>>, %arg17: memref<32x32xbf16, #tpu.memory_space<vmem>>, %arg18: memref<1x32xf32, #tpu.memory_space<vmem>>, %arg19: memref<1x8x32xf32, #tpu.memory_space<vmem>>, %arg20: memref<1x4x8x8xbf16, #tpu.memory_space<vmem>>, %arg21: memref<4x8x8xbf16, #tpu.memory_space<vmem>>, %arg22: memref<4x8x8xbf16, #tpu.memory_space<vmem>>, %arg23: memref<8x32xbf16, #tpu.memory_space<vmem>>) attributes {dimension_semantics = [#tpu.dimension_semantics<parallel>, #tpu.dimension_semantics<arbitrary>], iteration_bounds = array<i64: 2, 1>, scalar_prefetch = 0 : i64, scratch_operands = 3 : i64, tpu.core_type = #tpu.core_type<tc>, window_params = [{transform_indices = @transform_0, window_bounds = array<i64: 1, 8, 32>}, {transform_indices = @transform_1, window_bounds = array<i64: 1, 4, 8, 8>}, {transform_indices = @transform_2, window_bounds = array<i64: 1, 4, 8, 8>}, {transform_indices = @transform_3, window_bounds = array<i64: 1, 1, 8>}, {pipeline_mode = #tpu.pipeline_mode<synchronous>, transform_indices = @transform_4, window_bounds = array<i64: 4, 1, 8>}, {pipeline_mode = #tpu.pipeline_mode<synchronous>, transform_indices = @transform_5, window_bounds = array<i64: 4, 1, 8>}, {pipeline_mode = #tpu.pipeline_mode<synchronous>, transform_indices = @transform_6, window_bounds = array<i64: 4, 1, 8>}, {pipeline_mode = #tpu.pipeline_mode<synchronous>, transform_indices = @transform_7, window_bounds = array<i64: 4, 1, 8>}, {pipeline_mode = #tpu.pipeline_mode<synchronous>, transform_indices = @transform_8, window_bounds = array<i64: 1, 32>}, {pipeline_mode = #tpu.pipeline_mode<synchronous>, transform_indices = @transform_9, window_bounds = array<i64: 1, 32>}, {pipeline_mode = #tpu.pipeline_mode<synchronous>, transform_indices = @transform_10, window_bounds = array<i64: 8, 8>}, {pipeline_mode = #tpu.pipeline_mode<synchronous>, transform_indices = @transform_11, window_bounds = array<i64: 8, 8>}, {pipeline_mode = #tpu.pipeline_mode<synchronous>, transform_indices = @transform_12, window_bounds = array<i64: 8, 8>}, {pipeline_mode = #tpu.pipeline_mode<synchronous>, transform_indices = @transform_13, window_bounds = array<i64: 32, 32>}, {pipeline_mode = #tpu.pipeline_mode<synchronous>, transform_indices = @transform_14, window_bounds = array<i64: 1, 32>}, {pipeline_mode = #tpu.pipeline_mode<synchronous>, transform_indices = @transform_15, window_bounds = array<i64: 32, 32>}, {pipeline_mode = #tpu.pipeline_mode<synchronous>, transform_indices = @transform_16, window_bounds = array<i64: 1, 32>}, {transform_indices = @transform_17, window_bounds = array<i64: 1, 8, 32>}, {transform_indices = @transform_18, window_bounds = array<i64: 1, 4, 8, 8>}]} {
    %c0 = arith.constant 0 : index
    %c0_0 = arith.constant 0 : index
    %c0_1 = arith.constant 0 : index
    %0 = vector.load %arg2[%c0, %c0_0, %c0_1] : memref<1x8x32xf32, #tpu.memory_space<vmem>>, vector<1x8x32xf32>
    %1 = vector.shape_cast %0 : vector<1x8x32xf32> to vector<8x32xf32>
    %c0_2 = arith.constant 0 : index
    %c0_3 = arith.constant 0 : index
    %c0_4 = arith.constant 0 : index
    %c0_5 = arith.constant 0 : index
    %2 = vector.load %arg3[%c0_2, %c0_3, %c0_4, %c0_5] : memref<1x4x8x8xf32, #tpu.memory_space<vmem>>, vector<1x4x8x8xf32>
    %3 = vector.shape_cast %2 : vector<1x4x8x8xf32> to vector<4x8x8xf32>
    %c0_i32 = arith.constant 0 : i32
    %4 = arith.cmpi eq, %arg1, %c0_i32 : i32
    %5 = arith.extui %4 : i1 to i32
    %cst = arith.constant 3.125000e-02 : f32
    %c0_i32_6 = arith.constant 0 : i32
    %6 = arith.cmpi ne, %5, %c0_i32_6 : i32
    scf.if %6 {
      %c0_72 = arith.constant 0 : index
      %c0_73 = arith.constant 0 : index
      %c0_74 = arith.constant 0 : index
      %c0_75 = arith.constant 0 : index
      %128 = vector.load %arg4[%c0_72, %c0_73, %c0_74, %c0_75] : memref<1x4x8x8xf32, #tpu.memory_space<vmem>>, vector<1x4x8x8xf32>
      %129 = vector.shape_cast %128 : vector<1x4x8x8xf32> to vector<4x8x8xf32>
      %cst_76 = arith.constant dense<0.000000e+00> : vector<4x8xf32>
      %130 = vector.multi_reduction <add>, %129, %cst_76 [2] : vector<4x8x8xf32> to vector<4x8xf32>
      %131 = vector.shape_cast %130 : vector<4x8xf32> to vector<4x8x1xf32>
      %cst_77 = arith.constant dense<0.000000e+00> : vector<8x1xf32>
      %132 = vector.multi_reduction <add>, %131, %cst_77 [0] : vector<4x8x1xf32> to vector<8x1xf32>
      %133 = vector.shape_cast %132 : vector<8x1xf32> to vector<1x8x1xf32>
      %134 = vector.broadcast %cst : f32 to vector<1x8x1xf32>
      %135 = arith.mulf %133, %134 : vector<1x8x1xf32>
      %136 = vector.broadcast %135 : vector<1x8x1xf32> to vector<4x8x8xf32>
      %137 = arith.subf %129, %136 : vector<4x8x8xf32>
      %138 = arith.mulf %137, %137 : vector<4x8x8xf32>
      %cst_78 = arith.constant dense<0.000000e+00> : vector<4x8xf32>
      %139 = vector.multi_reduction <add>, %138, %cst_78 [2] : vector<4x8x8xf32> to vector<4x8xf32>
      %140 = vector.shape_cast %139 : vector<4x8xf32> to vector<4x8x1xf32>
      %cst_79 = arith.constant dense<0.000000e+00> : vector<8x1xf32>
      %141 = vector.multi_reduction <add>, %140, %cst_79 [0] : vector<4x8x1xf32> to vector<8x1xf32>
      %142 = vector.shape_cast %141 : vector<8x1xf32> to vector<1x8x1xf32>
      %143 = vector.broadcast %cst : f32 to vector<1x8x1xf32>
      %144 = arith.mulf %142, %143 : vector<1x8x1xf32>
      %cst_80 = arith.constant 9.99999974E-6 : f32
      %145 = vector.broadcast %cst_80 : f32 to vector<1x8x1xf32>
      %146 = arith.addf %144, %145 : vector<1x8x1xf32>
      %147 = math.rsqrt %146 : vector<1x8x1xf32>
      %148 = vector.broadcast %147 : vector<1x8x1xf32> to vector<4x8x8xf32>
      %149 = arith.mulf %137, %148 : vector<4x8x8xf32>
      %c0_81 = arith.constant 0 : index
      %c0_82 = arith.constant 0 : index
      %c0_83 = arith.constant 0 : index
      %150 = vector.load %arg8[%c0_81, %c0_82, %c0_83] : memref<4x1x8xf32, #tpu.memory_space<vmem>>, vector<4x1x8xf32>
      %151 = vector.broadcast %150 : vector<4x1x8xf32> to vector<4x8x8xf32>
      %152 = arith.mulf %149, %151 : vector<4x8x8xf32>
      %c0_84 = arith.constant 0 : index
      %c0_85 = arith.constant 0 : index
      %c0_86 = arith.constant 0 : index
      %153 = vector.load %arg9[%c0_84, %c0_85, %c0_86] : memref<4x1x8xf32, #tpu.memory_space<vmem>>, vector<4x1x8xf32>
      %154 = vector.broadcast %153 : vector<4x1x8xf32> to vector<4x8x8xf32>
      %155 = arith.addf %152, %154 : vector<4x8x8xf32>
      %156 = arith.truncf %155 : vector<4x8x8xf32> to vector<4x8x8xbf16>
      %157 = vector.shape_cast %156 : vector<4x8x8xbf16> to vector<32x8xbf16>
      %c0_87 = arith.constant 0 : index
      %c0_88 = arith.constant 0 : index
      %158 = vector.load %arg13[%c0_87, %c0_88] : memref<8x8xbf16, #tpu.memory_space<vmem>>, vector<8x8xbf16>
      %cst_89 = arith.constant dense<0.000000e+00> : vector<32x8xf32>
      %159 = tpu.matmul %157, %158, %cst_89 {dimension_numbers = #tpu.dot_dimension_numbers<[1], [0], [0], [1], [0, 0, 1, 1], [], []>} : vector<32x8xbf16>, vector<8x8xbf16>, vector<32x8xf32> -> vector<32x8xf32>
      %160 = arith.truncf %159 : vector<32x8xf32> to vector<32x8xbf16>
      %161 = vector.shape_cast %160 : vector<32x8xbf16> to vector<4x8x8xbf16>
      %c0_90 = arith.constant 0 : index
      %c0_91 = arith.constant 0 : index
      %c0_92 = arith.constant 0 : index
      %162 = vector.load %arg21[%c0_90, %c0_91, %c0_92] : memref<4x8x8xbf16, #tpu.memory_space<vmem>>, vector<4x8x8xbf16>
      tpu.vector_store %arg21[%c0_90, %c0_91, %c0_92], %161 {strides = array<i32>} : memref<4x8x8xbf16, #tpu.memory_space<vmem>>, vector<4x8x8xbf16>,
      %c0_93 = arith.constant 0 : index
      %c0_94 = arith.constant 0 : index
      %163 = vector.load %arg14[%c0_93, %c0_94] : memref<8x8xbf16, #tpu.memory_space<vmem>>, vector<8x8xbf16>
      %cst_95 = arith.constant dense<0.000000e+00> : vector<32x8xf32>
      %164 = tpu.matmul %157, %163, %cst_95 {dimension_numbers = #tpu.dot_dimension_numbers<[1], [0], [0], [1], [0, 0, 1, 1], [], []>} : vector<32x8xbf16>, vector<8x8xbf16>, vector<32x8xf32> -> vector<32x8xf32>
      %165 = arith.truncf %164 : vector<32x8xf32> to vector<32x8xbf16>
      %166 = vector.shape_cast %165 : vector<32x8xbf16> to vector<4x8x8xbf16>
      %c0_96 = arith.constant 0 : index
      %c0_97 = arith.constant 0 : index
      %c0_98 = arith.constant 0 : index
      %167 = vector.load %arg22[%c0_96, %c0_97, %c0_98] : memref<4x8x8xbf16, #tpu.memory_space<vmem>>, vector<4x8x8xbf16>
      tpu.vector_store %arg22[%c0_96, %c0_97, %c0_98], %166 {strides = array<i32>} : memref<4x8x8xbf16, #tpu.memory_space<vmem>>, vector<4x8x8xbf16>,
    } else {
    }
    %cst_7 = arith.constant dense<0.000000e+00> : vector<8xf32>
    %7 = vector.multi_reduction <add>, %1, %cst_7 [1] : vector<8x32xf32> to vector<8xf32>
    %8 = vector.shape_cast %7 : vector<8xf32> to vector<8x1xf32>
    %cst_8 = arith.constant 3.200000e+01 : f32
    %9 = vector.broadcast %cst_8 : f32 to vector<8x1xf32>
    %10 = arith.divf %8, %9 : vector<8x1xf32>
    %11 = vector.broadcast %10 : vector<8x1xf32> to vector<8x32xf32>
    %12 = arith.subf %1, %11 : vector<8x32xf32>
    %13 = arith.mulf %12, %12 : vector<8x32xf32>
    %cst_9 = arith.constant dense<0.000000e+00> : vector<8xf32>
    %14 = vector.multi_reduction <add>, %13, %cst_9 [1] : vector<8x32xf32> to vector<8xf32>
    %15 = vector.shape_cast %14 : vector<8xf32> to vector<8x1xf32>
    %cst_10 = arith.constant 3.200000e+01 : f32
    %16 = vector.broadcast %cst_10 : f32 to vector<8x1xf32>
    %17 = arith.divf %15, %16 : vector<8x1xf32>
    %cst_11 = arith.constant 9.99999974E-6 : f32
    %18 = vector.broadcast %cst_11 : f32 to vector<8x1xf32>
    %19 = arith.addf %17, %18 : vector<8x1xf32>
    %20 = math.rsqrt %19 : vector<8x1xf32>
    %21 = vector.shape_cast %10 : vector<8x1xf32> to vector<1x8x1xf32>
    %22 = vector.broadcast %21 : vector<1x8x1xf32> to vector<4x8x8xf32>
    %23 = arith.subf %3, %22 : vector<4x8x8xf32>
    %24 = vector.shape_cast %20 : vector<8x1xf32> to vector<1x8x1xf32>
    %25 = vector.broadcast %24 : vector<1x8x1xf32> to vector<4x8x8xf32>
    %26 = arith.mulf %23, %25 : vector<4x8x8xf32>
    %c0_12 = arith.constant 0 : index
    %c0_13 = arith.constant 0 : index
    %c0_14 = arith.constant 0 : index
    %27 = vector.load %arg6[%c0_12, %c0_13, %c0_14] : memref<4x1x8xf32, #tpu.memory_space<vmem>>, vector<4x1x8xf32>
    %28 = vector.broadcast %27 : vector<4x1x8xf32> to vector<4x8x8xf32>
    %29 = arith.mulf %26, %28 : vector<4x8x8xf32>
    %c0_15 = arith.constant 0 : index
    %c0_16 = arith.constant 0 : index
    %c0_17 = arith.constant 0 : index
    %30 = vector.load %arg7[%c0_15, %c0_16, %c0_17] : memref<4x1x8xf32, #tpu.memory_space<vmem>>, vector<4x1x8xf32>
    %31 = vector.broadcast %30 : vector<4x1x8xf32> to vector<4x8x8xf32>
    %32 = arith.addf %29, %31 : vector<4x8x8xf32>
    %cst_18 = arith.constant 0.176776692 : f32
    %33 = vector.broadcast %cst_18 : f32 to vector<4x8x8xf32>
    %34 = arith.mulf %32, %33 : vector<4x8x8xf32>
    %35 = arith.truncf %34 : vector<4x8x8xf32> to vector<4x8x8xbf16>
    %36 = vector.shape_cast %35 : vector<4x8x8xbf16> to vector<32x8xbf16>
    %c0_19 = arith.constant 0 : index
    %c0_20 = arith.constant 0 : index
    %37 = vector.load %arg12[%c0_19, %c0_20] : memref<8x8xbf16, #tpu.memory_space<vmem>>, vector<8x8xbf16>
    %cst_21 = arith.constant dense<0.000000e+00> : vector<32x8xf32>
    %38 = tpu.matmul %36, %37, %cst_21 {dimension_numbers = #tpu.dot_dimension_numbers<[1], [0], [0], [1], [0, 0, 1, 1], [], []>} : vector<32x8xbf16>, vector<8x8xbf16>, vector<32x8xf32> -> vector<32x8xf32>
    %39 = arith.truncf %38 : vector<32x8xf32> to vector<32x8xbf16>
    %40 = vector.shape_cast %39 : vector<32x8xbf16> to vector<4x8x8xbf16>
    %c0_22 = arith.constant 0 : index
    %c0_23 = arith.constant 0 : index
    %c0_24 = arith.constant 0 : index
    %41 = vector.load %arg21[%c0_22, %c0_23, %c0_24] : memref<4x8x8xbf16, #tpu.memory_space<vmem>>, vector<4x8x8xbf16>
    "tpu.trace_start"() <{level = 10 : i32, message = "hqd,hkd->hqk"}> : () -> ()
    %cst_25 = arith.constant dense<0.000000e+00> : vector<4x8x8xf32>
    %42 = tpu.matmul %40, %41, %cst_25 {dimension_numbers = #tpu.dot_dimension_numbers<[2], [2], [1], [1], [0, 0, 0, 1, 1, 1], [0], [0]>} : vector<4x8x8xbf16>, vector<4x8x8xbf16>, vector<4x8x8xf32> -> vector<4x8x8xf32>
    "tpu.trace_stop"() : () -> ()
    %c0_26 = arith.constant 0 : index
    %c0_27 = arith.constant 0 : index
    %c0_28 = arith.constant 0 : index
    %43 = vector.load %arg5[%c0_26, %c0_27, %c0_28] : memref<1x1x8xf32, #tpu.memory_space<vmem>>, vector<1x1x8xf32>
    %44 = vector.shape_cast %43 : vector<1x1x8xf32> to vector<1x8xf32>
    %cst_29 = arith.constant 0.000000e+00 : f32
    %45 = vector.broadcast %cst_29 : f32 to vector<1x8xf32>
    %46 = arith.cmpf oeq, %44, %45 : vector<1x8xf32>
    %cst_30 = arith.constant -1.000000e+20 : f32
    %cst_31 = arith.constant 0.000000e+00 : f32
    %47 = vector.broadcast %cst_30 : f32 to vector<1x8xf32>
    %48 = vector.broadcast %cst_31 : f32 to vector<1x8xf32>
    %49 = arith.select %46, %47, %48 : vector<1x8xi1>, vector<1x8xf32>
    %50 = vector.shape_cast %49 : vector<1x8xf32> to vector<1x1x8xf32>
    %51 = vector.broadcast %50 : vector<1x1x8xf32> to vector<4x8x8xf32>
    %52 = arith.addf %42, %51 : vector<4x8x8xf32>
    %cst_32 = arith.constant dense<0xFF800000> : vector<4x8xf32>
    %53 = vector.multi_reduction <maximumf>, %52, %cst_32 [2] : vector<4x8x8xf32> to vector<4x8xf32>
    %54 = vector.shape_cast %53 : vector<4x8xf32> to vector<4x8x1xf32>
    %55 = vector.broadcast %54 : vector<4x8x1xf32> to vector<4x8x8xf32>
    %56 = arith.subf %52, %55 : vector<4x8x8xf32>
    %57 = math.exp %56 : vector<4x8x8xf32>
    %cst_33 = arith.constant dense<0.000000e+00> : vector<4x8xf32>
    %58 = vector.multi_reduction <add>, %57, %cst_33 [2] : vector<4x8x8xf32> to vector<4x8xf32>
    %59 = vector.shape_cast %58 : vector<4x8xf32> to vector<4x8x1xf32>
    %60 = tpu.reciprocal %59 {approx = true} : vector<4x8x1xf32> -> vector<4x8x1xf32>
    %61 = vector.broadcast %60 : vector<4x8x1xf32> to vector<4x8x8xf32>
    %62 = arith.mulf %57, %61 : vector<4x8x8xf32>
    %63 = arith.truncf %62 : vector<4x8x8xf32> to vector<4x8x8xbf16>
    %c0_34 = arith.constant 0 : index
    %c0_35 = arith.constant 0 : index
    %c0_36 = arith.constant 0 : index
    %c0_37 = arith.constant 0 : index
    %64 = vector.load %arg20[%c0_34, %c0_35, %c0_36, %c0_37] : memref<1x4x8x8xbf16, #tpu.memory_space<vmem>>, vector<1x4x8x8xbf16>
    %65 = vector.shape_cast %64 : vector<1x4x8x8xbf16> to vector<4x8x8xbf16>
    %66 = vector.shape_cast %63 : vector<4x8x8xbf16> to vector<1x4x8x8xbf16>
    tpu.vector_store %arg20[%c0_34, %c0_35, %c0_36, %c0_37], %66 {strides = array<i32>} : memref<1x4x8x8xbf16, #tpu.memory_space<vmem>>, vector<1x4x8x8xbf16>,
    %c0_38 = arith.constant 0 : index
    %c0_39 = arith.constant 0 : index
    %c0_40 = arith.constant 0 : index
    %67 = vector.load %arg22[%c0_38, %c0_39, %c0_40] : memref<4x8x8xbf16, #tpu.memory_space<vmem>>, vector<4x8x8xbf16>
    "tpu.trace_start"() <{level = 10 : i32, message = "hqk,hkd->hqd"}> : () -> ()
    %cst_41 = arith.constant dense<0.000000e+00> : vector<4x8x8xf32>
    %68 = tpu.matmul %63, %67, %cst_41 {dimension_numbers = #tpu.dot_dimension_numbers<[2], [1], [1], [2], [0, 0, 0, 1, 1, 2], [0], [0]>} : vector<4x8x8xbf16>, vector<4x8x8xbf16>, vector<4x8x8xf32> -> vector<4x8x8xf32>
    "tpu.trace_stop"() : () -> ()
    %69 = vector.extract_strided_slice %68 {offsets = [0, 0, 0], sizes = [1, 8, 8], strides = [1, 1, 1]} : vector<4x8x8xf32> to vector<1x8x8xf32>
    %70 = vector.shape_cast %69 : vector<1x8x8xf32> to vector<8x8xf32>
    %71 = arith.truncf %70 : vector<8x8xf32> to vector<8x8xbf16>
    %c0_42 = arith.constant 0 : index
    %c0_43 = arith.constant 0 : index
    %72 = vector.load %arg23[%c0_42, %c0_43] : memref<8x32xbf16, #tpu.memory_space<vmem>>, vector<8x8xbf16>
    tpu.vector_store %arg23[%c0_42, %c0_43], %71 {strides = array<i32>} : memref<8x32xbf16, #tpu.memory_space<vmem>>, vector<8x8xbf16>,
    %73 = vector.extract_strided_slice %68 {offsets = [1, 0, 0], sizes = [1, 8, 8], strides = [1, 1, 1]} : vector<4x8x8xf32> to vector<1x8x8xf32>
    %74 = vector.shape_cast %73 : vector<1x8x8xf32> to vector<8x8xf32>
    %75 = arith.truncf %74 : vector<8x8xf32> to vector<8x8xbf16>
    %c0_44 = arith.constant 0 : index
    %c8 = arith.constant 8 : index
    %76 = vector.load %arg23[%c0_44, %c8] : memref<8x32xbf16, #tpu.memory_space<vmem>>, vector<8x8xbf16>
    tpu.vector_store %arg23[%c0_44, %c8], %75 {strides = array<i32>} : memref<8x32xbf16, #tpu.memory_space<vmem>>, vector<8x8xbf16>,
    %77 = vector.extract_strided_slice %68 {offsets = [2, 0, 0], sizes = [1, 8, 8], strides = [1, 1, 1]} : vector<4x8x8xf32> to vector<1x8x8xf32>
    %78 = vector.shape_cast %77 : vector<1x8x8xf32> to vector<8x8xf32>
    %79 = arith.truncf %78 : vector<8x8xf32> to vector<8x8xbf16>
    %c0_45 = arith.constant 0 : index
    %c16 = arith.constant 16 : index
    %80 = vector.load %arg23[%c0_45, %c16] : memref<8x32xbf16, #tpu.memory_space<vmem>>, vector<8x8xbf16>
    tpu.vector_store %arg23[%c0_45, %c16], %79 {strides = array<i32>} : memref<8x32xbf16, #tpu.memory_space<vmem>>, vector<8x8xbf16>,
    %81 = vector.extract_strided_slice %68 {offsets = [3, 0, 0], sizes = [1, 8, 8], strides = [1, 1, 1]} : vector<4x8x8xf32> to vector<1x8x8xf32>
    %82 = vector.shape_cast %81 : vector<1x8x8xf32> to vector<8x8xf32>
    %83 = arith.truncf %82 : vector<8x8xf32> to vector<8x8xbf16>
    %c0_46 = arith.constant 0 : index
    %c24 = arith.constant 24 : index
    %84 = vector.load %arg23[%c0_46, %c24] : memref<8x32xbf16, #tpu.memory_space<vmem>>, vector<8x8xbf16>
    tpu.vector_store %arg23[%c0_46, %c24], %83 {strides = array<i32>} : memref<8x32xbf16, #tpu.memory_space<vmem>>, vector<8x8xbf16>,
    %c0_47 = arith.constant 0 : index
    %c0_48 = arith.constant 0 : index
    %85 = vector.load %arg23[%c0_47, %c0_48] : memref<8x32xbf16, #tpu.memory_space<vmem>>, vector<8x32xbf16>
    %c0_49 = arith.constant 0 : index
    %c0_50 = arith.constant 0 : index
    %86 = vector.load %arg15[%c0_49, %c0_50] : memref<32x32xbf16, #tpu.memory_space<vmem>>, vector<32x32xbf16>
    %cst_51 = arith.constant dense<0.000000e+00> : vector<8x32xf32>
    %87 = tpu.matmul %85, %86, %cst_51 {dimension_numbers = #tpu.dot_dimension_numbers<[1], [0], [0], [1], [0, 0, 1, 1], [], []>} : vector<8x32xbf16>, vector<32x32xbf16>, vector<8x32xf32> -> vector<8x32xf32>
    %c0_52 = arith.constant 0 : index
    %c0_53 = arith.constant 0 : index
    %88 = vector.load %arg16[%c0_52, %c0_53] : memref<1x32xf32, #tpu.memory_space<vmem>>, vector<1x32xf32>
    %89 = vector.broadcast %88 : vector<1x32xf32> to vector<8x32xf32>
    %90 = arith.addf %87, %89 : vector<8x32xf32>
    %91 = arith.addf %90, %1 : vector<8x32xf32>
    %cst_54 = arith.constant dense<0.000000e+00> : vector<8xf32>
    %92 = vector.multi_reduction <add>, %91, %cst_54 [1] : vector<8x32xf32> to vector<8xf32>
    %93 = vector.shape_cast %92 : vector<8xf32> to vector<8x1xf32>
    %cst_55 = arith.constant 3.200000e+01 : f32
    %94 = vector.broadcast %cst_55 : f32 to vector<8x1xf32>
    %95 = arith.divf %93, %94 : vector<8x1xf32>
    %96 = vector.broadcast %95 : vector<8x1xf32> to vector<8x32xf32>
    %97 = arith.subf %91, %96 : vector<8x32xf32>
    %98 = arith.mulf %97, %97 : vector<8x32xf32>
    %cst_56 = arith.constant dense<0.000000e+00> : vector<8xf32>
    %99 = vector.multi_reduction <add>, %98, %cst_56 [1] : vector<8x32xf32> to vector<8xf32>
    %100 = vector.shape_cast %99 : vector<8xf32> to vector<8x1xf32>
    %cst_57 = arith.constant 3.200000e+01 : f32
    %101 = vector.broadcast %cst_57 : f32 to vector<8x1xf32>
    %102 = arith.divf %100, %101 : vector<8x1xf32>
    %103 = vector.broadcast %95 : vector<8x1xf32> to vector<8x32xf32>
    %104 = arith.subf %91, %103 : vector<8x32xf32>
    %cst_58 = arith.constant 9.99999974E-6 : f32
    %105 = vector.broadcast %cst_58 : f32 to vector<8x1xf32>
    %106 = arith.addf %102, %105 : vector<8x1xf32>
    %107 = math.rsqrt %106 : vector<8x1xf32>
    %108 = vector.broadcast %107 : vector<8x1xf32> to vector<8x32xf32>
    %109 = arith.mulf %104, %108 : vector<8x32xf32>
    %c0_59 = arith.constant 0 : index
    %c0_60 = arith.constant 0 : index
    %110 = vector.load %arg10[%c0_59, %c0_60] : memref<1x32xf32, #tpu.memory_space<vmem>>, vector<1x32xf32>
    %111 = vector.broadcast %110 : vector<1x32xf32> to vector<8x32xf32>
    %112 = arith.mulf %109, %111 : vector<8x32xf32>
    %c0_61 = arith.constant 0 : index
    %c0_62 = arith.constant 0 : index
    %113 = vector.load %arg11[%c0_61, %c0_62] : memref<1x32xf32, #tpu.memory_space<vmem>>, vector<1x32xf32>
    %114 = vector.broadcast %113 : vector<1x32xf32> to vector<8x32xf32>
    %115 = arith.addf %112, %114 : vector<8x32xf32>
    %116 = arith.truncf %115 : vector<8x32xf32> to vector<8x32xbf16>
    %c0_63 = arith.constant 0 : index
    %c0_64 = arith.constant 0 : index
    %117 = vector.load %arg17[%c0_63, %c0_64] : memref<32x32xbf16, #tpu.memory_space<vmem>>, vector<32x32xbf16>
    %cst_65 = arith.constant dense<0.000000e+00> : vector<8x32xf32>
    %118 = tpu.matmul %116, %117, %cst_65 {dimension_numbers = #tpu.dot_dimension_numbers<[1], [0], [0], [1], [0, 0, 1, 1], [], []>} : vector<8x32xbf16>, vector<32x32xbf16>, vector<8x32xf32> -> vector<8x32xf32>
    %c0_66 = arith.constant 0 : index
    %c0_67 = arith.constant 0 : index
    %119 = vector.load %arg18[%c0_66, %c0_67] : memref<1x32xf32, #tpu.memory_space<vmem>>, vector<1x32xf32>
    %120 = vector.broadcast %119 : vector<1x32xf32> to vector<8x32xf32>
    %121 = arith.addf %118, %120 : vector<8x32xf32>
    %cst_68 = arith.constant 0.000000e+00 : f32
    %122 = vector.broadcast %cst_68 : f32 to vector<8x32xf32>
    %123 = arith.maximumf %121, %122 : vector<8x32xf32>
    %124 = arith.addf %123, %91 : vector<8x32xf32>
    %c0_69 = arith.constant 0 : index
    %c0_70 = arith.constant 0 : index
    %c0_71 = arith.constant 0 : index
    %125 = vector.load %arg19[%c0_69, %c0_70, %c0_71] : memref<1x8x32xf32, #tpu.memory_space<vmem>>, vector<1x8x32xf32>
    %126 = vector.shape_cast %125 : vector<1x8x32xf32> to vector<8x32xf32>
    %127 = vector.shape_cast %124 : vector<8x32xf32> to vector<1x8x32xf32>
    tpu.vector_store %arg19[%c0_69, %c0_70, %c0_71], %127 {strides = array<i32>} : memref<1x8x32xf32, #tpu.memory_space<vmem>>, vector<1x8x32xf32>,
    return
  }
  func.func @transform_0(%arg0: i32, %arg1: i32) -> (i32, i32, i32) {
    %c0_i32 = arith.constant 0 : i32
    %c0_i32_0 = arith.constant 0 : i32
    return %arg0, %arg1, %c0_i32 : i32, i32, i32
  }
  func.func @transform_1(%arg0: i32, %arg1: i32) -> (i32, i32, i32, i32) {
    %c0_i32 = arith.constant 0 : i32
    %c0_i32_0 = arith.constant 0 : i32
    %c0_i32_1 = arith.constant 0 : i32
    return %arg0, %c0_i32, %arg1, %c0_i32_0 : i32, i32, i32, i32
  }
  func.func @transform_2(%arg0: i32, %arg1: i32) -> (i32, i32, i32, i32) {
    %c0_i32 = arith.constant 0 : i32
    %c0_i32_0 = arith.constant 0 : i32
    %c0_i32_1 = arith.constant 0 : i32
    %c0_i32_2 = arith.constant 0 : i32
    return %arg0, %c0_i32, %c0_i32_0, %c0_i32_1 : i32, i32, i32, i32
  }
  func.func @transform_3(%arg0: i32, %arg1: i32) -> (i32, i32, i32) {
    %c0_i32 = arith.constant 0 : i32
    %c0_i32_0 = arith.constant 0 : i32
    %c0_i32_1 = arith.constant 0 : i32
    return %arg0, %c0_i32, %c0_i32_0 : i32, i32, i32
  }
  func.func @transform_4(%arg0: i32, %arg1: i32) -> (i32, i32, i32) {
    %c0_i32 = arith.constant 0 : i32
    %c0_i32_0 = arith.constant 0 : i32
    %c0_i32_1 = arith.constant 0 : i32
    %c0_i32_2 = arith.constant 0 : i32
    return %c0_i32, %c0_i32_0, %c0_i32_1 : i32, i32, i32
  }
  func.func @transform_5(%arg0: i32, %arg1: i32) -> (i32, i32, i32) {
    %c0_i32 = arith.constant 0 : i32
    %c0_i32_0 = arith.constant 0 : i32
    %c0_i32_1 = arith.constant 0 : i32
    %c0_i32_2 = arith.constant 0 : i32
    return %c0_i32, %c0_i32_0, %c0_i32_1 : i32, i32, i32
  }
  func.func @transform_6(%arg0: i32, %arg1: i32) -> (i32, i32, i32) {
    %c0_i32 = arith.constant 0 : i32
    %c0_i32_0 = arith.constant 0 : i32
    %c0_i32_1 = arith.constant 0 : i32
    %c0_i32_2 = arith.constant 0 : i32
    return %c0_i32, %c0_i32_0, %c0_i32_1 : i32, i32, i32
  }
  func.func @transform_7(%arg0: i32, %arg1: i32) -> (i32, i32, i32) {
    %c0_i32 = arith.constant 0 : i32
    %c0_i32_0 = arith.constant 0 : i32
    %c0_i32_1 = arith.constant 0 : i32
    %c0_i32_2 = arith.constant 0 : i32
    return %c0_i32, %c0_i32_0, %c0_i32_1 : i32, i32, i32
  }
  func.func @transform_8(%arg0: i32, %arg1: i32) -> (i32, i32) {
    %c0_i32 = arith.constant 0 : i32
    %c0_i32_0 = arith.constant 0 : i32
    %c0_i32_1 = arith.constant 0 : i32
    return %c0_i32, %c0_i32_0 : i32, i32
  }
  func.func @transform_9(%arg0: i32, %arg1: i32) -> (i32, i32) {
    %c0_i32 = arith.constant 0 : i32
    %c0_i32_0 = arith.constant 0 : i32
    %c0_i32_1 = arith.constant 0 : i32
    return %c0_i32, %c0_i32_0 : i32, i32
  }
  func.func @transform_10(%arg0: i32, %arg1: i32) -> (i32, i32) {
    %c0_i32 = arith.constant 0 : i32
    %c0_i32_0 = arith.constant 0 : i32
    %c0_i32_1 = arith.constant 0 : i32
    return %c0_i32, %c0_i32_0 : i32, i32
  }
  func.func @transform_11(%arg0: i32, %arg1: i32) -> (i32, i32) {
    %c0_i32 = arith.constant 0 : i32
    %c0_i32_0 = arith.constant 0 : i32
    %c0_i32_1 = arith.constant 0 : i32
    return %c0_i32, %c0_i32_0 : i32, i32
  }
  func.func @transform_12(%arg0: i32, %arg1: i32) -> (i32, i32) {
    %c0_i32 = arith.constant 0 : i32
    %c0_i32_0 = arith.constant 0 : i32
    %c0_i32_1 = arith.constant 0 : i32
    return %c0_i32, %c0_i32_0 : i32, i32
  }
  func.func @transform_13(%arg0: i32, %arg1: i32) -> (i32, i32) {
    %c0_i32 = arith.constant 0 : i32
    %c0_i32_0 = arith.constant 0 : i32
    %c0_i32_1 = arith.constant 0 : i32
    return %c0_i32, %c0_i32_0 : i32, i32
  }
  func.func @transform_14(%arg0: i32, %arg1: i32) -> (i32, i32) {
    %c0_i32 = arith.constant 0 : i32
    %c0_i32_0 = arith.constant 0 : i32
    %c0_i32_1 = arith.constant 0 : i32
    return %c0_i32, %c0_i32_0 : i32, i32
  }
  func.func @transform_15(%arg0: i32, %arg1: i32) -> (i32, i32) {
    %c0_i32 = arith.constant 0 : i32
    %c0_i32_0 = arith.constant 0 : i32
    %c0_i32_1 = arith.constant 0 : i32
    return %c0_i32, %c0_i32_0 : i32, i32
  }
  func.func @transform_16(%arg0: i32, %arg1: i32) -> (i32, i32) {
    %c0_i32 = arith.constant 0 : i32
    %c0_i32_0 = arith.constant 0 : i32
    %c0_i32_1 = arith.constant 0 : i32
    return %c0_i32, %c0_i32_0 : i32, i32
  }
  func.func @transform_17(%arg0: i32, %arg1: i32) -> (i32, i32, i32) {
    %c0_i32 = arith.constant 0 : i32
    %c0_i32_0 = arith.constant 0 : i32
    return %arg0, %arg1, %c0_i32 : i32, i32, i32
  }
  func.func @transform_18(%arg0: i32, %arg1: i32) -> (i32, i32, i32, i32) {
    %c0_i32 = arith.constant 0 : i32
    %c0_i32_0 = arith.constant 0 : i32
    %c0_i32_1 = arith.constant 0 : i32
    return %arg0, %c0_i32, %arg1, %c0_i32_0 : i32, i32, i32, i32
  }
}

module attributes {stable_mosaic.version = 11 : i64} {
  func.func @_kernel_with_attn(%arg0: i32, %arg1: i32, %arg2: memref<1x8x32xf32, #tpu.memory_space<vmem>>, %arg3: memref<1x4x8x8xf32, #tpu.memory_space<vmem>>, %arg4: memref<1x4x8x8xf32, #tpu.memory_space<vmem>>, %arg5: memref<1x1x8xf32, #tpu.memory_space<vmem>>, %arg6: memref<4x1x8xf32, #tpu.memory_space<vmem>>, %arg7: memref<4x1x8xf32, #tpu.memory_space<vmem>>, %arg8: memref<4x1x8xf32, #tpu.memory_space<vmem>>, %arg9: memref<4x1x8xf32, #tpu.memory_space<vmem>>, %arg10: memref<1x32xf32, #tpu.memory_space<vmem>>, %arg11: memref<1x32xf32, #tpu.memory_space<vmem>>, %arg12: memref<8x8xbf16, #tpu.memory_space<vmem>>, %arg13: memref<8x8xbf16, #tpu.memory_space<vmem>>, %arg14: memref<8x8xbf16, #tpu.memory_space<vmem>>, %arg15: memref<32x32xbf16, #tpu.memory_space<vmem>>, %arg16: memref<1x32xf32, #tpu.memory_space<vmem>>, %arg17: memref<32x32xbf16, #tpu.memory_space<vmem>>, %arg18: memref<1x32xf32, #tpu.memory_space<vmem>>, %arg19: memref<1x8x32xf32, #tpu.memory_space<vmem>>, %arg20: memref<1x4x8x8xbf16, #tpu.memory_space<vmem>>, %arg21: memref<4x8x8xbf16, #tpu.memory_space<vmem>>, %arg22: memref<4x8x8xbf16, #tpu.memory_space<vmem>>, %arg23: memref<8x32xbf16, #tpu.memory_space<vmem>>) attributes {dimension_semantics = [#tpu.dimension_semantics<parallel>, #tpu.dimension_semantics<arbitrary>], iteration_bounds = array<i64: 2, 1>, scalar_prefetch = 0 : i64, scratch_operands = 3 : i64, tpu.core_type = #tpu.core_type<tc>, window_params = [{transform_indices = @transform_0, window_bounds = array<i64: 1, 8, 32>}, {transform_indices = @transform_1, window_bounds = array<i64: 1, 4, 8, 8>}, {transform_indices = @transform_2, window_bounds = array<i64: 1, 4, 8, 8>}, {transform_indices = @transform_3, window_bounds = array<i64: 1, 1, 8>}, {pipeline_mode = #tpu.pipeline_mode<synchronous>, transform_indices = @transform_4, window_bounds = array<i64: 4, 1, 8>}, {pipeline_mode = #tpu.pipeline_mode<synchronous>, transform_indices = @transform_5, window_bounds = array<i64: 4, 1, 8>}, {pipeline_mode = #tpu.pipeline_mode<synchronous>, transform_indices = @transform_6, window_bounds = array<i64: 4, 1, 8>}, {pipeline_mode = #tpu.pipeline_mode<synchronous>, transform_indices = @transform_7, window_bounds = array<i64: 4, 1, 8>}, {pipeline_mode = #tpu.pipeline_mode<synchronous>, transform_indices = @transform_8, window_bounds = array<i64: 1, 32>}, {pipeline_mode = #tpu.pipeline_mode<synchronous>, transform_indices = @transform_9, window_bounds = array<i64: 1, 32>}, {pipeline_mode = #tpu.pipeline_mode<synchronous>, transform_indices = @transform_10, window_bounds = array<i64: 8, 8>}, {pipeline_mode = #tpu.pipeline_mode<synchronous>, transform_indices = @transform_11, window_bounds = array<i64: 8, 8>}, {pipeline_mode = #tpu.pipeline_mode<synchronous>, transform_indices = @transform_12, window_bounds = array<i64: 8, 8>}, {pipeline_mode = #tpu.pipeline_mode<synchronous>, transform_indices = @transform_13, window_bounds = array<i64: 32, 32>}, {pipeline_mode = #tpu.pipeline_mode<synchronous>, transform_indices = @transform_14, window_bounds = array<i64: 1, 32>}, {pipeline_mode = #tpu.pipeline_mode<synchronous>, transform_indices = @transform_15, window_bounds = array<i64: 32, 32>}, {pipeline_mode = #tpu.pipeline_mode<synchronous>, transform_indices = @transform_16, window_bounds = array<i64: 1, 32>}, {transform_indices = @transform_17, window_bounds = array<i64: 1, 8, 32>}, {transform_indices = @transform_18, window_bounds = array<i64: 1, 4, 8, 8>}]} {
    %c0 = arith.constant 0 : index
    %c0_0 = arith.constant 0 : index
    %c0_1 = arith.constant 0 : index
    %0 = vector.load %arg2[%c0, %c0_0, %c0_1] : memref<1x8x32xf32, #tpu.memory_space<vmem>>, vector<1x8x32xf32>
    %1 = vector.shape_cast %0 : vector<1x8x32xf32> to vector<8x32xf32>
    %c0_2 = arith.constant 0 : index
    %c0_3 = arith.constant 0 : index
    %c0_4 = arith.constant 0 : index
    %c0_5 = arith.constant 0 : index
    %2 = vector.load %arg3[%c0_2, %c0_3, %c0_4, %c0_5] : memref<1x4x8x8xf32, #tpu.memory_space<vmem>>, vector<1x4x8x8xf32>
    %3 = vector.shape_cast %2 : vector<1x4x8x8xf32> to vector<4x8x8xf32>
    %c0_i32 = arith.constant 0 : i32
    %4 = arith.cmpi eq, %arg1, %c0_i32 : i32
    %5 = arith.extui %4 : i1 to i32
    %cst = arith.constant 3.125000e-02 : f32
    %c0_i32_6 = arith.constant 0 : i32
    %6 = arith.cmpi ne, %5, %c0_i32_6 : i32
    scf.if %6 {
      %c0_72 = arith.constant 0 : index
      %c0_73 = arith.constant 0 : index
      %c0_74 = arith.constant 0 : index
      %c0_75 = arith.constant 0 : index
      %128 = vector.load %arg4[%c0_72, %c0_73, %c0_74, %c0_75] : memref<1x4x8x8xf32, #tpu.memory_space<vmem>>, vector<1x4x8x8xf32>
      %129 = vector.shape_cast %128 : vector<1x4x8x8xf32> to vector<4x8x8xf32>
      %cst_76 = arith.constant dense<0.000000e+00> : vector<4x8xf32>
      %130 = vector.multi_reduction <add>, %129, %cst_76 [2] : vector<4x8x8xf32> to vector<4x8xf32>
      %131 = vector.shape_cast %130 : vector<4x8xf32> to vector<4x8x1xf32>
      %cst_77 = arith.constant dense<0.000000e+00> : vector<8x1xf32>
      %132 = vector.multi_reduction <add>, %131, %cst_77 [0] : vector<4x8x1xf32> to vector<8x1xf32>
      %133 = vector.shape_cast %132 : vector<8x1xf32> to vector<1x8x1xf32>
      %134 = vector.broadcast %cst : f32 to vector<1x8x1xf32>
      %135 = arith.mulf %133, %134 : vector<1x8x1xf32>
      %136 = vector.broadcast %135 : vector<1x8x1xf32> to vector<4x8x8xf32>
      %137 = arith.subf %129, %136 : vector<4x8x8xf32>
      %138 = arith.mulf %137, %137 : vector<4x8x8xf32>
      %cst_78 = arith.constant dense<0.000000e+00> : vector<4x8xf32>
      %139 = vector.multi_reduction <add>, %138, %cst_78 [2] : vector<4x8x8xf32> to vector<4x8xf32>
      %140 = vector.shape_cast %139 : vector<4x8xf32> to vector<4x8x1xf32>
      %cst_79 = arith.constant dense<0.000000e+00> : vector<8x1xf32>
      %141 = vector.multi_reduction <add>, %140, %cst_79 [0] : vector<4x8x1xf32> to vector<8x1xf32>
      %142 = vector.shape_cast %141 : vector<8x1xf32> to vector<1x8x1xf32>
      %143 = vector.broadcast %cst : f32 to vector<1x8x1xf32>
      %144 = arith.mulf %142, %143 : vector<1x8x1xf32>
      %cst_80 = arith.constant 9.99999974E-6 : f32
      %145 = vector.broadcast %cst_80 : f32 to vector<1x8x1xf32>
      %146 = arith.addf %144, %145 : vector<1x8x1xf32>
      %147 = math.rsqrt %146 : vector<1x8x1xf32>
      %148 = vector.broadcast %147 : vector<1x8x1xf32> to vector<4x8x8xf32>
      %149 = arith.mulf %137, %148 : vector<4x8x8xf32>
      %c0_81 = arith.constant 0 : index
      %c0_82 = arith.constant 0 : index
      %c0_83 = arith.constant 0 : index
      %150 = vector.load %arg8[%c0_81, %c0_82, %c0_83] : memref<4x1x8xf32, #tpu.memory_space<vmem>>, vector<4x1x8xf32>
      %151 = vector.broadcast %150 : vector<4x1x8xf32> to vector<4x8x8xf32>
      %152 = arith.mulf %149, %151 : vector<4x8x8xf32>
      %c0_84 = arith.constant 0 : index
      %c0_85 = arith.constant 0 : index
      %c0_86 = arith.constant 0 : index
      %153 = vector.load %arg9[%c0_84, %c0_85, %c0_86] : memref<4x1x8xf32, #tpu.memory_space<vmem>>, vector<4x1x8xf32>
      %154 = vector.broadcast %153 : vector<4x1x8xf32> to vector<4x8x8xf32>
      %155 = arith.addf %152, %154 : vector<4x8x8xf32>
      %156 = arith.truncf %155 : vector<4x8x8xf32> to vector<4x8x8xbf16>
      %157 = vector.shape_cast %156 : vector<4x8x8xbf16> to vector<32x8xbf16>
      %c0_87 = arith.constant 0 : index
      %c0_88 = arith.constant 0 : index
      %158 = vector.load %arg13[%c0_87, %c0_88] : memref<8x8xbf16, #tpu.memory_space<vmem>>, vector<8x8xbf16>
      %cst_89 = arith.constant dense<0.000000e+00> : vector<32x8xf32>
      %159 = tpu.matmul %157, %158, %cst_89 {dimension_numbers = #tpu.dot_dimension_numbers<[1], [0], [0], [1], [0, 0, 1, 1], [], []>} : vector<32x8xbf16>, vector<8x8xbf16>, vector<32x8xf32> -> vector<32x8xf32>
      %160 = arith.truncf %159 : vector<32x8xf32> to vector<32x8xbf16>
      %161 = vector.shape_cast %160 : vector<32x8xbf16> to vector<4x8x8xbf16>
      %c0_90 = arith.constant 0 : index
      %c0_91 = arith.constant 0 : index
      %c0_92 = arith.constant 0 : index
      %162 = vector.load %arg21[%c0_90, %c0_91, %c0_92] : memref<4x8x8xbf16, #tpu.memory_space<vmem>>, vector<4x8x8xbf16>
      tpu.vector_store %arg21[%c0_90, %c0_91, %c0_92], %161 {strides = array<i32>} : memref<4x8x8xbf16, #tpu.memory_space<vmem>>, vector<4x8x8xbf16>,
      %c0_93 = arith.constant 0 : index
      %c0_94 = arith.constant 0 : index
      %163 = vector.load %arg14[%c0_93, %c0_94] : memref<8x8xbf16, #tpu.memory_space<vmem>>, vector<8x8xbf16>
      %cst_95 = arith.constant dense<0.000000e+00> : vector<32x8xf32>
      %164 = tpu.matmul %157, %163, %cst_95 {dimension_numbers = #tpu.dot_dimension_numbers<[1], [0], [0], [1], [0, 0, 1, 1], [], []>} : vector<32x8xbf16>, vector<8x8xbf16>, vector<32x8xf32> -> vector<32x8xf32>
      %165 = arith.truncf %164 : vector<32x8xf32> to vector<32x8xbf16>
      %166 = vector.shape_cast %165 : vector<32x8xbf16> to vector<4x8x8xbf16>
      %c0_96 = arith.constant 0 : index
      %c0_97 = arith.constant 0 : index
      %c0_98 = arith.constant 0 : index
      %167 = vector.load %arg22[%c0_96, %c0_97, %c0_98] : memref<4x8x8xbf16, #tpu.memory_space<vmem>>, vector<4x8x8xbf16>
      tpu.vector_store %arg22[%c0_96, %c0_97, %c0_98], %166 {strides = array<i32>} : memref<4x8x8xbf16, #tpu.memory_space<vmem>>, vector<4x8x8xbf16>,
    } else {
    }
    %cst_7 = arith.constant dense<0.000000e+00> : vector<8xf32>
    %7 = vector.multi_reduction <add>, %1, %cst_7 [1] : vector<8x32xf32> to vector<8xf32>
    %8 = vector.shape_cast %7 : vector<8xf32> to vector<8x1xf32>
    %cst_8 = arith.constant 3.200000e+01 : f32
    %9 = vector.broadcast %cst_8 : f32 to vector<8x1xf32>
    %10 = arith.divf %8, %9 : vector<8x1xf32>
    %11 = vector.broadcast %10 : vector<8x1xf32> to vector<8x32xf32>
    %12 = arith.subf %1, %11 : vector<8x32xf32>
    %13 = arith.mulf %12, %12 : vector<8x32xf32>
    %cst_9 = arith.constant dense<0.000000e+00> : vector<8xf32>
    %14 = vector.multi_reduction <add>, %13, %cst_9 [1] : vector<8x32xf32> to vector<8xf32>
    %15 = vector.shape_cast %14 : vector<8xf32> to vector<8x1xf32>
    %cst_10 = arith.constant 3.200000e+01 : f32
    %16 = vector.broadcast %cst_10 : f32 to vector<8x1xf32>
    %17 = arith.divf %15, %16 : vector<8x1xf32>
    %cst_11 = arith.constant 9.99999974E-6 : f32
    %18 = vector.broadcast %cst_11 : f32 to vector<8x1xf32>
    %19 = arith.addf %17, %18 : vector<8x1xf32>
    %20 = math.rsqrt %19 : vector<8x1xf32>
    %21 = vector.shape_cast %10 : vector<8x1xf32> to vector<1x8x1xf32>
    %22 = vector.broadcast %21 : vector<1x8x1xf32> to vector<4x8x8xf32>
    %23 = arith.subf %3, %22 : vector<4x8x8xf32>
    %24 = vector.shape_cast %20 : vector<8x1xf32> to vector<1x8x1xf32>
    %25 = vector.broadcast %24 : vector<1x8x1xf32> to vector<4x8x8xf32>
    %26 = arith.mulf %23, %25 : vector<4x8x8xf32>
    %c0_12 = arith.constant 0 : index
    %c0_13 = arith.constant 0 : index
    %c0_14 = arith.constant 0 : index
    %27 = vector.load %arg6[%c0_12, %c0_13, %c0_14] : memref<4x1x8xf32, #tpu.memory_space<vmem>>, vector<4x1x8xf32>
    %28 = vector.broadcast %27 : vector<4x1x8xf32> to vector<4x8x8xf32>
    %29 = arith.mulf %26, %28 : vector<4x8x8xf32>
    %c0_15 = arith.constant 0 : index
    %c0_16 = arith.constant 0 : index
    %c0_17 = arith.constant 0 : index
    %30 = vector.load %arg7[%c0_15, %c0_16, %c0_17] : memref<4x1x8xf32, #tpu.memory_space<vmem>>, vector<4x1x8xf32>
    %31 = vector.broadcast %30 : vector<4x1x8xf32> to vector<4x8x8xf32>
    %32 = arith.addf %29, %31 : vector<4x8x8xf32>
    %cst_18 = arith.constant 0.176776692 : f32
    %33 = vector.broadcast %cst_18 : f32 to vector<4x8x8xf32>
    %34 = arith.mulf %32, %33 : vector<4x8x8xf32>
    %35 = arith.truncf %34 : vector<4x8x8xf32> to vector<4x8x8xbf16>
    %36 = vector.shape_cast %35 : vector<4x8x8xbf16> to vector<32x8xbf16>
    %c0_19 = arith.constant 0 : index
    %c0_20 = arith.constant 0 : index
    %37 = vector.load %arg12[%c0_19, %c0_20] : memref<8x8xbf16, #tpu.memory_space<vmem>>, vector<8x8xbf16>
    %cst_21 = arith.constant dense<0.000000e+00> : vector<32x8xf32>
    %38 = tpu.matmul %36, %37, %cst_21 {dimension_numbers = #tpu.dot_dimension_numbers<[1], [0], [0], [1], [0, 0, 1, 1], [], []>} : vector<32x8xbf16>, vector<8x8xbf16>, vector<32x8xf32> -> vector<32x8xf32>
    %39 = arith.truncf %38 : vector<32x8xf32> to vector<32x8xbf16>
    %40 = vector.shape_cast %39 : vector<32x8xbf16> to vector<4x8x8xbf16>
    %c0_22 = arith.constant 0 : index
    %c0_23 = arith.constant 0 : index
    %c0_24 = arith.constant 0 : index
    %41 = vector.load %arg21[%c0_22, %c0_23, %c0_24] : memref<4x8x8xbf16, #tpu.memory_space<vmem>>, vector<4x8x8xbf16>
    "tpu.trace_start"() <{level = 10 : i32, message = "hqd,hkd->hqk"}> : () -> ()
    %cst_25 = arith.constant dense<0.000000e+00> : vector<4x8x8xf32>
    %42 = tpu.matmul %40, %41, %cst_25 {dimension_numbers = #tpu.dot_dimension_numbers<[2], [2], [1], [1], [0, 0, 0, 1, 1, 1], [0], [0]>} : vector<4x8x8xbf16>, vector<4x8x8xbf16>, vector<4x8x8xf32> -> vector<4x8x8xf32>
    "tpu.trace_stop"() : () -> ()
    %c0_26 = arith.constant 0 : index
    %c0_27 = arith.constant 0 : index
    %c0_28 = arith.constant 0 : index
    %43 = vector.load %arg5[%c0_26, %c0_27, %c0_28] : memref<1x1x8xf32, #tpu.memory_space<vmem>>, vector<1x1x8xf32>
    %44 = vector.shape_cast %43 : vector<1x1x8xf32> to vector<1x8xf32>
    %cst_29 = arith.constant 0.000000e+00 : f32
    %45 = vector.broadcast %cst_29 : f32 to vector<1x8xf32>
    %46 = arith.cmpf oeq, %44, %45 : vector<1x8xf32>
    %cst_30 = arith.constant -1.000000e+20 : f32
    %cst_31 = arith.constant 0.000000e+00 : f32
    %47 = vector.broadcast %cst_30 : f32 to vector<1x8xf32>
    %48 = vector.broadcast %cst_31 : f32 to vector<1x8xf32>
    %49 = arith.select %46, %47, %48 : vector<1x8xi1>, vector<1x8xf32>
    %50 = vector.shape_cast %49 : vector<1x8xf32> to vector<1x1x8xf32>
    %51 = vector.broadcast %50 : vector<1x1x8xf32> to vector<4x8x8xf32>
    %52 = arith.addf %42, %51 : vector<4x8x8xf32>
    %cst_32 = arith.constant dense<0xFF800000> : vector<4x8xf32>
    %53 = vector.multi_reduction <maximumf>, %52, %cst_32 [2] : vector<4x8x8xf32> to vector<4x8xf32>
    %54 = vector.shape_cast %53 : vector<4x8xf32> to vector<4x8x1xf32>
    %55 = vector.broadcast %54 : vector<4x8x1xf32> to vector<4x8x8xf32>
    %56 = arith.subf %52, %55 : vector<4x8x8xf32>
    %57 = math.exp %56 : vector<4x8x8xf32>
    %cst_33 = arith.constant dense<0.000000e+00> : vector<4x8xf32>
    %58 = vector.multi_reduction <add>, %57, %cst_33 [2] : vector<4x8x8xf32> to vector<4x8xf32>
    %59 = vector.shape_cast %58 : vector<4x8xf32> to vector<4x8x1xf32>
    %60 = tpu.reciprocal %59 {approx = true} : vector<4x8x1xf32> -> vector<4x8x1xf32>
    %61 = vector.broadcast %60 : vector<4x8x1xf32> to vector<4x8x8xf32>
    %62 = arith.mulf %57, %61 : vector<4x8x8xf32>
    %63 = arith.truncf %62 : vector<4x8x8xf32> to vector<4x8x8xbf16>
    %c0_34 = arith.constant 0 : index
    %c0_35 = arith.constant 0 : index
    %c0_36 = arith.constant 0 : index
    %c0_37 = arith.constant 0 : index
    %64 = vector.load %arg20[%c0_34, %c0_35, %c0_36, %c0_37] : memref<1x4x8x8xbf16, #tpu.memory_space<vmem>>, vector<1x4x8x8xbf16>
    %65 = vector.shape_cast %64 : vector<1x4x8x8xbf16> to vector<4x8x8xbf16>
    %66 = vector.shape_cast %63 : vector<4x8x8xbf16> to vector<1x4x8x8xbf16>
    tpu.vector_store %arg20[%c0_34, %c0_35, %c0_36, %c0_37], %66 {strides = array<i32>} : memref<1x4x8x8xbf16, #tpu.memory_space<vmem>>, vector<1x4x8x8xbf16>,
    %c0_38 = arith.constant 0 : index
    %c0_39 = arith.constant 0 : index
    %c0_40 = arith.constant 0 : index
    %67 = vector.load %arg22[%c0_38, %c0_39, %c0_40] : memref<4x8x8xbf16, #tpu.memory_space<vmem>>, vector<4x8x8xbf16>
    "tpu.trace_start"() <{level = 10 : i32, message = "hqk,hkd->hqd"}> : () -> ()
    %cst_41 = arith.constant dense<0.000000e+00> : vector<4x8x8xf32>
    %68 = tpu.matmul %63, %67, %cst_41 {dimension_numbers = #tpu.dot_dimension_numbers<[2], [1], [1], [2], [0, 0, 0, 1, 1, 2], [0], [0]>} : vector<4x8x8xbf16>, vector<4x8x8xbf16>, vector<4x8x8xf32> -> vector<4x8x8xf32>
    "tpu.trace_stop"() : () -> ()
    %69 = vector.extract_strided_slice %68 {offsets = [0, 0, 0], sizes = [1, 8, 8], strides = [1, 1, 1]} : vector<4x8x8xf32> to vector<1x8x8xf32>
    %70 = vector.shape_cast %69 : vector<1x8x8xf32> to vector<8x8xf32>
    %71 = arith.truncf %70 : vector<8x8xf32> to vector<8x8xbf16>
    %c0_42 = arith.constant 0 : index
    %c0_43 = arith.constant 0 : index
    %72 = vector.load %arg23[%c0_42, %c0_43] : memref<8x32xbf16, #tpu.memory_space<vmem>>, vector<8x8xbf16>
    tpu.vector_store %arg23[%c0_42, %c0_43], %71 {strides = array<i32>} : memref<8x32xbf16, #tpu.memory_space<vmem>>, vector<8x8xbf16>,
    %73 = vector.extract_strided_slice %68 {offsets = [1, 0, 0], sizes = [1, 8, 8], strides = [1, 1, 1]} : vector<4x8x8xf32> to vector<1x8x8xf32>
    %74 = vector.shape_cast %73 : vector<1x8x8xf32> to vector<8x8xf32>
    %75 = arith.truncf %74 : vector<8x8xf32> to vector<8x8xbf16>
    %c0_44 = arith.constant 0 : index
    %c8 = arith.constant 8 : index
    %76 = vector.load %arg23[%c0_44, %c8] : memref<8x32xbf16, #tpu.memory_space<vmem>>, vector<8x8xbf16>
    tpu.vector_store %arg23[%c0_44, %c8], %75 {strides = array<i32>} : memref<8x32xbf16, #tpu.memory_space<vmem>>, vector<8x8xbf16>,
    %77 = vector.extract_strided_slice %68 {offsets = [2, 0, 0], sizes = [1, 8, 8], strides = [1, 1, 1]} : vector<4x8x8xf32> to vector<1x8x8xf32>
    %78 = vector.shape_cast %77 : vector<1x8x8xf32> to vector<8x8xf32>
    %79 = arith.truncf %78 : vector<8x8xf32> to vector<8x8xbf16>
    %c0_45 = arith.constant 0 : index
    %c16 = arith.constant 16 : index
    %80 = vector.load %arg23[%c0_45, %c16] : memref<8x32xbf16, #tpu.memory_space<vmem>>, vector<8x8xbf16>
    tpu.vector_store %arg23[%c0_45, %c16], %79 {strides = array<i32>} : memref<8x32xbf16, #tpu.memory_space<vmem>>, vector<8x8xbf16>,
    %81 = vector.extract_strided_slice %68 {offsets = [3, 0, 0], sizes = [1, 8, 8], strides = [1, 1, 1]} : vector<4x8x8xf32> to vector<1x8x8xf32>
    %82 = vector.shape_cast %81 : vector<1x8x8xf32> to vector<8x8xf32>
    %83 = arith.truncf %82 : vector<8x8xf32> to vector<8x8xbf16>
    %c0_46 = arith.constant 0 : index
    %c24 = arith.constant 24 : index
    %84 = vector.load %arg23[%c0_46, %c24] : memref<8x32xbf16, #tpu.memory_space<vmem>>, vector<8x8xbf16>
    tpu.vector_store %arg23[%c0_46, %c24], %83 {strides = array<i32>} : memref<8x32xbf16, #tpu.memory_space<vmem>>, vector<8x8xbf16>,
    %c0_47 = arith.constant 0 : index
    %c0_48 = arith.constant 0 : index
    %85 = vector.load %arg23[%c0_47, %c0_48] : memref<8x32xbf16, #tpu.memory_space<vmem>>, vector<8x32xbf16>
    %c0_49 = arith.constant 0 : index
    %c0_50 = arith.constant 0 : index
    %86 = vector.load %arg15[%c0_49, %c0_50] : memref<32x32xbf16, #tpu.memory_space<vmem>>, vector<32x32xbf16>
    %cst_51 = arith.constant dense<0.000000e+00> : vector<8x32xf32>
    %87 = tpu.matmul %85, %86, %cst_51 {dimension_numbers = #tpu.dot_dimension_numbers<[1], [0], [0], [1], [0, 0, 1, 1], [], []>} : vector<8x32xbf16>, vector<32x32xbf16>, vector<8x32xf32> -> vector<8x32xf32>
    %c0_52 = arith.constant 0 : index
    %c0_53 = arith.constant 0 : index
    %88 = vector.load %arg16[%c0_52, %c0_53] : memref<1x32xf32, #tpu.memory_space<vmem>>, vector<1x32xf32>
    %89 = vector.broadcast %88 : vector<1x32xf32> to vector<8x32xf32>
    %90 = arith.addf %87, %89 : vector<8x32xf32>
    %91 = arith.addf %90, %1 : vector<8x32xf32>
    %cst_54 = arith.constant dense<0.000000e+00> : vector<8xf32>
    %92 = vector.multi_reduction <add>, %91, %cst_54 [1] : vector<8x32xf32> to vector<8xf32>
    %93 = vector.shape_cast %92 : vector<8xf32> to vector<8x1xf32>
    %cst_55 = arith.constant 3.200000e+01 : f32
    %94 = vector.broadcast %cst_55 : f32 to vector<8x1xf32>
    %95 = arith.divf %93, %94 : vector<8x1xf32>
    %96 = vector.broadcast %95 : vector<8x1xf32> to vector<8x32xf32>
    %97 = arith.subf %91, %96 : vector<8x32xf32>
    %98 = arith.mulf %97, %97 : vector<8x32xf32>
    %cst_56 = arith.constant dense<0.000000e+00> : vector<8xf32>
    %99 = vector.multi_reduction <add>, %98, %cst_56 [1] : vector<8x32xf32> to vector<8xf32>
    %100 = vector.shape_cast %99 : vector<8xf32> to vector<8x1xf32>
    %cst_57 = arith.constant 3.200000e+01 : f32
    %101 = vector.broadcast %cst_57 : f32 to vector<8x1xf32>
    %102 = arith.divf %100, %101 : vector<8x1xf32>
    %103 = vector.broadcast %95 : vector<8x1xf32> to vector<8x32xf32>
    %104 = arith.subf %91, %103 : vector<8x32xf32>
    %cst_58 = arith.constant 9.99999974E-6 : f32
    %105 = vector.broadcast %cst_58 : f32 to vector<8x1xf32>
    %106 = arith.addf %102, %105 : vector<8x1xf32>
    %107 = math.rsqrt %106 : vector<8x1xf32>
    %108 = vector.broadcast %107 : vector<8x1xf32> to vector<8x32xf32>
    %109 = arith.mulf %104, %108 : vector<8x32xf32>
    %c0_59 = arith.constant 0 : index
    %c0_60 = arith.constant 0 : index
    %110 = vector.load %arg10[%c0_59, %c0_60] : memref<1x32xf32, #tpu.memory_space<vmem>>, vector<1x32xf32>
    %111 = vector.broadcast %110 : vector<1x32xf32> to vector<8x32xf32>
    %112 = arith.mulf %109, %111 : vector<8x32xf32>
    %c0_61 = arith.constant 0 : index
    %c0_62 = arith.constant 0 : index
    %113 = vector.load %arg11[%c0_61, %c0_62] : memref<1x32xf32, #tpu.memory_space<vmem>>, vector<1x32xf32>
    %114 = vector.broadcast %113 : vector<1x32xf32> to vector<8x32xf32>
    %115 = arith.addf %112, %114 : vector<8x32xf32>
    %116 = arith.truncf %115 : vector<8x32xf32> to vector<8x32xbf16>
    %c0_63 = arith.constant 0 : index
    %c0_64 = arith.constant 0 : index
    %117 = vector.load %arg17[%c0_63, %c0_64] : memref<32x32xbf16, #tpu.memory_space<vmem>>, vector<32x32xbf16>
    %cst_65 = arith.constant dense<0.000000e+00> : vector<8x32xf32>
    %118 = tpu.matmul %116, %117, %cst_65 {dimension_numbers = #tpu.dot_dimension_numbers<[1], [0], [0], [1], [0, 0, 1, 1], [], []>} : vector<8x32xbf16>, vector<32x32xbf16>, vector<8x32xf32> -> vector<8x32xf32>
    %c0_66 = arith.constant 0 : index
    %c0_67 = arith.constant 0 : index
    %119 = vector.load %arg18[%c0_66, %c0_67] : memref<1x32xf32, #tpu.memory_space<vmem>>, vector<1x32xf32>
    %120 = vector.broadcast %119 : vector<1x32xf32> to vector<8x32xf32>
    %121 = arith.addf %118, %120 : vector<8x32xf32>
    %cst_68 = arith.constant 0.000000e+00 : f32
    %122 = vector.broadcast %cst_68 : f32 to vector<8x32xf32>
    %123 = arith.maximumf %121, %122 : vector<8x32xf32>
    %124 = arith.addf %123, %91 : vector<8x32xf32>
    %c0_69 = arith.constant 0 : index
    %c0_70 = arith.constant 0 : index
    %c0_71 = arith.constant 0 : index
    %125 = vector.load %arg19[%c0_69, %c0_70, %c0_71] : memref<1x8x32xf32, #tpu.memory_space<vmem>>, vector<1x8x32xf32>
    %126 = vector.shape_cast %125 : vector<1x8x32xf32> to vector<8x32xf32>
    %127 = vector.shape_cast %124 : vector<8x32xf32> to vector<1x8x32xf32>
    tpu.vector_store %arg19[%c0_69, %c0_70, %c0_71], %127 {strides = array<i32>} : memref<1x8x32xf32, #tpu.memory_space<vmem>>, vector<1x8x32xf32>,
    return
  }
  func.func @transform_0(%arg0: i32, %arg1: i32) -> (i32, i32, i32) {
    %c0_i32 = arith.constant 0 : i32
    %c0_i32_0 = arith.constant 0 : i32
    return %arg0, %arg1, %c0_i32 : i32, i32, i32
  }
  func.func @transform_1(%arg0: i32, %arg1: i32) -> (i32, i32, i32, i32) {
    %c0_i32 = arith.constant 0 : i32
    %c0_i32_0 = arith.constant 0 : i32
    %c0_i32_1 = arith.constant 0 : i32
    return %arg0, %c0_i32, %arg1, %c0_i32_0 : i32, i32, i32, i32
  }
  func.func @transform_2(%arg0: i32, %arg1: i32) -> (i32, i32, i32, i32) {
    %c0_i32 = arith.constant 0 : i32
    %c0_i32_0 = arith.constant 0 : i32
    %c0_i32_1 = arith.constant 0 : i32
    %c0_i32_2 = arith.constant 0 : i32
    return %arg0, %c0_i32, %c0_i32_0, %c0_i32_1 : i32, i32, i32, i32
  }
  func.func @transform_3(%arg0: i32, %arg1: i32) -> (i32, i32, i32) {
    %c0_i32 = arith.constant 0 : i32
    %c0_i32_0 = arith.constant 0 : i32
    %c0_i32_1 = arith.constant 0 : i32
    return %arg0, %c0_i32, %c0_i32_0 : i32, i32, i32
  }
  func.func @transform_4(%arg0: i32, %arg1: i32) -> (i32, i32, i32) {
    %c0_i32 = arith.constant 0 : i32
    %c0_i32_0 = arith.constant 0 : i32
    %c0_i32_1 = arith.constant 0 : i32
    %c0_i32_2 = arith.constant 0 : i32
    return %c0_i32, %c0_i32_0, %c0_i32_1 : i32, i32, i32
  }
  func.func @transform_5(%arg0: i32, %arg1: i32) -> (i32, i32, i32) {
    %c0_i32 = arith.constant 0 : i32
    %c0_i32_0 = arith.constant 0 : i32
    %c0_i32_1 = arith.constant 0 : i32
    %c0_i32_2 = arith.constant 0 : i32
    return %c0_i32, %c0_i32_0, %c0_i32_1 : i32, i32, i32
  }
  func.func @transform_6(%arg0: i32, %arg1: i32) -> (i32, i32, i32) {
    %c0_i32 = arith.constant 0 : i32
    %c0_i32_0 = arith.constant 0 : i32
    %c0_i32_1 = arith.constant 0 : i32
    %c0_i32_2 = arith.constant 0 : i32
    return %c0_i32, %c0_i32_0, %c0_i32_1 : i32, i32, i32
  }
  func.func @transform_7(%arg0: i32, %arg1: i32) -> (i32, i32, i32) {
    %c0_i32 = arith.constant 0 : i32
    %c0_i32_0 = arith.constant 0 : i32
    %c0_i32_1 = arith.constant 0 : i32
    %c0_i32_2 = arith.constant 0 : i32
    return %c0_i32, %c0_i32_0, %c0_i32_1 : i32, i32, i32
  }
  func.func @transform_8(%arg0: i32, %arg1: i32) -> (i32, i32) {
    %c0_i32 = arith.constant 0 : i32
    %c0_i32_0 = arith.constant 0 : i32
    %c0_i32_1 = arith.constant 0 : i32
    return %c0_i32, %c0_i32_0 : i32, i32
  }
  func.func @transform_9(%arg0: i32, %arg1: i32) -> (i32, i32) {
    %c0_i32 = arith.constant 0 : i32
    %c0_i32_0 = arith.constant 0 : i32
    %c0_i32_1 = arith.constant 0 : i32
    return %c0_i32, %c0_i32_0 : i32, i32
  }
  func.func @transform_10(%arg0: i32, %arg1: i32) -> (i32, i32) {
    %c0_i32 = arith.constant 0 : i32
    %c0_i32_0 = arith.constant 0 : i32
    %c0_i32_1 = arith.constant 0 : i32
    return %c0_i32, %c0_i32_0 : i32, i32
  }
  func.func @transform_11(%arg0: i32, %arg1: i32) -> (i32, i32) {
    %c0_i32 = arith.constant 0 : i32
    %c0_i32_0 = arith.constant 0 : i32
    %c0_i32_1 = arith.constant 0 : i32
    return %c0_i32, %c0_i32_0 : i32, i32
  }
  func.func @transform_12(%arg0: i32, %arg1: i32) -> (i32, i32) {
    %c0_i32 = arith.constant 0 : i32
    %c0_i32_0 = arith.constant 0 : i32
    %c0_i32_1 = arith.constant 0 : i32
    return %c0_i32, %c0_i32_0 : i32, i32
  }
  func.func @transform_13(%arg0: i32, %arg1: i32) -> (i32, i32) {
    %c0_i32 = arith.constant 0 : i32
    %c0_i32_0 = arith.constant 0 : i32
    %c0_i32_1 = arith.constant 0 : i32
    return %c0_i32, %c0_i32_0 : i32, i32
  }
  func.func @transform_14(%arg0: i32, %arg1: i32) -> (i32, i32) {
    %c0_i32 = arith.constant 0 : i32
    %c0_i32_0 = arith.constant 0 : i32
    %c0_i32_1 = arith.constant 0 : i32
    return %c0_i32, %c0_i32_0 : i32, i32
  }
  func.func @transform_15(%arg0: i32, %arg1: i32) -> (i32, i32) {
    %c0_i32 = arith.constant 0 : i32
    %c0_i32_0 = arith.constant 0 : i32
    %c0_i32_1 = arith.constant 0 : i32
    return %c0_i32, %c0_i32_0 : i32, i32
  }
  func.func @transform_16(%arg0: i32, %arg1: i32) -> (i32, i32) {
    %c0_i32 = arith.constant 0 : i32
    %c0_i32_0 = arith.constant 0 : i32
    %c0_i32_1 = arith.constant 0 : i32
    return %c0_i32, %c0_i32_0 : i32, i32
  }
  func.func @transform_17(%arg0: i32, %arg1: i32) -> (i32, i32, i32) {
    %c0_i32 = arith.constant 0 : i32
    %c0_i32_0 = arith.constant 0 : i32
    return %arg0, %arg1, %c0_i32 : i32, i32, i32
  }
  func.func @transform_18(%arg0: i32, %arg1: i32) -> (i32, i32, i32, i32) {
    %c0_i32 = arith.constant 0 : i32
    %c0_i32_0 = arith.constant 0 : i32
    %c0_i32_1 = arith.constant 0 : i32
    return %arg0, %c0_i32, %arg1, %c0_i32_0 : i32, i32, i32, i32
  }
}

</mosaic_0001>

<bundles_post_ra>
// kernel: tpu_custom_call.1
= control target key start
LH: loop header
LB: loop body
LE: loop exit
PB: predicated region body
PF: predicated region fallthrough
CT: control target
= control target key end

     0   :  { %s3686_s0 = inlined_call_operand.hbm [shape: f32[2,8,32], index: 0, kind: input, shape index: {}]   ;;  %s3687_s1 = inlined_call_operand.hbm [shape: f32[2,4,8,8], index: 1, kind: input, shape index: {}]   ;;  %s3688_s2 = inlined_call_operand.hbm [shape: f32[2,4,8,8], index: 2, kind: input, shape index: {}]   ;;  %s3689_s3 = inlined_call_operand.vmem [shape: f32[2,1,8], index: 3, kind: input, shape index: {}]   ;;  %s3690_s4 = inlined_call_operand.vmem [shape: f32[4,1,8], index: 4, kind: input, shape index: {}]   ;;  %s3691_s5 = inlined_call_operand.hbm [shape: f32[4,1,8], index: 5, kind: input, shape index: {}]   ;;  %s3692_s6 = inlined_call_operand.hbm [shape: f32[4,1,8], index: 6, kind: input, shape index: {}]   ;;  %s3693_s7 = inlined_call_operand.hbm [shape: f32[4,1,8], index: 7, kind: input, shape index: {}]   ;;  %s3694_s8 = inlined_call_operand.vmem [shape: f32[1,32], index: 8, kind: input, shape index: {}]   ;;  %s3695_s9 = inlined_call_operand.hbm [shape: f32[1,32], index: 9, kind: input, shape index: {}]   ;;  %s3696_s10 = inlined_call_operand.hbm [shape: bf16[8,8], index: 10, kind: input, shape index: {}]   ;;  %s3697_s11 = inlined_call_operand.hbm [shape: bf16[8,8], index: 11, kind: input, shape index: {}]   ;;  %s3698_s12 = inlined_call_operand.hbm [shape: bf16[8,8], index: 12, kind: input, shape index: {}]   ;;  %s3699_s13 = inlined_call_operand.vmem [shape: bf16[32,32], index: 13, kind: input, shape index: {}]   ;;  %s3700_s14 = inlined_call_operand.vmem [shape: f32[1,32], index: 14, kind: input, shape index: {}]   ;;  %s3701_s15 = inlined_call_operand.hbm [shape: bf16[32,32], index: 15, kind: input, shape index: {}]   ;;  %s3702_s16 = inlined_call_operand.vmem [shape: f32[1,32], index: 16, kind: input, shape index: {}]   ;;  %s3703_s17 = inlined_call_operand.hbm [shape: f32[2,8,32], index: 17, kind: output, shape index: {0}]   ;;  %s3704_s18 = inlined_call_operand.hbm [shape: bf16[2,4,8,8], index: 18, kind: output, shape index: {1}]  }
   0x1   :  { %3729 = sst [smem:[#allocation42_spill]] %s3686_s0 }
   0x2   :  { %3730 = sst [smem:[#allocation43_spill]] %s3687_s1 }
   0x3   :  { %3731 = sst [smem:[#allocation44_spill]] %s3688_s2 }
   0x4   :  { %3732 = sst [smem:[#allocation45_spill]] %s3689_s3 }
   0x5   :  { %3733 = sst [smem:[#allocation46_spill]] %s3690_s4 }
   0x6   :  { %3734 = sst [smem:[#allocation47_spill]] %s3691_s5 }
   0x7   :  { %3735 = sst [smem:[#allocation48_spill]] %s3693_s7 }
   0x8   :  { %3736 = sst [smem:[#allocation49_spill]] %s3694_s8 }
   0x9   :  { %3737 = sst [smem:[#allocation50_spill]] %s3696_s10 }
   0xa   :  { %3738 = sst [smem:[#allocation51_spill]] %s3698_s12 }
   0xb   :  { %3739 = sst [smem:[#allocation52_spill]] %s3699_s13 }
   0xc   :  { %3740 = sst [smem:[#allocation53_spill]] %s3700_s14 }
   0xd   :  { %3741 = sst [smem:[#allocation54_spill]] %s3702_s16 }
   0xe   :  { %3742 = sst [smem:[#allocation55_spill]] %s3703_s17 }
   0xf   :  { %3743 = sst [smem:[#allocation56_spill]] %s3704_s18 }
  0x10   :  { %24 = vsyncpa [#allocation6], 0 }
  0x11   :  { %26 = vsyncpa [#allocation6 + $0x1], 0 }
  0x12   :  { %27 = vsyncpa [#allocation9], 0 }
  0x13   :  { %29 = vsyncpa [#allocation9 + $0x1], 0 }
  0x14   :  { %30 = vsyncpa [#allocation12], 0 }
  0x15   :  { %31 = vsyncpa [#allocation15], 0 }
  0x16   :  { %32 = vsyncpa [#allocation18], 0 }
  0x17   :  { %33 = vsyncpa [#allocation21], 0 }
  0x18   :  { %34 = vsyncpa [#allocation7], 0 }
  0x19   :  { %36 = vsyncpa [#allocation7 + $0x1], 0 }
  0x1a   :  { %37 = vsyncpa [#allocation25], 0 }
  0x1b   :  { %39 = vsyncpa [#allocation25 + $0x1], 0  ;;  %s3188_s27 = smov 0   ;;  %s3190_s28 = smov 0  }
  0x1c   :  { %s3192_s29 = smov 0   ;;  %s3194_s30 = smov 0  }
  0x1d   :  { %s3196_s0 = smov 0   ;;  %s3198_s19 = smov 0  }
  0x1e LB: > { %3744 = sst [smem:[#allocation34_spill]] %s3045_s27  ;;  %s3219_s1 = sadd.s32 4294967295, %s3065_s19   ;;  %s3065_s19 = sphi %s3198_s19, %s45_s19   ;;  %s3061_s0 = sphi %s3196_s0, %s3806_s0   ;;  %s3057_s30 = sphi %s3194_s30, %s3805_s30   ;;  %s3053_s29 = sphi %s3192_s29, %s3801_s29   ;;  %s3049_s28 = sphi %s3190_s28, %s3804_s28   ;;  %s3045_s27 = sphi %s3188_s27, %s3803_s27  }
  0x1f   : > { %3745 = sst [smem:[#allocation35_spill]] %s3053_s29  ;;  %p2210_p0 = scmp.ge.s32.totalorder %s3065_s19, 1 }
  0x20   : > { %3746 = sst [smem:[#allocation36_spill]] %s3057_s30  ;;  %p3709_p1 = scmp.eq.s32.totalorder %s3219_s1, 0 }
  0x21   : > { %3747 = sst [smem:[#allocation37_spill]] %s3065_s19  ;;  %p499_p2 = scmp.lt.s32.totalorder %s3065_s19, 3 }
  0x22   : > { %s3067_s21 = smov [#allocation11]   ;;  %s3068_s23 = smov [#allocation14]  }
  0x23   : > { %p3224_p3 = pnand %p2210_p0, %p499_p2  ;;  %s514_s22 = sshll.u32 %s3067_s21, 4  ;;  %s515_s22 = int_to_ptr.vmem [resolvable:$true] %s514_s22 }
  0x24   : > { %s540_s24 = sshll.u32 %s3068_s23, 4  ;;  %s3069_s25 = smov [#allocation17]   ;;  %s541_s24 = int_to_ptr.vmem [resolvable:$true] %s540_s24 }
  0x25   : > { %s3748_s20 = scalar_select %p3224_p3, 1, 0 }
  0x26   : > { %p2488_p4 = pneg %p3224_p3  ;;  %s568_s26 = sshll.u32 %s3069_s25, 4  ;;  %s569_s26 = int_to_ptr.vmem [resolvable:$true] %s568_s26 }
  0x27   : > { %s2654_s21 = scalar_lea.vmem %s515_s22, 64  ;;  %p2662_p11 = scmp.lt.s32.totalorder %s515_s22, %s515_s22 }
  0x28   : > { %p3233_p6 = pnand %p2488_p4, %p3709_p1  ;;  %p2655_p8 = scmp.ne.s32.totalorder %s515_s22, %s2654_s21 }
  0x29   : > { %p2663_p12 = scmp.lt.s32.totalorder %s2654_s21, %s2654_s21 }
  0x2a   : > { %p3239_p7 = pneg %p3233_p6 }
  0x2b   : > { %p2664_p13 = por %p2663_p12, %p2662_p11 }
  0x2c   : > { %p2657_p9 = pnand %p2655_p8, %p3239_p7 }
  0x2e   : > { %p2658_p10 = pneg %p2657_p9 }
  0x30   : > { %p2665_p0 = pnand %p2664_p13, %p2658_p10 }
  0x32   : > { %2668 = shalt.err (!%p2665_p0)
}
  0x33   : > { %s3707_s23 = smov 16   ;;  %s3708_s25 = smov 1  }
  0x34   : > { %s3751_s5 = sld [smem:[#allocation47_spill]]  ;;  %s2680_s8 = scalar_lea.vmem %s541_s24, 64 }
  0x35   : > { %p2681_p2 = scmp.ne.s32.totalorder %s541_s24, %s2680_s8  ;;  %p2688_p9 = scmp.lt.s32.totalorder %s541_s24, %s541_s24 }
  0x36   : > { %p2689_p10 = scmp.lt.s32.totalorder %s2680_s8, %s2680_s8 }
  0x37   : > { %p2683_p4 = pnand %p2681_p2, %p3239_p7 }
  0x38   : > { %p2690_p11 = por %p2689_p10, %p2688_p9 }
  0x39   : > { %p2684_p8 = pneg %p2683_p4 }
  0x3a   : > { %2491 = dma.hbm_to_vmem [thread:$0]  (!%p3233_p6), %s3751_s5, 64, %s515_s22, [#allocation12], %s3707_s23, %s3707_s23, %s3708_s25  }
  0x3b   : > { %p2691_p12 = pnand %p2690_p11, %p2684_p8 }
  0x3d   : > { %2694 = shalt.err (!%p2691_p12)
}
  0x3e   : > { %s3752_s7 = sld [smem:[#allocation48_spill]]  ;;  %s2706_s16 = scalar_lea.vmem %s569_s26, 64 }
  0x3f   : > { %p2707_p13 = scmp.ne.s32.totalorder %s569_s26, %s2706_s16  ;;  %p2714_p4 = scmp.lt.s32.totalorder %s569_s26, %s569_s26 }
  0x40   : > { %p2715_p9 = scmp.lt.s32.totalorder %s2706_s16, %s2706_s16 }
  0x41   : > { %p2709_p0 = pnand %p2707_p13, %p3239_p7 }
  0x42   : > { %p2716_p8 = por %p2715_p9, %p2714_p4 }
  0x43   : > { %p2710_p2 = pneg %p2709_p0 }
  0x44   : > { %2497 = dma.hbm_to_vmem [thread:$0]  (!%p3233_p6), %s3752_s7, 64, %s541_s24, [#allocation15], %s3707_s23, %s3707_s23, %s3708_s25  }
  0x45   : > { %p2717_p10 = pnand %p2716_p8, %p2710_p2 }
  0x47   : > { %2720 = shalt.err (!%p2717_p10)
}
  0x48   : > { %s3753_s10 = sld [smem:[#allocation50_spill]]  ;;  %s3072_s14 = smov [#allocation20]  }
  0x49   : > { %s590_s22 = sshll.u32 %s3072_s14, 4  ;;  %s591_s22 = int_to_ptr.vmem [resolvable:$true] %s590_s22 }
  0x4a   : > { %s2732_s24 = scalar_lea.vmem %s591_s22, 64  ;;  %p2740_p0 = scmp.lt.s32.totalorder %s591_s22, %s591_s22 }
  0x4b   : > { %p2733_p11 = scmp.ne.s32.totalorder %s591_s22, %s2732_s24  ;;  %p2741_p5 = scmp.lt.s32.totalorder %s2732_s24, %s2732_s24 }
  0x4d   : > { %p2735_p12 = pnand %p2733_p11, %p3239_p7  ;;  %p2742_p4 = por %p2741_p5, %p2740_p0 }
  0x4e   : > { %2503 = dma.hbm_to_vmem [thread:$0]  (!%p3233_p6), %s3753_s10, 64, %s569_s26, [#allocation18]  }
  0x4f   : > { %p2736_p13 = pneg %p2735_p12 }
  0x51   : > { %p2743_p2 = pnand %p2742_p4, %p2736_p13 }
  0x53   : > { %2746 = shalt.err (!%p2743_p2)
}
  0x54   : > { %s3754_s12 = sld [smem:[#allocation51_spill]]  ;;  %s2209_s26 = sadd.s32 4294967294, %s3065_s19  }
  0x55   : > { %s57_s8 = sadd.s32 1, %s3061_s0  ;;  %s66_s18 = sadd.s32 1, %s3053_s29 }
  0x56   : > { %p59_p5 = scmp.ge.s32.totalorder %s57_s8, 2  ;;  %p73_p9 = scmp.ne.s32.totalorder %s3053_s29, %s3049_s28 }
  0x57   : > { %p74_p8 = scmp.eq.s32.totalorder %s3065_s19, 0  ;;  %p79_p11 = scmp.ne.s32.totalorder %s3049_s28, %s3045_s27 }
  0x58   : > { %s3808_s8 = smov (%p59_p5, %s57_s8), 0  ;;  %p458_p12 = scmp.eq.s32.totalorder %s3219_s1, 1 }
  0x59   : > { %3755 = sst [smem:[#allocation38_spill]] %s3808_s8  ;;  %p3285_p10 = por %p74_p8, %p73_p9 }
  0x5a   : > { %2509 = dma.hbm_to_vmem [thread:$0]  (!%p3233_p6), %s3754_s12, 64, %s591_s22, [#allocation21]  }
  0x5b   : > { %s61_s22 = ssub.s32 %s3061_s0, %s3808_s8  ;;  %p3296_p0 = por %p3709_p1, %p79_p11 }
  0x5c   : > { %p64_p13 = scmp.eq.s32.totalorder %s61_s22, 0  ;;  %p3300_p4 = por %p458_p12, %p73_p9 }
  0x5d   : > { %s3757_s24 = scalar_select %p3296_p0, 1, 0 }
  0x5e   : > { %s3758_s21 = scalar_select %p3300_p4, 1, 0 }
  0x5f   : > { %p464_p2 = scmp.eq.s32.totalorder %s2209_s26, 1  ;;  %p2538_p8 = scmp.lt.s32.totalorder %s3065_s19, 2 }
  0x60   : > { %3759 = sst [smem:[#allocation39_spill]] %s3758_s21  ;;  %s3313_s25 = sand.u32 1, %s3053_s29  }
  0x61   : > { %s3305_s16 = scalar_select %p64_p13, %s3053_s29, %s66_s18  }
  0x62   : > { %p3307_p5 = por %p464_p2, %p79_p11  ;;  %s642_s22 = sand.u32 1, %s3065_s19  }
  0x63   : > { %3760 = sst [smem:[#allocation40_spill]] %s3305_s16  ;;  %p3318_p1 = pnand %p2538_p8, %p3285_p10 }
  0x64   : > { %s3761_s23 = scalar_select %p3307_p5, 1, 0 }
  0x65   : > { %s3763_s5 = scalar_select %p3318_p1, 1, 0 }
  0x66   : > { %3762 = sst [smem:[#allocation41_spill]] %s3761_s23  ;;  %s2222_s7 = sshll.u32 %s3313_s25, 5 }
  0x67   : > { %s2308_s26 = sshll.u32 %s3061_s0, 9  ;;  %s3764_s12 = sld [smem:[#allocation43_spill]] }
  0x68   : > { %s646_s16 = scalar_lea.vmem [#allocation8], %s2222_s7  ;;  %s3327_s29 = scalar_lea.sflag [#allocation9], %s642_s22 }
  0x69   : > { %s654_s23 = sshll.u32 %s646_s16, 4  ;;  %p3721_p9 = pneg %p3318_p1  ;;  %s655_s23 = int_to_ptr.vmem [resolvable:$true] %s654_s23 }
  0x6a   : > { %s2760_s14 = scalar_lea.vmem %s655_s23, 512  ;;  %s3073_s19 = smov [#allocation8]  }
  0x6b   : > { %p2761_p10 = scmp.ne.s32.totalorder %s655_s23, %s2760_s14  ;;  %s2765_s27 = sshll.u32 %s3073_s19, 4  ;;  %s2766_s27 = int_to_ptr.vmem [resolvable:$false] %s2765_s27 }
  0x6c   : > { %s2767_s21 = scalar_lea.vmem %s2766_s27, 1024  ;;  %p2768_p13 = scmp.lt.s32.totalorder %s655_s23, %s2766_s27 }
  0x6d   : > { %s653_s8 = scalar_lea.hbm %s3764_s12, %s2308_s26  ;;  %p2763_p11 = pnand %p2761_p10, %p3721_p9 }
  0x6e   : > { %p2769_p2 = scmp.lt.s32.totalorder %s2767_s21, %s2760_s14 }
  0x6f   : > { %p2764_p12 = pneg %p2763_p11 }
  0x70   : > { %p2770_p8 = por %p2769_p2, %p2768_p13 }
  0x72   : > { %p2771_p5 = pnand %p2770_p8, %p2764_p12 }
  0x74   : > { %2774 = shalt.err (!%p2771_p5)
}
  0x75   : > { %s3727_s10 = smov 128   ;;  %s3728_s12 = smov 8  }
  0x76   : > { %2519 = dma.hbm_to_vmem [thread:$0]  (!%p3318_p1), %s653_s8, 512, %s655_s23, %s3327_s29, %s3727_s10, %s3727_s10, %s3728_s12  }
  0x77   : > { %s3765_s19 = sld [smem:[#allocation44_spill]]  ;;  %s3345_s27 = scalar_lea.vmem [#allocation10], %s2222_s7 }
  0x78   : > { %s675_s21 = sshll.u32 %s3345_s27, 4  ;;  %s3076_s14 = smov [#allocation13]   ;;  %s3386_s21 = int_to_ptr.vmem [resolvable:$true] %s675_s21 }
  0x79   : > { %s527_s13 = sshll.u32 %s3076_s14, 4  ;;  %s3077_s3 = smov [#allocation16]   ;;  %s528_s13 = int_to_ptr.vmem [resolvable:$true] %s527_s13 }
  0x7a   : > { %s557_s30 = sshll.u32 %s3077_s3, 4  ;;  %s2786_s4 = scalar_lea.vmem %s528_s13, 64  ;;  %s558_s30 = int_to_ptr.vmem [resolvable:$true] %s557_s30 }
  0x7b   : > { %p2787_p5 = scmp.ne.s32.totalorder %s528_s13, %s2786_s4  ;;  %p2794_p12 = scmp.lt.s32.totalorder %s528_s13, %s528_s13 }
  0x7c   : > { %p2795_p13 = scmp.lt.s32.totalorder %s2786_s4, %s2786_s4 }
  0x7d   : > { %s3343_s18 = scalar_lea.hbm %s3765_s19, %s2308_s26  ;;  %p2789_p10 = pnand %p2787_p5, %p3239_p7 }
  0x7e   : > { %p2796_p2 = por %p2795_p13, %p2794_p12 }
  0x7f   : > { %p2790_p11 = pneg %p2789_p10 }
  0x81   : > { %p2797_p8 = pnand %p2796_p2, %p2790_p11 }
  0x83   : > { %2800 = shalt.err (!%p2797_p8)
}
  0x84   : > { %s3766_s7 = smov 1   ;;  %s3767_s23 = smov 16  }
  0x85   : > { %2494 = dma.hbm_to_vmem [thread:$0]  (!%p3233_p6), %s3692_s6, 64, %s528_s13, [#allocation12], %s3767_s23, %s3767_s23, %s3766_s7  }
  0x86   : > { %s2812_s3 = scalar_lea.vmem %s558_s30, 16  ;;  %s2819_s4 = scalar_lea.vmem %s558_s30, 32 }
  0x87   : > { %p2813_p9 = scmp.ne.s32.totalorder %s558_s30, %s2812_s3  ;;  %p2820_p12 = scmp.lt.s32.totalorder %s558_s30, %s558_s30 }
  0x88   : > { %p2821_p11 = scmp.lt.s32.totalorder %s2819_s4, %s2812_s3 }
  0x89   : > { %p2815_p5 = pnand %p2813_p9, %p3239_p7 }
  0x8a   : > { %p2822_p13 = por %p2821_p11, %p2820_p12 }
  0x8b   : > { %p2816_p10 = pneg %p2815_p5 }
  0x8d   : > { %p2823_p2 = pnand %p2822_p13, %p2816_p10 }
  0x8f   : > { %2826 = shalt.err (!%p2823_p2)
}
  0x90   : > { %2500 = dma.hbm_to_vmem [thread:$0]  (!%p3233_p6), %s3695_s9, 16, %s558_s30, [#allocation15]  }
  0x91   : > { %s3078_s13 = smov [#allocation19]   ;;  %s3079_s14 = smov [#allocation22]  }
  0x92   : > { %s579_s19 = sshll.u32 %s3078_s13, 4  ;;  %s606_s7 = sshll.u32 %s3079_s14, 4  ;;  %s580_s19 = int_to_ptr.vmem [resolvable:$true] %s579_s19  ;;  %s607_s7 = int_to_ptr.vmem [resolvable:$true] %s606_s7 }
  0x93   : > { %s2838_s23 = scalar_lea.vmem %s580_s19, 64  ;;  %p2846_p12 = scmp.lt.s32.totalorder %s580_s19, %s580_s19 }
  0x94   : > { %p2839_p9 = scmp.ne.s32.totalorder %s580_s19, %s2838_s23  ;;  %p2847_p10 = scmp.lt.s32.totalorder %s2838_s23, %s2838_s23 }
  0x96   : > { %p2841_p8 = pnand %p2839_p9, %p3239_p7  ;;  %p2848_p11 = por %p2847_p10, %p2846_p12 }
  0x98   : > { %p2842_p5 = pneg %p2841_p8 }
  0x9a   : > { %p2849_p13 = pnand %p2848_p11, %p2842_p5 }
  0x9c   : > { %2852 = shalt.err (!%p2849_p13)
}
  0x9d   : > { %2506 = dma.hbm_to_vmem [thread:$0]  (!%p3233_p6), %s3697_s11, 64, %s580_s19, [#allocation18]  }
  0x9e   : > { %s2864_s30 = scalar_lea.vmem %s607_s7, 256  ;;  %p2872_p9 = scmp.lt.s32.totalorder %s607_s7, %s607_s7 }
  0x9f   : > { %p2865_p2 = scmp.ne.s32.totalorder %s607_s7, %s2864_s30  ;;  %p2873_p8 = scmp.lt.s32.totalorder %s2864_s30, %s2864_s30 }
  0xa1   : > { %p2867_p4 = pnand %p2865_p2, %p3239_p7  ;;  %p2874_p3 = por %p2873_p8, %p2872_p9 }
  0xa3   : > { %p2868_p0 = pneg %p2867_p4 }
  0xa5   : > { %p2875_p1 = pnand %p2874_p3, %p2868_p0 }
  0xa7   : > { %2878 = shalt.err (!%p2875_p1)
}
  0xa8   : > { %s3080_s3 = smov 64   ;;  %s3081_s4 = smov 4  }
  0xa9   : > { %2512 = dma.hbm_to_vmem [thread:$0]  (!%p3233_p6), %s3701_s15, 256, %s607_s7, [#allocation21], %s3080_s3, %s3080_s3, %s3081_s4  }
  0xaa   : > { %s2220_s17 = sshll.u32 %s3313_s25, 3  ;;  %s2221_s13 = sshll.u32 %s3061_s0, 7 }
  0xab   : > { %s3768_s23 = sld [smem:[#allocation42_spill]]  ;;  %s627_s26 = scalar_lea.vmem [#allocation5], %s2220_s17 }
  0xac   : > { %s635_s30 = sshll.u32 %s627_s26, 4  ;;  %s624_s10 = scalar_lea.sflag [#allocation6], %s3313_s25  ;;  %s636_s30 = int_to_ptr.vmem [resolvable:$true] %s635_s30 }
  0xad   : > { %s2892_s12 = scalar_lea.vmem %s636_s30, 128  ;;  %p3769_p3 = scmp.ne.s32.totalorder %s3763_s5, 0 }
  0xae   : > { %p2893_p1 = scmp.ne.s32.totalorder %s636_s30, %s2892_s12  ;;  %s3082_s2 = smov [#allocation5]  }
  0xaf   : > { %p3770_p7 = pneg %p3769_p3  ;;  %s2897_s7 = sshll.u32 %s3082_s2, 4  ;;  %s2898_s7 = int_to_ptr.vmem [resolvable:$false] %s2897_s7 }
  0xb0   : > { %s2899_s3 = scalar_lea.vmem %s2898_s7, 256  ;;  %p2900_p6 = scmp.lt.s32.totalorder %s636_s30, %s2898_s7 }
  0xb1   : > { %s633_s8 = scalar_lea.hbm %s3768_s23, %s2221_s13  ;;  %p2895_p0 = pnand %p2893_p1, %p3770_p7 }
  0xb2   : > { %p2901_p5 = scmp.lt.s32.totalorder %s2899_s3, %s2892_s12 }
  0xb3   : > { %p2896_p4 = pneg %p2895_p0 }
  0xb4   : > { %p2902_p12 = por %p2901_p5, %p2900_p6 }
  0xb6   : > { %p2903_p10 = pnand %p2902_p12, %p2896_p4 }
  0xb8   : > { %2906 = shalt.err (!%p2903_p10)
}
  0xb9   : > { %2516 = dma.hbm_to_vmem [thread:$0]  (!%p3769_p3), %s633_s8, 128, %s636_s30, %s624_s10  }
  0xba   : > { %s2920_s25 = scalar_lea.vmem %s3386_s21, 512  ;;  %p3771_p13 = pmov %p3770_p7 }
  0xbb   : > { %p2921_p11 = scmp.ne.s32.totalorder %s3386_s21, %s2920_s25  ;;  %s3083_s27 = smov [#allocation10]  }
  0xbc   : > { %s2925_s4 = sshll.u32 %s3083_s27, 4  ;;  %s2926_s4 = int_to_ptr.vmem [resolvable:$false] %s2925_s4 }
  0xbd   : > { %p2923_p2 = pnand %p2921_p11, %p3771_p13  ;;  %s2927_s12 = scalar_lea.vmem %s2926_s4, 1024 }
  0xbe   : > { %p2928_p8 = scmp.lt.s32.totalorder %s3386_s21, %s2926_s4  ;;  %p2929_p1 = scmp.lt.s32.totalorder %s2927_s12, %s2920_s25 }
  0xbf   : > { %p2924_p9 = pneg %p2923_p2 }
  0xc0   : > { %p2930_p7 = por %p2929_p1, %p2928_p8 }
  0xc2   : > { %p2931_p0 = pnand %p2930_p7, %p2924_p9 }
  0xc4   : > { %2934 = shalt.err (!%p2931_p0)
}
  0xc5   : > { %s3772_s16 = smov 8   ;;  %s3773_s22 = smov 128  }
  0xc6   : > { %2522 = dma.hbm_to_vmem [thread:$0]  (!%p3769_p3), %s3343_s18, 512, %s3386_s21, %s3327_s29, %s3773_s22, %s3773_s22, %s3772_s16  }
  0xc7   : > { %p3774_p4 = scmp.ne.s32.totalorder %s3748_s20, 0 }
  0xc8   : > { %s3411_s10 = sand.u32 (!%p3774_p4), 1, %s3049_s28   ;;  %p3775_p6 = scmp.ne.s32.totalorder (!%p3774_p4), %s3757_s24, 0 }
  0xc9   : > { %693 = sbr.rel (%p3774_p4) target bundleno = 2323 (0x913), region = 88  ;;  %s2229_s17 = sshll.u32 (!%p3774_p4), %s3411_s10, 3 }
  0xca   : > { %s696_s13 = scalar_lea.sflag (!%p3774_p4), [#allocation6], %s3411_s10  ;;  %s699_s5 = scalar_lea.vmem (!%p3774_p4), [#allocation5], %s2229_s17 }
  0xce   : > { %3012 = dma.done.wait (%p3775_p6), %s696_s13, 128  }
  0xcf   : > { %3014 = vsyncadd (%p3775_p6), %s696_s13, 4294967168  ;;  %s704_s29 = sand.u32 1, %s3219_s1   ;;  %s2230_s20 = sshll.u32 %s3411_s10, 5 }
  0xd0   : > { %s705_s18 = scalar_lea.sflag [#allocation9], %s704_s29  ;;  %s3423_s21 = scalar_lea.vmem [#allocation8], %s2230_s20 }
  0xd1   : > { %3016 = dma.done.wait (%p3775_p6), %s705_s18, 1024  }
  0xd2   : > { %3018 = vsyncadd (%p3775_p6), %s705_s18, 4294966272  ;;  %s717_s19 = scalar_lea.vmem [#allocation10], %s2230_s20  ;;  %p3776_p3 = scmp.eq.s32.totalorder %s3219_s1, 0 }
  0xd4   : > { %3020 = dma.done.wait (%p3776_p3), [#allocation12], 128   ;;  %p3777_p5 = pmov %p3776_p3 }
  0xd5   : > { %p3778_p12 = pmov %p3776_p3 }
  0xd6   : > { %3022 = vsyncadd (%p3777_p5), [#allocation12], 4294967168 }
  0xd7   : > { %3024 = dma.done.wait (%p3778_p12), [#allocation15], 80   ;;  %p3779_p10 = pmov %p3776_p3 }
  0xd8   : > { %p3780_p11 = pmov %p3776_p3 }
  0xd9   : > { %3026 = vsyncadd (%p3779_p10), [#allocation15], 4294967216 }
  0xda   : > { %3028 = dma.done.wait (%p3780_p11), [#allocation18], 128   ;;  %p3781_p13 = pmov %p3776_p3 }
  0xdb   : > { %p3782_p2 = pmov %p3776_p3 }
  0xdc   : > { %3030 = vsyncadd (%p3781_p13), [#allocation18], 4294967168 }
  0xdd   : > { %3032 = dma.done.wait (%p3782_p2), [#allocation21], 320   ;;  %p3783_p9 = pmov %p3782_p2 }
  0xde   : > { %vm837_vm0 = vcmask 64512   ;;  %v833_v0 = vld [vmem:[%s717_s19] sm:$0xff]  ;;  %v835_v1 = vld [vmem:[%s717_s19 + $0x10] sm:$0xff]  ;;  %v834_v2 = vld [vmem:[%s717_s19 + $0x8] sm:$0xff]  ;;  %vm1116_vm1 = vcmask 261120   ;;  %vm969_vm2 = vcmask 1043456  }
  0xdf   : > { %3034 = vsyncadd (%p3783_p9), [#allocation21], 4294966976  ;;  %v838_v3 = vsel %vm837_vm0, %v833_v0, 0.0  ;;  %v844_v4 = vsel %vm837_vm0, %v835_v1, 0.0  ;;  %v841_v5 = vsel %vm837_vm0, %v834_v2, 0.0  ;;  %v836_v6 = vld [vmem:[%s717_s19 + $0x18] sm:$0xff] }
  0xe0   : > { %839 = vadd.xlane.f32.xlu0 %v838_v3  ;;  %845 = vadd.xlane.f32.xlu1 %v844_v4  ;;  %v847_v7 = vsel %vm837_vm0, %v836_v6, 0.0  ;;  %v3449_v8 = vld [vmem:[%s699_s5] sm:$0xff]  ;;  %v825_v52 = vld [vmem:[%s3423_s21] sm:$0xff]  ;;  %v826_v53 = vld [vmem:[%s3423_s21 + $0x8] sm:$0xff]  ;;  %s3784_s14 = sld [smem:[#allocation46_spill]]  ;;  %vm3085_vm3 = vmmov 0  }
  0xe1   : > { %v1117_v9 = vsel %vm1116_vm1, %v3449_v8, 0.0  ;;  %v952_v35 = vld [vmem:[#allocation19] sm:$0xf]  ;;  %v1043_v36 = vld [vmem:[#allocation20] sm:$0xf]  ;;  %vm1038_vm4 = vcmask 60416  }
  0xe2   : > { %2443 = vmatprep.subr.msk.bf16.mxu0 %vm969_vm2, %v952_v35  ;;  %2444 = vmatprep.subr.msk.bf16.mxu1 %vm969_vm2, %v1043_v36  ;;  %v971_v37 = vsel %vm969_vm2, %v952_v35, 0  ;;  %v1045_v38 = vsel %vm969_vm2, %v1043_v36, 0  ;;  %v3466_v39 = vld [vmem:[#allocation17] sm:$0xf]  ;;  %v828_v55 = vld [vmem:[%s3423_s21 + $0x18] sm:$0xff]  ;;  %s3785_s3 = sld [smem:[#allocation36_spill]] }
  0xe3   : > { %2362 = vmatpush3.bf16.msra.mxu0 %v971_v37  ;;  %2368 = vmatpush3.bf16.msra.mxu1 %v1045_v38  ;;  %v827_v54 = vld [vmem:[%s3423_s21 + $0x10] sm:$0xff]  ;;  %v2242_v56 = vld [vmem:[#allocation13] ss:$0 sm:$0xff]  ;;  %v2243_v57 = vld [vmem:[#allocation13 + $0x1] ss:$0 sm:$0xff]  ;;  %s3786_s12 = sld [smem:[#allocation45_spill]] }
  0xe4   : > { %842 = vadd.xlane.f32.xlu0 %v841_v5  ;;  %848 = vadd.xlane.f32.xlu1 %v847_v7  ;;  %v2246_v63 = vld [vmem:[#allocation14] ss:$0 sm:$0xff]  ;;  %s2241_s22 = sshll.u32 %s3411_s10, 4  ;;  %s3787_s20 = sld [smem:[#allocation52_spill]]  ;;  %vm1740_vm6 = vcmask 126016   ;;  %vm1749_vm7 = vcmask 191616  }
  0xe5   : > { %2445 = vmatprep.subr.msk.bf16.mxu0 %vm969_vm2, %v3466_v39  ;;  %s3551_s13 = scalar_lea.vmem [#allocation24], %s2241_s22  ;;  %s3086_s19 = smov 8   ;;  %vm1758_vm8 = vcmask 257216  }
  0xe6   : > { %s3087_s1 = smov 16   ;;  %s3088_s24 = smov 24  }
  0xe7   : > { %s3788_s26 = sld [smem:[#allocation53_spill]]  ;;  %s1961_s4 = sshll.u32 %s3551_s13, 4  ;;  %s3608_s4 = int_to_ptr.vmem [resolvable:$true] %s1961_s4 }
  0xe8   : > { %1118 = vadd.xlane.f32.xlu0 %v1117_v9  ;;  %v2265_v9 = vld [vmem:[%s3784_s14 + $0x1] ss:$0 sm:$0xff]  ;;  %p820_p8 = scmp.lt.s32.totalorder %s3785_s3, 1  ;;  %s3789_s30 = sld [smem:[#allocation39_spill]] }
  0xe9   : > { %s2329_s27 = sshll.u32 %s3785_s3, 8  ;;  %s3791_s22 = sld [smem:[#allocation56_spill]] }
  0xea   : > { %s821_s25 = scalar_select %p820_p8, %s3785_s3, 1 }
  0xeb   : > { %s1933_s29 = scalar_lea.sflag [#allocation25], %s3411_s10  ;;  %s2935_s18 = scalar_lea.vmem %s3608_s4, 256 }
  0xec   : > { %s822_s16 = scalar_lea.vmem %s3786_s12, %s821_s25  ;;  %s3790_s25 = sld [smem:[#allocation49_spill]] }
  0xed   : > { %p2936_p1 = scmp.ne.s32.totalorder %s3608_s4, %s2935_s18  ;;  %s3089_s21 = smov [#allocation24]  }
  0xee   : > { %p3792_p7 = scmp.ne.s32.totalorder %s3789_s30, 0 }
  0xef   : > { %s3606_s5 = scalar_lea.hbm %s3791_s22, %s2329_s27 }
  0xf0   : > { %p2937_p0 = pnand %p2936_p1, %p3792_p7 }
  0xf2   : > { %p2938_p4 = pneg %p2937_p0 }
 0x169   : > { %v840_v10 = vpop.xlane.xlu0 %839  ;;  %v846_v11 = vpop.xlane.xlu1 %845 }
 0x16d   : > { %v843_v12 = vpop.xlane.xlu0 %842  ;;  %v849_v14 = vpop.xlane.xlu1 %848 }
 0x16e   : > { %v850_v13 = vadd.f32 %v843_v12, %v840_v10  ;;  %v2266_v10 = vld [vmem:[%s3784_s14 + $0x2] ss:$0 sm:$0xff]  ;;  %v2247_v12 = vld [vmem:[#allocation14 + $0x1] ss:$0 sm:$0xff] }
 0x170   : > { %v851_v15 = vadd.f32 %v850_v13, %v846_v11  ;;  %v2267_v11 = vld [vmem:[%s3784_s14 + $0x3] ss:$0 sm:$0xff]  ;;  %v2248_v13 = vld [vmem:[#allocation14 + $0x2] ss:$0 sm:$0xff] }
 0x171   : > { %v1119_v16 = vpop.xlane.xlu0 %1118 }
 0x172   : > { %v852_v17 = vadd.f32 %v851_v15, %v849_v14  ;;  %v3453_v19 = vmul.f32 0.03125, %v1119_v16  ;;  %v2249_v14 = vld [vmem:[#allocation14 + $0x3] ss:$0 sm:$0xff] }
 0x174   : > { %v853_v18 = vmul.f32 0.03125, %v852_v17  ;;  %v1122_v26 = vsub.f32 %v3449_v8, %v3453_v19  ;;  %v1130_v59 = vsub.f32 %v825_v52, %v3453_v19  ;;  %v1131_v60 = vsub.f32 %v826_v53, %v3453_v19 }
 0x175   : > { %v1132_v61 = vsub.f32 %v827_v54, %v3453_v19  ;;  %v1133_v62 = vsub.f32 %v828_v55, %v3453_v19 }
 0x176   : > { %v854_v20 = vsub.f32 %v833_v0, %v853_v18  ;;  %v855_v21 = vsub.f32 %v834_v2, %v853_v18  ;;  %v856_v22 = vsub.f32 %v835_v1, %v853_v18  ;;  %v857_v23 = vsub.f32 %v836_v6, %v853_v18  ;;  %v2244_v0 = vld [vmem:[#allocation13 + $0x2] ss:$0 sm:$0xff]  ;;  %v2245_v1 = vld [vmem:[#allocation13 + $0x3] ss:$0 sm:$0xff]  ;;  %v2264_v2 = vld [vmem:[%s3784_s14] ss:$0 sm:$0xff] }
 0x177   : > { %v1123_v31 = vmul.f32 %v1122_v26, %v1122_v26 }
 0x178   : > { %v858_v24 = vmul.f32 %v854_v20, %v854_v20  ;;  %v859_v25 = vmul.f32 %v855_v21, %v855_v21  ;;  %v860_v29 = vmul.f32 %v856_v22, %v856_v22  ;;  %v861_v30 = vmul.f32 %v857_v23, %v857_v23 }
 0x179   : > { %v1124_v34 = vsel %vm1116_vm1, %v1123_v31, 0.0 }
 0x17a   : > { %v862_v27 = vsel %vm837_vm0, %v858_v24, 0.0  ;;  %v865_v28 = vsel %vm837_vm0, %v859_v25, 0.0  ;;  %v868_v32 = vsel %vm837_vm0, %v860_v29, 0.0  ;;  %v871_v33 = vsel %vm837_vm0, %v861_v30, 0.0  ;;  %v2269_v24 = vld [vmem:[#allocation11 + $0x1] ss:$0 sm:$0xff] }
 0x17b   : > { %863 = vadd.xlane.f32.xlu1 %v862_v27  ;;  %866 = vadd.xlane.f32.xlu0 %v865_v28 }
 0x17f   : > { %869 = vadd.xlane.f32.xlu1 %v868_v32  ;;  %872 = vadd.xlane.f32.xlu0 %v871_v33  ;;  %v2270_v33 = vld [vmem:[#allocation11 + $0x2] ss:$0 sm:$0xff] }
 0x183   : > { %1125 = vadd.xlane.f32.xlu1 %v1124_v34  ;;  %v2271_v34 = vld [vmem:[#allocation11 + $0x3] ss:$0 sm:$0xff] }
 0x204   : > { %v864_v40 = vpop.xlane.xlu1 %863  ;;  %v867_v41 = vpop.xlane.xlu0 %866 }
 0x205   : > { %v874_v42 = vadd.f32 %v867_v41, %v864_v40  ;;  %v1230_v40 = vsel %vm969_vm2, %v3466_v39, 0  ;;  %v3084_v39 = vmov 0.0  }
 0x206   : > { %2379 = vmatprep.subr.bf16.mxu1 %v3084_v39 }
 0x208   : > { %v870_v43 = vpop.xlane.xlu1 %869  ;;  %v873_v45 = vpop.xlane.xlu0 %872 }
 0x209   : > { %v875_v44 = vadd.f32 %v874_v42, %v870_v43 }
 0x20b   : > { %v876_v46 = vadd.f32 %v875_v44, %v873_v45 }
 0x20c   : > { %v1126_v47 = vpop.xlane.xlu1 %1125 }
 0x20d   : > { %v877_v48 = vmul.f32 0.03125, %v876_v46  ;;  %v1127_v49 = vmul.f32 0.03125, %v1126_v47 }
 0x20f   : > { %v878_v50 = vadd.f32 1e-05, %v877_v48  ;;  %v1128_v51 = vadd.f32 1e-05, %v1127_v49 }
 0x211   : > { %2621 = vrsqrt.f32 %v878_v50 }
 0x212   : > { %2623 = vrsqrt.f32 %v1128_v51 }
 0x21e   : > { %v2622_v58 = vpop.eup %2621 }
 0x21f   : > { %v2624_v3 = vpop.eup %2623  ;;  %v880_v4 = vmul.f32 %v2622_v58, %v854_v20  ;;  %v881_v5 = vmul.f32 %v2622_v58, %v855_v21  ;;  %v882_v6 = vmul.f32 %v2622_v58, %v856_v22  ;;  %v883_v7 = vmul.f32 %v2622_v58, %v857_v23  ;;  %v2268_v23 = vld [vmem:[#allocation11] ss:$0 sm:$0xff] }
 0x220   : > { %v1134_v15 = vmul.f32 %v2624_v3, %v1130_v59  ;;  %v1135_v16 = vmul.f32 %v2624_v3, %v1131_v60  ;;  %v1136_v17 = vmul.f32 %v2624_v3, %v1132_v61  ;;  %v1137_v18 = vmul.f32 %v2624_v3, %v1133_v62 }
 0x221   : > { %v912_v19 = vmul.f32 %v2242_v56, %v880_v4  ;;  %v913_v20 = vmul.f32 %v2243_v57, %v881_v5  ;;  %v914_v21 = vmul.f32 %v2244_v0, %v882_v6  ;;  %v915_v22 = vmul.f32 %v2245_v1, %v883_v7 }
 0x222   : > { %v1166_v25 = vmul.f32 %v2264_v2, %v1134_v15  ;;  %v1167_v26 = vmul.f32 %v2265_v9, %v1135_v16  ;;  %v1168_v27 = vmul.f32 %v2266_v10, %v1136_v17  ;;  %v1169_v28 = vmul.f32 %v2267_v11, %v1137_v18 }
 0x223   : > { %v944_v29 = vadd.f32 %v2246_v63, %v912_v19  ;;  %v945_v30 = vadd.f32 %v2247_v12, %v913_v20  ;;  %v946_v31 = vadd.f32 %v2248_v13, %v914_v21  ;;  %v947_v32 = vadd.f32 %v2249_v14, %v915_v22 }
 0x224   : > { %v1198_v35 = vadd.f32 %v2268_v23, %v1166_v25  ;;  %v1199_v36 = vadd.f32 %v2269_v24, %v1167_v26  ;;  %v1200_v43 = vadd.f32 %v2270_v33, %v1168_v27  ;;  %v1201_v44 = vadd.f32 %v2271_v34, %v1169_v28  ;;  %v1297_v23 = vld [vmem:[%s822_s16] sm:$0x1] }
 0x225   : > { %v2310_v37 = vpack.c.bf16 %v945_v30, %v944_v29  ;;  %v2311_v38 = vpack.c.bf16 %v947_v32, %v946_v31  ;;  %v1301_v22 = vlaneseq  ;;  %vm1298_vm5 = vcmp.eq.f32.partialorder %v1297_v23, 0.0 }
 0x226   : > { %v1202_v41 = vmul.f32 0.17677669, %v1198_v35  ;;  %v1203_v42 = vmul.f32 0.17677669, %v1199_v36  ;;  %v1204_v46 = vmul.f32 0.17677669, %v1200_v43 }
 0x227   : > { %2363 = vmatprep.mubr.msk.bf16.mxu0 %vm837_vm0, %v2310_v37  ;;  %2369 = vmatprep.mubr.msk.bf16.mxu1 %vm837_vm0, %v2310_v37  ;;  %v1205_v47 = vmul.f32 0.17677669, %v1201_v44  ;;  %v1302_v24 = vshrl.u32 %v1301_v22, 7  ;;  %v1299_v26 = vsel %vm1298_vm5, -1e+20, %v3084_v39 }
 0x228   : > { %2364 = vmatmul.mubr.msk.bf16.vlgmr.msra.gmra.mxu0 %vm837_vm0, %v2311_v38  ;;  %2370 = vmatmul.mubr.msk.bf16.vlgmr.msra.gmra.mxu1 %vm837_vm0, %v2311_v38  ;;  %v2320_v45 = vpack.c.bf16 %v1203_v42, %v1202_v41 }
 0x229   : > { %2374 = vmatpush3.bf16.msra.mxu0 %v1230_v40  ;;  %v2321_v48 = vpack.c.bf16 %v1205_v47, %v1204_v46  ;;  %2381 = vmatprep.mubr.msk.bf16.mxu1 %vm3085_vm3, %v3084_v39  ;;  %v1303_v25 = vsub.s32 0, %v1302_v24 }
 0x22a   : > { %2375 = vmatprep.mubr.msk.bf16.mxu0 %vm837_vm0, %v2320_v45  ;;  %2385 = vmatprep.subr.bf16.mxu0 %v3084_v39 }
 0x22b   : > { %v1304_v27 = vrot.slane %v1299_v26, %v1303_v25 }
 0x230   : > { %2376 = vmatmul.mubr.msk.bf16.vlgmr.msra.gmra.mxu0 %vm837_vm0, %v2321_v48 }
 0x231   : > { %2387 = vmatprep.mubr.msk.bf16.mxu0 %vm3085_vm3, %v3084_v39 }
 0x2e8   : > { %v2365_v49 = vpop.f32.mrf.mxu0  ;;  %v2371_v50 = vpop.f32.mrf.mxu1 }
 0x2e9   : > { %v2314_v51 = vpack.c.bf16 %v2365_v49, %v2365_v49  ;;  %v2318_v52 = vpack.c.bf16 %v2371_v50, %v2371_v50 }
 0x2ea   : > { %v1007_v53 = vpop.f32.mrf.mxu0  ;;  %v1081_v54 = vpop.f32.mrf.mxu1 }
 0x2eb   : > { %1041 = vst.msk [vmem:[#allocation2 + $0x8] sm:$0xf] %vm1038_vm4, %v2314_v51  ;;  %1114 = vst.msk [vmem:[#allocation3 + $0x8] sm:$0xf] %vm1038_vm4, %v2318_v52  ;;  %v2312_v55 = vpack.c.bf16 %v1007_v53, %v1007_v53  ;;  %v2316_v56 = vpack.c.bf16 %v1081_v54, %v1081_v54 }
 0x2ec   : > { %v2366_v57 = vpop.f32.mrf.mxu0  ;;  %v2372_v58 = vpop.f32.mrf.mxu1 }
 0x2ed   : > { %1039 = vst.msk [vmem:[#allocation2] sm:$0xf] %vm1038_vm4, %v2312_v55  ;;  %1112 = vst.msk [vmem:[#allocation3] sm:$0xf] %vm1038_vm4, %v2316_v56  ;;  %v2315_v59 = vpack.c.bf16 %v2366_v57, %v2366_v57  ;;  %v2319_v60 = vpack.c.bf16 %v2372_v58, %v2372_v58 }
 0x2ee   : > { %v1010_v61 = vpop.f32.mrf.mxu0  ;;  %v1084_v62 = vpop.f32.mrf.mxu1 }
 0x2ef   : > { %1042 = vst.msk [vmem:[#allocation2 + $0xc] sm:$0xf] %vm1038_vm4, %v2315_v59  ;;  %1115 = vst.msk [vmem:[#allocation3 + $0xc] sm:$0xf] %vm1038_vm4, %v2319_v60  ;;  %v2313_v63 = vpack.c.bf16 %v1010_v61, %v1010_v61  ;;  %v2317_v0 = vpack.c.bf16 %v1084_v62, %v1084_v62 }
 0x2f0   : > { %v2377_v1 = vpop.f32.mrf.mxu0 }
 0x2f1   : > { %1040 = vst.msk [vmem:[#allocation2 + $0x4] sm:$0xf] %vm1038_vm4, %v2313_v63  ;;  %1113 = vst.msk [vmem:[#allocation3 + $0x4] sm:$0xf] %vm1038_vm4, %v2317_v0  ;;  %v2324_v17 = vpack.c.bf16 %v2377_v1, %v2377_v1 }
 0x2f2   : > { %v1266_v2 = vpop.f32.mrf.mxu0  ;;  %v1295_v9 = vld [vmem:[#allocation2 + $0x8] sm:$0xf] }
 0x2f3   : > { %v2322_v10 = vpack.c.bf16 %v1266_v2, %v1266_v2  ;;  %v1402_v12 = vsel %vm837_vm0, %v1295_v9, 0 }
 0x2f4   : > { %v1293_v3 = vld [vmem:[#allocation2] sm:$0xf]  ;;  %v2378_v5 = vpop.f32.mrf.mxu0  ;;  %v1543_v16 = vld [vmem:[#allocation3] sm:$0xf] }
 0x2f5   : > { %v1310_v4 = vsel %vm837_vm0, %v1293_v3, 0  ;;  %v1551_v18 = vsel %vm969_vm2, %v1543_v16, 0  ;;  %v2325_v20 = vpack.c.bf16 %v2378_v5, %v2378_v5  ;;  %v1545_v16 = vld [vmem:[#allocation3 + $0x8] sm:$0xf] }
 0x2f6   : > { %2380 = vmatpush3.bf16.xpose.msra.mxu1 %v1310_v4  ;;  %v1269_v11 = vpop.f32.mrf.mxu0  ;;  %v1296_v13 = vld [vmem:[#allocation2 + $0xc] sm:$0xf] }
 0x2f7   : > { %2391 = vmatprep.subr.bf16.mxu1 %v3084_v39  ;;  %v2323_v14 = vpack.c.bf16 %v1269_v11, %v1269_v11  ;;  %v1448_v15 = vsel %vm837_vm0, %v1296_v13, 0 }
 0x2f8   : > { %v1294_v6 = vld [vmem:[#allocation2 + $0x4] sm:$0xf]  ;;  %v1544_v19 = vld [vmem:[#allocation3 + $0x4] sm:$0xf] }
 0x2f9   : > { %v1356_v7 = vsel %vm837_vm0, %v1294_v6, 0  ;;  %v1597_v21 = vsel %vm969_vm2, %v1544_v19, 0  ;;  %v1643_v19 = vsel %vm969_vm2, %v1545_v16, 0 }
 0x2fa   : > { %2386 = vmatpush3.bf16.xpose.msra.mxu0 %v1356_v7 }
 0x2fb   : > { %2397 = vmatprep.subr.bf16.mxu0 %v3084_v39 }
 0x2fd   : > { %2382 = vmatmul.mubr.msk.bf16.vlgmr.msra.gmra.mxu1 %vm837_vm0, %v2322_v10 }
 0x2fe   : > { %2392 = vmatpush3.bf16.xpose.msra.mxu1 %v1402_v12  ;;  %2393 = vmatprep.mubr.msk.bf16.mxu1 %vm3085_vm3, %v3084_v39 }
 0x2ff   : > { %2403 = vmatprep.subr.bf16.mxu1 %v3084_v39 }
 0x301   : > { %2388 = vmatmul.mubr.msk.bf16.vlgmr.msra.gmra.mxu0 %vm837_vm0, %v2323_v14 }
 0x302   : > { %2398 = vmatpush3.bf16.xpose.msra.mxu0 %v1448_v15  ;;  %2399 = vmatprep.mubr.msk.bf16.mxu0 %vm3085_vm3, %v3084_v39 }
 0x303   : > { %2409 = vmatprep.subr.bf16.mxu0 %v3084_v39 }
 0x305   : > { %2394 = vmatmul.mubr.msk.bf16.vlgmr.msra.gmra.mxu1 %vm837_vm0, %v2324_v17 }
 0x306   : > { %2404 = vmatpush3.bf16.msra.mxu1 %v1551_v18  ;;  %2405 = vmatprep.mubr.msk.bf16.mxu1 %vm3085_vm3, %v3084_v39 }
 0x307   : > { %2415 = vmatprep.subr.bf16.mxu1 %v3084_v39 }
 0x309   : > { %2400 = vmatmul.mubr.msk.bf16.vlgmr.msra.gmra.mxu0 %vm837_vm0, %v2325_v20 }
 0x30a   : > { %2410 = vmatpush3.bf16.msra.mxu0 %v1597_v21  ;;  %2411 = vmatprep.mubr.msk.bf16.mxu0 %vm3085_vm3, %v3084_v39  ;;  %v1546_v21 = vld [vmem:[#allocation3 + $0xc] sm:$0xf] }
 0x30b   : > { %2421 = vmatprep.subr.bf16.mxu0 %v3084_v39  ;;  %v1689_v24 = vsel %vm969_vm2, %v1546_v21, 0 }
 0x3bd   : > { %v1346_v28 = vpop.f32.mrf.mxu1 }
 0x3be   : > { %v1347_v29 = vadd.f32 %v1346_v28, %v1304_v27 }
 0x3bf   : > { %v2383_v30 = vpop.f32.mrf.mxu1 }
 0x3c0   : > { %v1490_v31 = vsel %vm837_vm0, %v1347_v29, -inf }
 0x3c1   : > { %1491 = vmax.xlane.f32.xlu0 %v1490_v31  ;;  %v1349_v32 = vpop.f32.mrf.mxu1  ;;  %v1392_v33 = vpop.f32.mrf.mxu0 }
 0x3c2   : > { %v1393_v34 = vadd.f32 %v1392_v33, %v1304_v27  ;;  %v2617_v33 = vld [vmem:[%s3787_s20 + $0x8] sm:$0xff]  }
 0x3c3   : > { %v2384_v35 = vpop.f32.mrf.mxu1  ;;  %v2389_v36 = vpop.f32.mrf.mxu0 }
 0x3c4   : > { %v1493_v37 = vsel %vm837_vm0, %v1393_v34, -inf  ;;  %v2618_v36 = vld [vmem:[%s3787_s20] sm:$0xff]  }
 0x3c5   : > { %v1438_v38 = vpop.f32.mrf.mxu1  ;;  %1494 = vmax.xlane.f32.xlu1 %v1493_v37  ;;  %v1395_v40 = vpop.f32.mrf.mxu0 }
 0x3c6   : > { %v1439_v41 = vadd.f32 %v1438_v38, %v1304_v27 }
 0x3c7   : > { %v2390_v42 = vpop.f32.mrf.mxu0  ;;  %v2395_v43 = vpop.f32.mrf.mxu1 }
 0x3c8   : > { %v1496_v44 = vsel %vm837_vm0, %v1439_v41, -inf }
 0x3c9   : > { %1497 = vmax.xlane.f32.xlu0 %v1496_v44  ;;  %v1441_v45 = vpop.f32.mrf.mxu1  ;;  %v1484_v46 = vpop.f32.mrf.mxu0 }
 0x3ca   : > { %v1485_v47 = vadd.f32 %v1484_v46, %v1304_v27 }
 0x3cb   : > { %v2396_v48 = vpop.f32.mrf.mxu1  ;;  %v2401_v49 = vpop.f32.mrf.mxu0 }
 0x3cc   : > { %v1499_v50 = vsel %vm837_vm0, %v1485_v47, -inf }
 0x3cd   : > { %1500 = vmax.xlane.f32.xlu1 %v1499_v50  ;;  %v1487_v51 = vpop.f32.mrf.mxu0 }
 0x3cf   : > { %v2402_v52 = vpop.f32.mrf.mxu0 }
 0x44a   : > { %v1492_v53 = vpop.xlane.xlu0 %1491 }
 0x44b   : > { %v1502_v54 = vsub.f32 %v1347_v29, %v1492_v53 }
 0x44d   : > { %v1506_v55 = vmul.f32 1.442695, %v1502_v54 }
 0x44e   : > { %v1495_v56 = vpop.xlane.xlu1 %1494 }
 0x44f   : > { %2625 = vpow2.f32 %v1506_v55  ;;  %v1503_v57 = vsub.f32 %v1393_v34, %v1495_v56 }
 0x451   : > { %v1508_v58 = vmul.f32 1.442695, %v1503_v57  ;;  %v2291_v57 = vld [vmem:[%s3788_s26] ss:$0 sm:$0xff] }
 0x452   : > { %v1498_v59 = vpop.xlane.xlu0 %1497 }
 0x453   : > { %2627 = vpow2.f32 %v1508_v58  ;;  %v1504_v60 = vsub.f32 %v1439_v41, %v1498_v59 }
 0x455   : > { %v1510_v61 = vmul.f32 1.442695, %v1504_v60 }
 0x456   : > { %v1501_v62 = vpop.xlane.xlu1 %1500 }
 0x457   : > { %2629 = vpow2.f32 %v1510_v61  ;;  %v1505_v63 = vsub.f32 %v1485_v47, %v1501_v62 }
 0x459   : > { %v1512_v0 = vmul.f32 1.442695, %v1505_v63 }
 0x45b   : > { %2631 = vpow2.f32 %v1512_v0 }
 0x45c   : > { %v2626_v1 = vpop.eup %2625 }
 0x45d   : > { %v1514_v2 = vsel %vm837_vm0, %v2626_v1, 0.0 }
 0x45e   : > { %1515 = vadd.xlane.f32.xlu0 %v1514_v2 }
 0x460   : > { %v2628_v3 = vpop.eup %2627 }
 0x461   : > { %v1517_v4 = vsel %vm837_vm0, %v2628_v3, 0.0 }
 0x462   : > { %1518 = vadd.xlane.f32.xlu1 %v1517_v4 }
 0x464   : > { %v2630_v5 = vpop.eup %2629 }
 0x465   : > { %v1520_v6 = vsel %vm837_vm0, %v2630_v5, 0.0 }
 0x466   : > { %1521 = vadd.xlane.f32.xlu0 %v1520_v6  ;;  %v2619_v6 = vld [vmem:[#allocation22 + $0x8] sm:$0xff]  }
 0x468   : > { %v2632_v7 = vpop.eup %2631 }
 0x469   : > { %v1523_v9 = vsel %vm837_vm0, %v2632_v7, 0.0 }
 0x46a   : > { %1524 = vadd.xlane.f32.xlu1 %v1523_v9 }
 0x4e7   : > { %v1516_v10 = vpop.xlane.xlu0 %1515 }
 0x4e8   : > { %2633 = vrcp.f32 %v1516_v10 }
 0x4eb   : > { %v1519_v11 = vpop.xlane.xlu1 %1518 }
 0x4ec   : > { %2635 = vrcp.f32 %v1519_v11 }
 0x4ef   : > { %v1522_v12 = vpop.xlane.xlu0 %1521 }
 0x4f0   : > { %2637 = vrcp.f32 %v1522_v12  ;;  %v2295_v12 = vld [vmem:[%s3790_s25] ss:$0 sm:$0xff] }
 0x4f3   : > { %v1525_v13 = vpop.xlane.xlu1 %1524 }
 0x4f4   : > { %2639 = vrcp.f32 %v1525_v13 }
 0x4f5   : > { %v2634_v14 = vpop.eup %2633 }
 0x4f6   : > { %v1530_v15 = vmul.f32 %v2634_v14, %v2626_v1  ;;  %v2296_v14 = vld [vmem:[#allocation16] ss:$0 sm:$0xff] }
 0x4f8   : > { %v1534_v17 = vpack.c.bf16 %v1530_v15, %v1530_v15 }
 0x4f9   : > { %v2636_v18 = vpop.eup %2635 }
 0x4fa   : > { %1539 = vst.msk [vmem:[%s3551_s13] sm:$0xf] %vm1038_vm4, %v1534_v17  ;;  %2406 = vmatmul.mubr.msk.bf16.vlgmr.msra.gmra.mxu1 %vm837_vm0, %v1534_v17  ;;  %v1531_v20 = vmul.f32 %v2636_v18, %v2628_v3 }
 0x4fb   : > { %2416 = vmatpush3.bf16.msra.mxu1 %v1643_v19  ;;  %2417 = vmatprep.mubr.msk.bf16.mxu1 %vm3085_vm3, %v3084_v39 }
 0x4fc   : > { %v1535_v22 = vpack.c.bf16 %v1531_v20, %v1531_v20  ;;  %2427 = vmatprep.subr.bf16.mxu1 %v3084_v39 }
 0x4fd   : > { %v2638_v23 = vpop.eup %2637 }
 0x4fe   : > { %1540 = vst.msk [vmem:[%s3551_s13 + $0x4] sm:$0xf] %vm1038_vm4, %v1535_v22  ;;  %2412 = vmatmul.mubr.msk.bf16.vlgmr.msra.gmra.mxu0 %vm837_vm0, %v1535_v22  ;;  %v1532_v25 = vmul.f32 %v2638_v23, %v2630_v5 }
 0x4ff   : > { %2422 = vmatpush3.bf16.msra.mxu0 %v1689_v24  ;;  %2423 = vmatprep.mubr.msk.bf16.mxu0 %vm3085_vm3, %v3084_v39 }
 0x500   : > { %v1536_v26 = vpack.c.bf16 %v1532_v25, %v1532_v25  ;;  %2435 = vmatprep.subr.bf16.mxu0 %v3084_v39 }
 0x501   : > { %v2640_v27 = vpop.eup %2639 }
 0x502   : > { %1541 = vst.msk [vmem:[%s3551_s13 + $0x8] sm:$0xf] %vm1038_vm4, %v1536_v26  ;;  %2418 = vmatmul.mubr.msk.bf16.vlgmr.msra.gmra.mxu1 %vm837_vm0, %v1536_v26  ;;  %v1533_v28 = vmul.f32 %v2640_v27, %v2632_v7  ;;  %v2620_v7 = vld [vmem:[#allocation22] sm:$0xff]  }
 0x503   : > { %2431 = vmatprep.mubr.msk.bf16.mxu1 %vm3085_vm3, %v3084_v39  ;;  %2428 = vmatpush3.bf16.msra.mxu1 %v2617_v33 }
 0x504   : > { %v1537_v29 = vpack.c.bf16 %v1533_v28, %v1533_v28  ;;  %2429 = vmatprep.subr.bf16.mxu1 %v3084_v39 }
 0x506   : > { %1542 = vst.msk [vmem:[%s3551_s13 + $0xc] sm:$0xf] %vm1038_vm4, %v1537_v29  ;;  %2424 = vmatmul.mubr.msk.bf16.vlgmr.msra.gmra.mxu0 %vm837_vm0, %v1537_v29 }
 0x507   : > { %2439 = vmatprep.mubr.msk.bf16.mxu0 %vm3085_vm3, %v3084_v39  ;;  %2430 = vmatpush3.bf16.msra.mxu1 %v2618_v36 }
 0x508   : > { %2436 = vmatpush3.bf16.msra.mxu0 %v2619_v6 }
 0x509   : > { %2437 = vmatprep.subr.bf16.mxu0 %v3084_v39 }
 0x50c   : > { %2438 = vmatpush3.bf16.msra.mxu0 %v2620_v7 }
 0x5ba   : > { %v1587_v30 = vpop.f32.mrf.mxu1 }
 0x5bb   : > { %v1731_v31 = vpack.c.bf16 %v1587_v30, %v1587_v30 }
 0x5bc   : > { %v2407_v32 = vpop.f32.mrf.mxu1 }
 0x5bd   : > { %1732 = vst.msk [vmem:[#allocation4] sm:$0xf] %vm1038_vm4, %v1731_v31 }
 0x5be   : > { %v1590_v34 = vpop.f32.mrf.mxu1  ;;  %v1633_v35 = vpop.f32.mrf.mxu0 }
 0x5bf   : > { %v2326_v37 = vpack.c.bf16 %v1633_v35, %v1633_v35 }
 0x5c0   : > { %v2408_v38 = vpop.f32.mrf.mxu1  ;;  %v2413_v40 = vpop.f32.mrf.mxu0 }
 0x5c1   : > { %1737 = vrot.lane.b32.xlu0 %v2326_v37, %s3086_s19  ;;  %s2939_s19 = sshll.u32 %s3089_s21, 4  ;;  %s2940_s19 = int_to_ptr.vmem [resolvable:$false] %s2939_s19 }
 0x5c2   : > { %v1636_v41 = vpop.f32.mrf.mxu0  ;;  %v1679_v42 = vpop.f32.mrf.mxu1  ;;  %s2941_s13 = scalar_lea.vmem %s2940_s19, 512  ;;  %p2942_p6 = scmp.lt.s32.totalorder %s3608_s4, %s2940_s19 }
 0x5c3   : > { %v2327_v43 = vpack.c.bf16 %v1679_v42, %v1679_v42  ;;  %p2943_p3 = scmp.lt.s32.totalorder %s2941_s13, %s2935_s18 }
 0x5c4   : > { %v2414_v44 = vpop.f32.mrf.mxu0  ;;  %v2419_v45 = vpop.f32.mrf.mxu1 }
 0x5c5   : > { %1746 = vrot.lane.b32.xlu1 %v2327_v43, %s3087_s1  ;;  %p2944_p5 = por %p2943_p3, %p2942_p6 }
 0x5c6   : > { %v1682_v46 = vpop.f32.mrf.mxu1  ;;  %v1725_v47 = vpop.f32.mrf.mxu0 }
 0x5c7   : > { %v2328_v48 = vpack.c.bf16 %v1725_v47, %v1725_v47  ;;  %p2945_p12 = pnand %p2944_p5, %p2938_p4 }
 0x5c8   : > { %v2420_v49 = vpop.f32.mrf.mxu1  ;;  %v2425_v50 = vpop.f32.mrf.mxu0 }
 0x5c9   : > { %1755 = vrot.lane.b32.xlu1 %v2328_v48, %s3088_s24 }
 0x5ca   : > { %v1728_v51 = vpop.f32.mrf.mxu0 }
 0x5cc   : > { %v2426_v52 = vpop.f32.mrf.mxu0 }
 0x633   : > { %v1738_v53 = vpop.permute.xlu0 %1737 }
 0x634   : > { %1741 = vst.msk [vmem:[#allocation4] sm:$0xf] %vm1740_vm6, %v1738_v53 }
 0x637   : > { %v1747_v54 = vpop.permute.xlu1 %1746 }
 0x638   : > { %1750 = vst.msk [vmem:[#allocation4] sm:$0xf] %vm1749_vm7, %v1747_v54 }
 0x63b   : > { %v1756_v55 = vpop.permute.xlu1 %1755 }
 0x63c   : > { %1759 = vst.msk [vmem:[#allocation4] sm:$0xf] %vm1758_vm8, %v1756_v55 }
 0x643   : > { %v1760_v56 = vld [vmem:[#allocation4] sm:$0xf] }
 0x644   : > { %2432 = vmatmul.mubr.msk.bf16.vlgmr.msra.gmra.mxu1 %vm1116_vm1, %v1760_v56 }
 0x704   : > { %v1821_v58 = vpop.f32.mrf.mxu1 }
 0x705   : > { %v1822_v59 = vadd.f32 %v2291_v57, %v1821_v58 }
 0x706   : > { %v2433_v60 = vpop.f32.mrf.mxu1 }
 0x707   : > { %v3590_v61 = vadd.f32 %v1822_v59, %v3449_v8 }
 0x708   : > { %v1824_v62 = vpop.f32.mrf.mxu1 }
 0x709   : > { %v1828_v63 = vsel %vm1116_vm1, %v3590_v61, 0.0 }
 0x70a   : > { %1829 = vadd.xlane.f32.xlu1 %v1828_v63  ;;  %v2434_v0 = vpop.f32.mrf.mxu1 }
 0x793   : > { %v1830_v1 = vpop.xlane.xlu1 %1829 }
 0x794   : > { %v1831_v2 = vmul.f32 0.03125, %v1830_v1 }
 0x796   : > { %v1832_v3 = vsub.f32 %v3590_v61, %v1831_v2 }
 0x798   : > { %v1833_v4 = vmul.f32 %v1832_v3, %v1832_v3 }
 0x79a   : > { %v1834_v5 = vsel %vm1116_vm1, %v1833_v4, 0.0 }
 0x79b   : > { %1835 = vadd.xlane.f32.xlu0 %v1834_v5 }
 0x824   : > { %v1836_v8 = vpop.xlane.xlu0 %1835 }
 0x825   : > { %v1837_v9 = vmul.f32 0.03125, %v1836_v8 }
 0x827   : > { %v1838_v10 = vadd.f32 1e-05, %v1837_v9 }
 0x829   : > { %2641 = vrsqrt.f32 %v1838_v10 }
 0x836   : > { %v2642_v11 = vpop.eup %2641 }
 0x837   : > { %v1840_v13 = vmul.f32 %v2642_v11, %v1832_v3 }
 0x839   : > { %v1848_v15 = vmul.f32 %v2295_v12, %v1840_v13 }
 0x83b   : > { %v1856_v16 = vadd.f32 %v2296_v14, %v1848_v15 }
 0x83d   : > { %v1857_v17 = vpack.c.bf16 %v1856_v16, %v1856_v16 }
 0x83f   : > { %2440 = vmatmul.mubr.msk.bf16.vlgmr.msra.gmra.mxu0 %vm1116_vm1, %v1857_v17 }
 0x840   : > { %2948 = shalt.err (!%p2945_p12)
}
 0x841   : > { %s2949_s1 = scalar_lea.hbm %s3606_s5, 256  ;;  %s2953_s8 = scalar_lea.hbm %s3791_s22, 512 }
 0x842   : > { %p2950_p10 = scmp.ne.s32.totalorder %s3606_s5, %s2949_s1  ;;  %p2954_p2 = scmp.lt.s32.totalorder %s3606_s5, %s3791_s22 }
 0x843   : > { %p2955_p9 = scmp.lt.s32.totalorder %s2953_s8, %s2949_s1 }
 0x844   : > { %p2951_p11 = pnand %p2950_p10, %p3792_p7 }
 0x845   : > { %p2956_p8 = por %p2955_p9, %p2954_p2 }
 0x846   : > { %p2952_p13 = pneg %p2951_p11 }
 0x848   : > { %p2957_p1 = pnand %p2956_p8, %p2952_p13 }
 0x84a   : > { %2960 = shalt.err (!%p2957_p1)
}
 0x84b   : > { %s3090_s7 = smov 64   ;;  %s3091_s25 = smov 4  }
 0x84c   : > { %2485 = dma.vmem_to_hbm [thread:$0]  (%p3792_p7), %s3608_s4, 256, %s3606_s5, %s1933_s29, %s3090_s7, %s3090_s7, %s3091_s25  }
 0x84d   : > { %s3793_s16 = sld [smem:[#allocation54_spill]]  ;;  %s2303_s18 = sshll.u32 %s3785_s3, 7 }
 0x84e   : > { %s812_s21 = scalar_lea.vmem [#allocation23], %s2229_s17  ;;  %s3794_s24 = sld [smem:[#allocation55_spill]] }
 0x84f   : > { %s1947_s19 = sshll.u32 %s812_s21, 4  ;;  %s1928_s5 = scalar_lea.sflag [#allocation7], %s3411_s10  ;;  %s1948_s19 = int_to_ptr.vmem [resolvable:$true] %s1947_s19 }
 0x850   : > { %s2961_s29 = scalar_lea.vmem %s1948_s19, 128  ;;  %s3092_s17 = smov [#allocation23]  }
 0x851   : > { %p2962_p0 = scmp.ne.s32.totalorder %s1948_s19, %s2961_s29  ;;  %s2965_s3 = sshll.u32 %s3092_s17, 4  ;;  %s2966_s3 = int_to_ptr.vmem [resolvable:$false] %s2965_s3 }
 0x852   : > { %s2967_s23 = scalar_lea.vmem %s2966_s3, 256  ;;  %p2968_p3 = scmp.lt.s32.totalorder %s1948_s19, %s2966_s3 }
 0x853   : > { %v2297_v39 = vld [vmem:[%s3793_s16] ss:$0 sm:$0xff]  ;;  %p2963_p4 = pnand %p2962_p0, %p3792_p7  ;;  %p2969_p5 = scmp.lt.s32.totalorder %s2967_s23, %s2961_s29 }
 0x854   : > { %s3643_s4 = scalar_lea.hbm %s3794_s24, %s2303_s18 }
 0x855   : > { %p2964_p6 = pneg %p2963_p4  ;;  %p2970_p12 = por %p2969_p5, %p2968_p3 }
 0x857   : > { %p2971_p10 = pnand %p2970_p12, %p2964_p6 }
 0x8ff   : > { %v1918_v18 = vpop.f32.mrf.mxu0 }
 0x900   : > { %v1919_v19 = vadd.f32 %v2297_v39, %v1918_v18 }
 0x901   : > { %v2441_v20 = vpop.f32.mrf.mxu0 }
 0x902   : > { %v1924_v21 = vmax.f32 %v1919_v19, 0.0 }
 0x903   : > { %v1921_v22 = vpop.f32.mrf.mxu0 }
 0x904   : > { %v1925_v23 = vadd.f32 %v1924_v21, %v3590_v61 }
 0x905   : > { %v2442_v24 = vpop.f32.mrf.mxu0 }
 0x906   : > { %1926 = vst.msk [vmem:[%s812_s21] sm:$0xff] %vm1116_vm1, %v1925_v23 }
 0x907   : > { %2974 = shalt.err (!%p2971_p10)
}
 0x908   : > { %s2975_s8 = scalar_lea.hbm %s3643_s4, 128  ;;  %s2979_s2 = scalar_lea.hbm %s3794_s24, 256 }
 0x909   : > { %p2976_p11 = scmp.ne.s32.totalorder %s3643_s4, %s2975_s8  ;;  %p2980_p9 = scmp.lt.s32.totalorder %s3643_s4, %s3794_s24 }
 0x90a   : > { %p2981_p8 = scmp.lt.s32.totalorder %s2979_s2, %s2975_s8 }
 0x90b   : > { %p2977_p13 = pnand %p2976_p11, %p3792_p7 }
 0x90c   : > { %p2982_p1 = por %p2981_p8, %p2980_p9 }
 0x90d   : > { %p2978_p2 = pneg %p2977_p13 }
 0x90f   : > { %p2983_p0 = pnand %p2982_p1, %p2978_p2 }
 0x911   : > { %2986 = shalt.err (!%p2983_p0)
}
 0x912   : > { %2484 = dma.vmem_to_hbm [thread:$0]  (%p3792_p7), %s1948_s19, 128, %s3643_s4, %s1928_s5  }
 0x913 PF: > { %s3795_s27 = sld [smem:[#allocation34_spill]] }
 0x914   : > { %s3796_s12 = sld [smem:[#allocation41_spill]] }
 0x915   : > { %s3797_s16 = sld [smem:[#allocation37_spill]] }
 0x919   : > { %s1976_s18 = sand.u32 1, %s3795_s27  }
 0x91a   : > { %p3798_p4 = scmp.ne.s32.totalorder %s3796_s12, 0  ;;  %s1977_s21 = scalar_lea.sflag [#allocation7], %s1976_s18 }
 0x91b   : > { %p3799_p6 = scmp.ge.s32.totalorder %s3797_s16, 2 }
 0x91d   : > { %p2524_p3 = pnand %p3799_p6, %p3798_p4 }
 0x91f   : > { %p2525_p5 = pneg %p2524_p3 }
 0x921   : > { %3036 = dma.done.wait (%p2525_p5), %s1977_s21, 128  }
 0x922   : > { %3038 = vsyncadd (%p2525_p5), %s1977_s21, 4294967168  ;;  %s1986_s13 = scalar_lea.sflag [#allocation25], %s1976_s18 }
 0x923   : > { %3040 = dma.done.wait (%p2525_p5), %s1986_s13, 256  }
 0x924   : > { %3042 = vsyncadd (%p2525_p5), %s1986_s13, 4294967040  ;;  %s45_s19 = sadd.s32 1, %s3797_s16   ;;  %s3800_s30 = sld [smem:[#allocation35_spill]] }
 0x925   : > { %p42_p12 = scmp.ge.s32.totalorder %s45_s19, 4   ;;  %s3801_s29 = sld [smem:[#allocation40_spill]] }
 0x926   : > { %s3802_s1 = sld [smem:[#allocation38_spill]]  ;;  %s3803_s27 = smov %s3049_s28 }
 0x928   :  { %44 = sbr.rel (!%p42_p12) target bundleno = 30 (0x1e), region = 213 }
 0x92a   : > { %s3804_s28 = smov %s3800_s30  ;;  %s3805_s30 = smov %s3061_s0 }
 0x92c   : > { %s3806_s0 = smov %s3802_s1 }
 0x92d   :  { %1991 = vsyncpa [#allocation6], 1 }
 0x92e   :  { %1993 = vsyncpa [#allocation6 + $0x1], 1 }
 0x92f   :  { %1994 = vsyncpa [#allocation9], 1 }
 0x930   :  { %1996 = vsyncpa [#allocation9 + $0x1], 1 }
 0x931   :  { %1997 = vsyncpa [#allocation12], 1 }
 0x932   :  { %1998 = vsyncpa [#allocation15], 1 }
 0x933   :  { %1999 = vsyncpa [#allocation18], 1 }
 0x934   :  { %2000 = vsyncpa [#allocation21], 1 }
 0x935   :  { %2001 = vsyncpa [#allocation7], 1 }
 0x936   :  { %2003 = vsyncpa [#allocation7 + $0x1], 1 }
 0x937   :  { %2004 = vsyncpa [#allocation25], 1 }
 0x938   :  { %2006 = vsyncpa [#allocation25 + $0x1], 1 }

// kernel: tpu_custom_call.1
= control target key start
LH: loop header
LB: loop body
LE: loop exit
PB: predicated region body
PF: predicated region fallthrough
CT: control target
= control target key end

     0   :  { %s3686_s0 = inlined_call_operand.hbm [shape: f32[2,8,32], index: 0, kind: input, shape index: {}]   ;;  %s3687_s1 = inlined_call_operand.hbm [shape: f32[2,4,8,8], index: 1, kind: input, shape index: {}]   ;;  %s3688_s2 = inlined_call_operand.hbm [shape: f32[2,4,8,8], index: 2, kind: input, shape index: {}]   ;;  %s3689_s3 = inlined_call_operand.vmem [shape: f32[2,1,8], index: 3, kind: input, shape index: {}]   ;;  %s3690_s4 = inlined_call_operand.vmem [shape: f32[4,1,8], index: 4, kind: input, shape index: {}]   ;;  %s3691_s5 = inlined_call_operand.hbm [shape: f32[4,1,8], index: 5, kind: input, shape index: {}]   ;;  %s3692_s6 = inlined_call_operand.hbm [shape: f32[4,1,8], index: 6, kind: input, shape index: {}]   ;;  %s3693_s7 = inlined_call_operand.hbm [shape: f32[4,1,8], index: 7, kind: input, shape index: {}]   ;;  %s3694_s8 = inlined_call_operand.vmem [shape: f32[1,32], index: 8, kind: input, shape index: {}]   ;;  %s3695_s9 = inlined_call_operand.hbm [shape: f32[1,32], index: 9, kind: input, shape index: {}]   ;;  %s3696_s10 = inlined_call_operand.hbm [shape: bf16[8,8], index: 10, kind: input, shape index: {}]   ;;  %s3697_s11 = inlined_call_operand.hbm [shape: bf16[8,8], index: 11, kind: input, shape index: {}]   ;;  %s3698_s12 = inlined_call_operand.hbm [shape: bf16[8,8], index: 12, kind: input, shape index: {}]   ;;  %s3699_s13 = inlined_call_operand.vmem [shape: bf16[32,32], index: 13, kind: input, shape index: {}]   ;;  %s3700_s14 = inlined_call_operand.vmem [shape: f32[1,32], index: 14, kind: input, shape index: {}]   ;;  %s3701_s15 = inlined_call_operand.hbm [shape: bf16[32,32], index: 15, kind: input, shape index: {}]   ;;  %s3702_s16 = inlined_call_operand.vmem [shape: f32[1,32], index: 16, kind: input, shape index: {}]   ;;  %s3703_s17 = inlined_call_operand.hbm [shape: f32[2,8,32], index: 17, kind: output, shape index: {0}]   ;;  %s3704_s18 = inlined_call_operand.hbm [shape: bf16[2,4,8,8], index: 18, kind: output, shape index: {1}]  }
   0x1   :  { %3729 = sst [smem:[#allocation42_spill]] %s3686_s0 }
   0x2   :  { %3730 = sst [smem:[#allocation43_spill]] %s3687_s1 }
   0x3   :  { %3731 = sst [smem:[#allocation44_spill]] %s3688_s2 }
   0x4   :  { %3732 = sst [smem:[#allocation45_spill]] %s3689_s3 }
   0x5   :  { %3733 = sst [smem:[#allocation46_spill]] %s3690_s4 }
   0x6   :  { %3734 = sst [smem:[#allocation47_spill]] %s3691_s5 }
   0x7   :  { %3735 = sst [smem:[#allocation48_spill]] %s3693_s7 }
   0x8   :  { %3736 = sst [smem:[#allocation49_spill]] %s3694_s8 }
   0x9   :  { %3737 = sst [smem:[#allocation50_spill]] %s3696_s10 }
   0xa   :  { %3738 = sst [smem:[#allocation51_spill]] %s3698_s12 }
   0xb   :  { %3739 = sst [smem:[#allocation52_spill]] %s3699_s13 }
   0xc   :  { %3740 = sst [smem:[#allocation53_spill]] %s3700_s14 }
   0xd   :  { %3741 = sst [smem:[#allocation54_spill]] %s3702_s16 }
   0xe   :  { %3742 = sst [smem:[#allocation55_spill]] %s3703_s17 }
   0xf   :  { %3743 = sst [smem:[#allocation56_spill]] %s3704_s18 }
  0x10   :  { %24 = vsyncpa [#allocation6], 0 }
  0x11   :  { %26 = vsyncpa [#allocation6 + $0x1], 0 }
  0x12   :  { %27 = vsyncpa [#allocation9], 0 }
  0x13   :  { %29 = vsyncpa [#allocation9 + $0x1], 0 }
  0x14   :  { %30 = vsyncpa [#allocation12], 0 }
  0x15   :  { %31 = vsyncpa [#allocation15], 0 }
  0x16   :  { %32 = vsyncpa [#allocation18], 0 }
  0x17   :  { %33 = vsyncpa [#allocation21], 0 }
  0x18   :  { %34 = vsyncpa [#allocation7], 0 }
  0x19   :  { %36 = vsyncpa [#allocation7 + $0x1], 0 }
  0x1a   :  { %37 = vsyncpa [#allocation25], 0 }
  0x1b   :  { %39 = vsyncpa [#allocation25 + $0x1], 0  ;;  %s3188_s27 = smov 0   ;;  %s3190_s28 = smov 0  }
  0x1c   :  { %s3192_s29 = smov 0   ;;  %s3194_s30 = smov 0  }
  0x1d   :  { %s3196_s0 = smov 0   ;;  %s3198_s19 = smov 0  }
  0x1e LB: > { %3744 = sst [smem:[#allocation34_spill]] %s3045_s27  ;;  %s3219_s1 = sadd.s32 4294967295, %s3065_s19   ;;  %s3065_s19 = sphi %s3198_s19, %s45_s19   ;;  %s3061_s0 = sphi %s3196_s0, %s3806_s0   ;;  %s3057_s30 = sphi %s3194_s30, %s3805_s30   ;;  %s3053_s29 = sphi %s3192_s29, %s3801_s29   ;;  %s3049_s28 = sphi %s3190_s28, %s3804_s28   ;;  %s3045_s27 = sphi %s3188_s27, %s3803_s27  }
  0x1f   : > { %3745 = sst [smem:[#allocation35_spill]] %s3053_s29  ;;  %p2210_p0 = scmp.ge.s32.totalorder %s3065_s19, 1 }
  0x20   : > { %3746 = sst [smem:[#allocation36_spill]] %s3057_s30  ;;  %p3709_p1 = scmp.eq.s32.totalorder %s3219_s1, 0 }
  0x21   : > { %3747 = sst [smem:[#allocation37_spill]] %s3065_s19  ;;  %p499_p2 = scmp.lt.s32.totalorder %s3065_s19, 3 }
  0x22   : > { %s3067_s21 = smov [#allocation11]   ;;  %s3068_s23 = smov [#allocation14]  }
  0x23   : > { %p3224_p3 = pnand %p2210_p0, %p499_p2  ;;  %s514_s22 = sshll.u32 %s3067_s21, 4  ;;  %s515_s22 = int_to_ptr.vmem [resolvable:$true] %s514_s22 }
  0x24   : > { %s540_s24 = sshll.u32 %s3068_s23, 4  ;;  %s3069_s25 = smov [#allocation17]   ;;  %s541_s24 = int_to_ptr.vmem [resolvable:$true] %s540_s24 }
  0x25   : > { %s3748_s20 = scalar_select %p3224_p3, 1, 0 }
  0x26   : > { %p2488_p4 = pneg %p3224_p3  ;;  %s568_s26 = sshll.u32 %s3069_s25, 4  ;;  %s569_s26 = int_to_ptr.vmem [resolvable:$true] %s568_s26 }
  0x27   : > { %s2654_s21 = scalar_lea.vmem %s515_s22, 64  ;;  %p2662_p11 = scmp.lt.s32.totalorder %s515_s22, %s515_s22 }
  0x28   : > { %p3233_p6 = pnand %p2488_p4, %p3709_p1  ;;  %p2655_p8 = scmp.ne.s32.totalorder %s515_s22, %s2654_s21 }
  0x29   : > { %p2663_p12 = scmp.lt.s32.totalorder %s2654_s21, %s2654_s21 }
  0x2a   : > { %p3239_p7 = pneg %p3233_p6 }
  0x2b   : > { %p2664_p13 = por %p2663_p12, %p2662_p11 }
  0x2c   : > { %p2657_p9 = pnand %p2655_p8, %p3239_p7 }
  0x2e   : > { %p2658_p10 = pneg %p2657_p9 }
  0x30   : > { %p2665_p0 = pnand %p2664_p13, %p2658_p10 }
  0x32   : > { %2668 = shalt.err (!%p2665_p0)
}
  0x33   : > { %s3707_s23 = smov 16   ;;  %s3708_s25 = smov 1  }
  0x34   : > { %s3751_s5 = sld [smem:[#allocation47_spill]]  ;;  %s2680_s8 = scalar_lea.vmem %s541_s24, 64 }
  0x35   : > { %p2681_p2 = scmp.ne.s32.totalorder %s541_s24, %s2680_s8  ;;  %p2688_p9 = scmp.lt.s32.totalorder %s541_s24, %s541_s24 }
  0x36   : > { %p2689_p10 = scmp.lt.s32.totalorder %s2680_s8, %s2680_s8 }
  0x37   : > { %p2683_p4 = pnand %p2681_p2, %p3239_p7 }
  0x38   : > { %p2690_p11 = por %p2689_p10, %p2688_p9 }
  0x39   : > { %p2684_p8 = pneg %p2683_p4 }
  0x3a   : > { %2491 = dma.hbm_to_vmem [thread:$0]  (!%p3233_p6), %s3751_s5, 64, %s515_s22, [#allocation12], %s3707_s23, %s3707_s23, %s3708_s25  }
  0x3b   : > { %p2691_p12 = pnand %p2690_p11, %p2684_p8 }
  0x3d   : > { %2694 = shalt.err (!%p2691_p12)
}
  0x3e   : > { %s3752_s7 = sld [smem:[#allocation48_spill]]  ;;  %s2706_s16 = scalar_lea.vmem %s569_s26, 64 }
  0x3f   : > { %p2707_p13 = scmp.ne.s32.totalorder %s569_s26, %s2706_s16  ;;  %p2714_p4 = scmp.lt.s32.totalorder %s569_s26, %s569_s26 }
  0x40   : > { %p2715_p9 = scmp.lt.s32.totalorder %s2706_s16, %s2706_s16 }
  0x41   : > { %p2709_p0 = pnand %p2707_p13, %p3239_p7 }
  0x42   : > { %p2716_p8 = por %p2715_p9, %p2714_p4 }
  0x43   : > { %p2710_p2 = pneg %p2709_p0 }
  0x44   : > { %2497 = dma.hbm_to_vmem [thread:$0]  (!%p3233_p6), %s3752_s7, 64, %s541_s24, [#allocation15], %s3707_s23, %s3707_s23, %s3708_s25  }
  0x45   : > { %p2717_p10 = pnand %p2716_p8, %p2710_p2 }
  0x47   : > { %2720 = shalt.err (!%p2717_p10)
}
  0x48   : > { %s3753_s10 = sld [smem:[#allocation50_spill]]  ;;  %s3072_s14 = smov [#allocation20]  }
  0x49   : > { %s590_s22 = sshll.u32 %s3072_s14, 4  ;;  %s591_s22 = int_to_ptr.vmem [resolvable:$true] %s590_s22 }
  0x4a   : > { %s2732_s24 = scalar_lea.vmem %s591_s22, 64  ;;  %p2740_p0 = scmp.lt.s32.totalorder %s591_s22, %s591_s22 }
  0x4b   : > { %p2733_p11 = scmp.ne.s32.totalorder %s591_s22, %s2732_s24  ;;  %p2741_p5 = scmp.lt.s32.totalorder %s2732_s24, %s2732_s24 }
  0x4d   : > { %p2735_p12 = pnand %p2733_p11, %p3239_p7  ;;  %p2742_p4 = por %p2741_p5, %p2740_p0 }
  0x4e   : > { %2503 = dma.hbm_to_vmem [thread:$0]  (!%p3233_p6), %s3753_s10, 64, %s569_s26, [#allocation18]  }
  0x4f   : > { %p2736_p13 = pneg %p2735_p12 }
  0x51   : > { %p2743_p2 = pnand %p2742_p4, %p2736_p13 }
  0x53   : > { %2746 = shalt.err (!%p2743_p2)
}
  0x54   : > { %s3754_s12 = sld [smem:[#allocation51_spill]]  ;;  %s2209_s26 = sadd.s32 4294967294, %s3065_s19  }
  0x55   : > { %s57_s8 = sadd.s32 1, %s3061_s0  ;;  %s66_s18 = sadd.s32 1, %s3053_s29 }
  0x56   : > { %p59_p5 = scmp.ge.s32.totalorder %s57_s8, 2  ;;  %p73_p9 = scmp.ne.s32.totalorder %s3053_s29, %s3049_s28 }
  0x57   : > { %p74_p8 = scmp.eq.s32.totalorder %s3065_s19, 0  ;;  %p79_p11 = scmp.ne.s32.totalorder %s3049_s28, %s3045_s27 }
  0x58   : > { %s3808_s8 = smov (%p59_p5, %s57_s8), 0  ;;  %p458_p12 = scmp.eq.s32.totalorder %s3219_s1, 1 }
  0x59   : > { %3755 = sst [smem:[#allocation38_spill]] %s3808_s8  ;;  %p3285_p10 = por %p74_p8, %p73_p9 }
  0x5a   : > { %2509 = dma.hbm_to_vmem [thread:$0]  (!%p3233_p6), %s3754_s12, 64, %s591_s22, [#allocation21]  }
  0x5b   : > { %s61_s22 = ssub.s32 %s3061_s0, %s3808_s8  ;;  %p3296_p0 = por %p3709_p1, %p79_p11 }
  0x5c   : > { %p64_p13 = scmp.eq.s32.totalorder %s61_s22, 0  ;;  %p3300_p4 = por %p458_p12, %p73_p9 }
  0x5d   : > { %s3757_s24 = scalar_select %p3296_p0, 1, 0 }
  0x5e   : > { %s3758_s21 = scalar_select %p3300_p4, 1, 0 }
  0x5f   : > { %p464_p2 = scmp.eq.s32.totalorder %s2209_s26, 1  ;;  %p2538_p8 = scmp.lt.s32.totalorder %s3065_s19, 2 }
  0x60   : > { %3759 = sst [smem:[#allocation39_spill]] %s3758_s21  ;;  %s3313_s25 = sand.u32 1, %s3053_s29  }
  0x61   : > { %s3305_s16 = scalar_select %p64_p13, %s3053_s29, %s66_s18  }
  0x62   : > { %p3307_p5 = por %p464_p2, %p79_p11  ;;  %s642_s22 = sand.u32 1, %s3065_s19  }
  0x63   : > { %3760 = sst [smem:[#allocation40_spill]] %s3305_s16  ;;  %p3318_p1 = pnand %p2538_p8, %p3285_p10 }
  0x64   : > { %s3761_s23 = scalar_select %p3307_p5, 1, 0 }
  0x65   : > { %s3763_s5 = scalar_select %p3318_p1, 1, 0 }
  0x66   : > { %3762 = sst [smem:[#allocation41_spill]] %s3761_s23  ;;  %s2222_s7 = sshll.u32 %s3313_s25, 5 }
  0x67   : > { %s2308_s26 = sshll.u32 %s3061_s0, 9  ;;  %s3764_s12 = sld [smem:[#allocation43_spill]] }
  0x68   : > { %s646_s16 = scalar_lea.vmem [#allocation8], %s2222_s7  ;;  %s3327_s29 = scalar_lea.sflag [#allocation9], %s642_s22 }
  0x69   : > { %s654_s23 = sshll.u32 %s646_s16, 4  ;;  %p3721_p9 = pneg %p3318_p1  ;;  %s655_s23 = int_to_ptr.vmem [resolvable:$true] %s654_s23 }
  0x6a   : > { %s2760_s14 = scalar_lea.vmem %s655_s23, 512  ;;  %s3073_s19 = smov [#allocation8]  }
  0x6b   : > { %p2761_p10 = scmp.ne.s32.totalorder %s655_s23, %s2760_s14  ;;  %s2765_s27 = sshll.u32 %s3073_s19, 4  ;;  %s2766_s27 = int_to_ptr.vmem [resolvable:$false] %s2765_s27 }
  0x6c   : > { %s2767_s21 = scalar_lea.vmem %s2766_s27, 1024  ;;  %p2768_p13 = scmp.lt.s32.totalorder %s655_s23, %s2766_s27 }
  0x6d   : > { %s653_s8 = scalar_lea.hbm %s3764_s12, %s2308_s26  ;;  %p2763_p11 = pnand %p2761_p10, %p3721_p9 }
  0x6e   : > { %p2769_p2 = scmp.lt.s32.totalorder %s2767_s21, %s2760_s14 }
  0x6f   : > { %p2764_p12 = pneg %p2763_p11 }
  0x70   : > { %p2770_p8 = por %p2769_p2, %p2768_p13 }
  0x72   : > { %p2771_p5 = pnand %p2770_p8, %p2764_p12 }
  0x74   : > { %2774 = shalt.err (!%p2771_p5)
}
  0x75   : > { %s3727_s10 = smov 128   ;;  %s3728_s12 = smov 8  }
  0x76   : > { %2519 = dma.hbm_to_vmem [thread:$0]  (!%p3318_p1), %s653_s8, 512, %s655_s23, %s3327_s29, %s3727_s10, %s3727_s10, %s3728_s12  }
  0x77   : > { %s3765_s19 = sld [smem:[#allocation44_spill]]  ;;  %s3345_s27 = scalar_lea.vmem [#allocation10], %s2222_s7 }
  0x78   : > { %s675_s21 = sshll.u32 %s3345_s27, 4  ;;  %s3076_s14 = smov [#allocation13]   ;;  %s3386_s21 = int_to_ptr.vmem [resolvable:$true] %s675_s21 }
  0x79   : > { %s527_s13 = sshll.u32 %s3076_s14, 4  ;;  %s3077_s3 = smov [#allocation16]   ;;  %s528_s13 = int_to_ptr.vmem [resolvable:$true] %s527_s13 }
  0x7a   : > { %s557_s30 = sshll.u32 %s3077_s3, 4  ;;  %s2786_s4 = scalar_lea.vmem %s528_s13, 64  ;;  %s558_s30 = int_to_ptr.vmem [resolvable:$true] %s557_s30 }
  0x7b   : > { %p2787_p5 = scmp.ne.s32.totalorder %s528_s13, %s2786_s4  ;;  %p2794_p12 = scmp.lt.s32.totalorder %s528_s13, %s528_s13 }
  0x7c   : > { %p2795_p13 = scmp.lt.s32.totalorder %s2786_s4, %s2786_s4 }
  0x7d   : > { %s3343_s18 = scalar_lea.hbm %s3765_s19, %s2308_s26  ;;  %p2789_p10 = pnand %p2787_p5, %p3239_p7 }
  0x7e   : > { %p2796_p2 = por %p2795_p13, %p2794_p12 }
  0x7f   : > { %p2790_p11 = pneg %p2789_p10 }
  0x81   : > { %p2797_p8 = pnand %p2796_p2, %p2790_p11 }
  0x83   : > { %2800 = shalt.err (!%p2797_p8)
}
  0x84   : > { %s3766_s7 = smov 1   ;;  %s3767_s23 = smov 16  }
  0x85   : > { %2494 = dma.hbm_to_vmem [thread:$0]  (!%p3233_p6), %s3692_s6, 64, %s528_s13, [#allocation12], %s3767_s23, %s3767_s23, %s3766_s7  }
  0x86   : > { %s2812_s3 = scalar_lea.vmem %s558_s30, 16  ;;  %s2819_s4 = scalar_lea.vmem %s558_s30, 32 }
  0x87   : > { %p2813_p9 = scmp.ne.s32.totalorder %s558_s30, %s2812_s3  ;;  %p2820_p12 = scmp.lt.s32.totalorder %s558_s30, %s558_s30 }
  0x88   : > { %p2821_p11 = scmp.lt.s32.totalorder %s2819_s4, %s2812_s3 }
  0x89   : > { %p2815_p5 = pnand %p2813_p9, %p3239_p7 }
  0x8a   : > { %p2822_p13 = por %p2821_p11, %p2820_p12 }
  0x8b   : > { %p2816_p10 = pneg %p2815_p5 }
  0x8d   : > { %p2823_p2 = pnand %p2822_p13, %p2816_p10 }
  0x8f   : > { %2826 = shalt.err (!%p2823_p2)
}
  0x90   : > { %2500 = dma.hbm_to_vmem [thread:$0]  (!%p3233_p6), %s3695_s9, 16, %s558_s30, [#allocation15]  }
  0x91   : > { %s3078_s13 = smov [#allocation19]   ;;  %s3079_s14 = smov [#allocation22]  }
  0x92   : > { %s579_s19 = sshll.u32 %s3078_s13, 4  ;;  %s606_s7 = sshll.u32 %s3079_s14, 4  ;;  %s580_s19 = int_to_ptr.vmem [resolvable:$true] %s579_s19  ;;  %s607_s7 = int_to_ptr.vmem [resolvable:$true] %s606_s7 }
  0x93   : > { %s2838_s23 = scalar_lea.vmem %s580_s19, 64  ;;  %p2846_p12 = scmp.lt.s32.totalorder %s580_s19, %s580_s19 }
  0x94   : > { %p2839_p9 = scmp.ne.s32.totalorder %s580_s19, %s2838_s23  ;;  %p2847_p10 = scmp.lt.s32.totalorder %s2838_s23, %s2838_s23 }
  0x96   : > { %p2841_p8 = pnand %p2839_p9, %p3239_p7  ;;  %p2848_p11 = por %p2847_p10, %p2846_p12 }
  0x98   : > { %p2842_p5 = pneg %p2841_p8 }
  0x9a   : > { %p2849_p13 = pnand %p2848_p11, %p2842_p5 }
  0x9c   : > { %2852 = shalt.err (!%p2849_p13)
}
  0x9d   : > { %2506 = dma.hbm_to_vmem [thread:$0]  (!%p3233_p6), %s3697_s11, 64, %s580_s19, [#allocation18]  }
  0x9e   : > { %s2864_s30 = scalar_lea.vmem %s607_s7, 256  ;;  %p2872_p9 = scmp.lt.s32.totalorder %s607_s7, %s607_s7 }
  0x9f   : > { %p2865_p2 = scmp.ne.s32.totalorder %s607_s7, %s2864_s30  ;;  %p2873_p8 = scmp.lt.s32.totalorder %s2864_s30, %s2864_s30 }
  0xa1   : > { %p2867_p4 = pnand %p2865_p2, %p3239_p7  ;;  %p2874_p3 = por %p2873_p8, %p2872_p9 }
  0xa3   : > { %p2868_p0 = pneg %p2867_p4 }
  0xa5   : > { %p2875_p1 = pnand %p2874_p3, %p2868_p0 }
  0xa7   : > { %2878 = shalt.err (!%p2875_p1)
}
  0xa8   : > { %s3080_s3 = smov 64   ;;  %s3081_s4 = smov 4  }
  0xa9   : > { %2512 = dma.hbm_to_vmem [thread:$0]  (!%p3233_p6), %s3701_s15, 256, %s607_s7, [#allocation21], %s3080_s3, %s3080_s3, %s3081_s4  }
  0xaa   : > { %s2220_s17 = sshll.u32 %s3313_s25, 3  ;;  %s2221_s13 = sshll.u32 %s3061_s0, 7 }
  0xab   : > { %s3768_s23 = sld [smem:[#allocation42_spill]]  ;;  %s627_s26 = scalar_lea.vmem [#allocation5], %s2220_s17 }
  0xac   : > { %s635_s30 = sshll.u32 %s627_s26, 4  ;;  %s624_s10 = scalar_lea.sflag [#allocation6], %s3313_s25  ;;  %s636_s30 = int_to_ptr.vmem [resolvable:$true] %s635_s30 }
  0xad   : > { %s2892_s12 = scalar_lea.vmem %s636_s30, 128  ;;  %p3769_p3 = scmp.ne.s32.totalorder %s3763_s5, 0 }
  0xae   : > { %p2893_p1 = scmp.ne.s32.totalorder %s636_s30, %s2892_s12  ;;  %s3082_s2 = smov [#allocation5]  }
  0xaf   : > { %p3770_p7 = pneg %p3769_p3  ;;  %s2897_s7 = sshll.u32 %s3082_s2, 4  ;;  %s2898_s7 = int_to_ptr.vmem [resolvable:$false] %s2897_s7 }
  0xb0   : > { %s2899_s3 = scalar_lea.vmem %s2898_s7, 256  ;;  %p2900_p6 = scmp.lt.s32.totalorder %s636_s30, %s2898_s7 }
  0xb1   : > { %s633_s8 = scalar_lea.hbm %s3768_s23, %s2221_s13  ;;  %p2895_p0 = pnand %p2893_p1, %p3770_p7 }
  0xb2   : > { %p2901_p5 = scmp.lt.s32.totalorder %s2899_s3, %s2892_s12 }
  0xb3   : > { %p2896_p4 = pneg %p2895_p0 }
  0xb4   : > { %p2902_p12 = por %p2901_p5, %p2900_p6 }
  0xb6   : > { %p2903_p10 = pnand %p2902_p12, %p2896_p4 }
  0xb8   : > { %2906 = shalt.err (!%p2903_p10)
}
  0xb9   : > { %2516 = dma.hbm_to_vmem [thread:$0]  (!%p3769_p3), %s633_s8, 128, %s636_s30, %s624_s10  }
  0xba   : > { %s2920_s25 = scalar_lea.vmem %s3386_s21, 512  ;;  %p3771_p13 = pmov %p3770_p7 }
  0xbb   : > { %p2921_p11 = scmp.ne.s32.totalorder %s3386_s21, %s2920_s25  ;;  %s3083_s27 = smov [#allocation10]  }
  0xbc   : > { %s2925_s4 = sshll.u32 %s3083_s27, 4  ;;  %s2926_s4 = int_to_ptr.vmem [resolvable:$false] %s2925_s4 }
  0xbd   : > { %p2923_p2 = pnand %p2921_p11, %p3771_p13  ;;  %s2927_s12 = scalar_lea.vmem %s2926_s4, 1024 }
  0xbe   : > { %p2928_p8 = scmp.lt.s32.totalorder %s3386_s21, %s2926_s4  ;;  %p2929_p1 = scmp.lt.s32.totalorder %s2927_s12, %s2920_s25 }
  0xbf   : > { %p2924_p9 = pneg %p2923_p2 }
  0xc0   : > { %p2930_p7 = por %p2929_p1, %p2928_p8 }
  0xc2   : > { %p2931_p0 = pnand %p2930_p7, %p2924_p9 }
  0xc4   : > { %2934 = shalt.err (!%p2931_p0)
}
  0xc5   : > { %s3772_s16 = smov 8   ;;  %s3773_s22 = smov 128  }
  0xc6   : > { %2522 = dma.hbm_to_vmem [thread:$0]  (!%p3769_p3), %s3343_s18, 512, %s3386_s21, %s3327_s29, %s3773_s22, %s3773_s22, %s3772_s16  }
  0xc7   : > { %p3774_p4 = scmp.ne.s32.totalorder %s3748_s20, 0 }
  0xc8   : > { %s3411_s10 = sand.u32 (!%p3774_p4), 1, %s3049_s28   ;;  %p3775_p6 = scmp.ne.s32.totalorder (!%p3774_p4), %s3757_s24, 0 }
  0xc9   : > { %693 = sbr.rel (%p3774_p4) target bundleno = 2323 (0x913), region = 88  ;;  %s2229_s17 = sshll.u32 (!%p3774_p4), %s3411_s10, 3 }
  0xca   : > { %s696_s13 = scalar_lea.sflag (!%p3774_p4), [#allocation6], %s3411_s10  ;;  %s699_s5 = scalar_lea.vmem (!%p3774_p4), [#allocation5], %s2229_s17 }
  0xce   : > { %3012 = dma.done.wait (%p3775_p6), %s696_s13, 128  }
  0xcf   : > { %3014 = vsyncadd (%p3775_p6), %s696_s13, 4294967168  ;;  %s704_s29 = sand.u32 1, %s3219_s1   ;;  %s2230_s20 = sshll.u32 %s3411_s10, 5 }
  0xd0   : > { %s705_s18 = scalar_lea.sflag [#allocation9], %s704_s29  ;;  %s3423_s21 = scalar_lea.vmem [#allocation8], %s2230_s20 }
  0xd1   : > { %3016 = dma.done.wait (%p3775_p6), %s705_s18, 1024  }
  0xd2   : > { %3018 = vsyncadd (%p3775_p6), %s705_s18, 4294966272  ;;  %s717_s19 = scalar_lea.vmem [#allocation10], %s2230_s20  ;;  %p3776_p3 = scmp.eq.s32.totalorder %s3219_s1, 0 }
  0xd4   : > { %3020 = dma.done.wait (%p3776_p3), [#allocation12], 128   ;;  %p3777_p5 = pmov %p3776_p3 }
  0xd5   : > { %p3778_p12 = pmov %p3776_p3 }
  0xd6   : > { %3022 = vsyncadd (%p3777_p5), [#allocation12], 4294967168 }
  0xd7   : > { %3024 = dma.done.wait (%p3778_p12), [#allocation15], 80   ;;  %p3779_p10 = pmov %p3776_p3 }
  0xd8   : > { %p3780_p11 = pmov %p3776_p3 }
  0xd9   : > { %3026 = vsyncadd (%p3779_p10), [#allocation15], 4294967216 }
  0xda   : > { %3028 = dma.done.wait (%p3780_p11), [#allocation18], 128   ;;  %p3781_p13 = pmov %p3776_p3 }
  0xdb   : > { %p3782_p2 = pmov %p3776_p3 }
  0xdc   : > { %3030 = vsyncadd (%p3781_p13), [#allocation18], 4294967168 }
  0xdd   : > { %3032 = dma.done.wait (%p3782_p2), [#allocation21], 320   ;;  %p3783_p9 = pmov %p3782_p2 }
  0xde   : > { %vm837_vm0 = vcmask 64512   ;;  %v833_v0 = vld [vmem:[%s717_s19] sm:$0xff]  ;;  %v835_v1 = vld [vmem:[%s717_s19 + $0x10] sm:$0xff]  ;;  %v834_v2 = vld [vmem:[%s717_s19 + $0x8] sm:$0xff]  ;;  %vm1116_vm1 = vcmask 261120   ;;  %vm969_vm2 = vcmask 1043456  }
  0xdf   : > { %3034 = vsyncadd (%p3783_p9), [#allocation21], 4294966976  ;;  %v838_v3 = vsel %vm837_vm0, %v833_v0, 0.0  ;;  %v844_v4 = vsel %vm837_vm0, %v835_v1, 0.0  ;;  %v841_v5 = vsel %vm837_vm0, %v834_v2, 0.0  ;;  %v836_v6 = vld [vmem:[%s717_s19 + $0x18] sm:$0xff] }
  0xe0   : > { %839 = vadd.xlane.f32.xlu0 %v838_v3  ;;  %845 = vadd.xlane.f32.xlu1 %v844_v4  ;;  %v847_v7 = vsel %vm837_vm0, %v836_v6, 0.0  ;;  %v3449_v8 = vld [vmem:[%s699_s5] sm:$0xff]  ;;  %v825_v52 = vld [vmem:[%s3423_s21] sm:$0xff]  ;;  %v826_v53 = vld [vmem:[%s3423_s21 + $0x8] sm:$0xff]  ;;  %s3784_s14 = sld [smem:[#allocation46_spill]]  ;;  %vm3085_vm3 = vmmov 0  }
  0xe1   : > { %v1117_v9 = vsel %vm1116_vm1, %v3449_v8, 0.0  ;;  %v952_v35 = vld [vmem:[#allocation19] sm:$0xf]  ;;  %v1043_v36 = vld [vmem:[#allocation20] sm:$0xf]  ;;  %vm1038_vm4 = vcmask 60416  }
  0xe2   : > { %2443 = vmatprep.subr.msk.bf16.mxu0 %vm969_vm2, %v952_v35  ;;  %2444 = vmatprep.subr.msk.bf16.mxu1 %vm969_vm2, %v1043_v36  ;;  %v971_v37 = vsel %vm969_vm2, %v952_v35, 0  ;;  %v1045_v38 = vsel %vm969_vm2, %v1043_v36, 0  ;;  %v3466_v39 = vld [vmem:[#allocation17] sm:$0xf]  ;;  %v828_v55 = vld [vmem:[%s3423_s21 + $0x18] sm:$0xff]  ;;  %s3785_s3 = sld [smem:[#allocation36_spill]] }
  0xe3   : > { %2362 = vmatpush3.bf16.msra.mxu0 %v971_v37  ;;  %2368 = vmatpush3.bf16.msra.mxu1 %v1045_v38  ;;  %v827_v54 = vld [vmem:[%s3423_s21 + $0x10] sm:$0xff]  ;;  %v2242_v56 = vld [vmem:[#allocation13] ss:$0 sm:$0xff]  ;;  %v2243_v57 = vld [vmem:[#allocation13 + $0x1] ss:$0 sm:$0xff]  ;;  %s3786_s12 = sld [smem:[#allocation45_spill]] }
  0xe4   : > { %842 = vadd.xlane.f32.xlu0 %v841_v5  ;;  %848 = vadd.xlane.f32.xlu1 %v847_v7  ;;  %v2246_v63 = vld [vmem:[#allocation14] ss:$0 sm:$0xff]  ;;  %s2241_s22 = sshll.u32 %s3411_s10, 4  ;;  %s3787_s20 = sld [smem:[#allocation52_spill]]  ;;  %vm1740_vm6 = vcmask 126016   ;;  %vm1749_vm7 = vcmask 191616  }
  0xe5   : > { %2445 = vmatprep.subr.msk.bf16.mxu0 %vm969_vm2, %v3466_v39  ;;  %s3551_s13 = scalar_lea.vmem [#allocation24], %s2241_s22  ;;  %s3086_s19 = smov 8   ;;  %vm1758_vm8 = vcmask 257216  }
  0xe6   : > { %s3087_s1 = smov 16   ;;  %s3088_s24 = smov 24  }
  0xe7   : > { %s3788_s26 = sld [smem:[#allocation53_spill]]  ;;  %s1961_s4 = sshll.u32 %s3551_s13, 4  ;;  %s3608_s4 = int_to_ptr.vmem [resolvable:$true] %s1961_s4 }
  0xe8   : > { %1118 = vadd.xlane.f32.xlu0 %v1117_v9  ;;  %v2265_v9 = vld [vmem:[%s3784_s14 + $0x1] ss:$0 sm:$0xff]  ;;  %p820_p8 = scmp.lt.s32.totalorder %s3785_s3, 1  ;;  %s3789_s30 = sld [smem:[#allocation39_spill]] }
  0xe9   : > { %s2329_s27 = sshll.u32 %s3785_s3, 8  ;;  %s3791_s22 = sld [smem:[#allocation56_spill]] }
  0xea   : > { %s821_s25 = scalar_select %p820_p8, %s3785_s3, 1 }
  0xeb   : > { %s1933_s29 = scalar_lea.sflag [#allocation25], %s3411_s10  ;;  %s2935_s18 = scalar_lea.vmem %s3608_s4, 256 }
  0xec   : > { %s822_s16 = scalar_lea.vmem %s3786_s12, %s821_s25  ;;  %s3790_s25 = sld [smem:[#allocation49_spill]] }
  0xed   : > { %p2936_p1 = scmp.ne.s32.totalorder %s3608_s4, %s2935_s18  ;;  %s3089_s21 = smov [#allocation24]  }
  0xee   : > { %p3792_p7 = scmp.ne.s32.totalorder %s3789_s30, 0 }
  0xef   : > { %s3606_s5 = scalar_lea.hbm %s3791_s22, %s2329_s27 }
  0xf0   : > { %p2937_p0 = pnand %p2936_p1, %p3792_p7 }
  0xf2   : > { %p2938_p4 = pneg %p2937_p0 }
 0x169   : > { %v840_v10 = vpop.xlane.xlu0 %839  ;;  %v846_v11 = vpop.xlane.xlu1 %845 }
 0x16d   : > { %v843_v12 = vpop.xlane.xlu0 %842  ;;  %v849_v14 = vpop.xlane.xlu1 %848 }
 0x16e   : > { %v850_v13 = vadd.f32 %v843_v12, %v840_v10  ;;  %v2266_v10 = vld [vmem:[%s3784_s14 + $0x2] ss:$0 sm:$0xff]  ;;  %v2247_v12 = vld [vmem:[#allocation14 + $0x1] ss:$0 sm:$0xff] }
 0x170   : > { %v851_v15 = vadd.f32 %v850_v13, %v846_v11  ;;  %v2267_v11 = vld [vmem:[%s3784_s14 + $0x3] ss:$0 sm:$0xff]  ;;  %v2248_v13 = vld [vmem:[#allocation14 + $0x2] ss:$0 sm:$0xff] }
 0x171   : > { %v1119_v16 = vpop.xlane.xlu0 %1118 }
 0x172   : > { %v852_v17 = vadd.f32 %v851_v15, %v849_v14  ;;  %v3453_v19 = vmul.f32 0.03125, %v1119_v16  ;;  %v2249_v14 = vld [vmem:[#allocation14 + $0x3] ss:$0 sm:$0xff] }
 0x174   : > { %v853_v18 = vmul.f32 0.03125, %v852_v17  ;;  %v1122_v26 = vsub.f32 %v3449_v8, %v3453_v19  ;;  %v1130_v59 = vsub.f32 %v825_v52, %v3453_v19  ;;  %v1131_v60 = vsub.f32 %v826_v53, %v3453_v19 }
 0x175   : > { %v1132_v61 = vsub.f32 %v827_v54, %v3453_v19  ;;  %v1133_v62 = vsub.f32 %v828_v55, %v3453_v19 }
 0x176   : > { %v854_v20 = vsub.f32 %v833_v0, %v853_v18  ;;  %v855_v21 = vsub.f32 %v834_v2, %v853_v18  ;;  %v856_v22 = vsub.f32 %v835_v1, %v853_v18  ;;  %v857_v23 = vsub.f32 %v836_v6, %v853_v18  ;;  %v2244_v0 = vld [vmem:[#allocation13 + $0x2] ss:$0 sm:$0xff]  ;;  %v2245_v1 = vld [vmem:[#allocation13 + $0x3] ss:$0 sm:$0xff]  ;;  %v2264_v2 = vld [vmem:[%s3784_s14] ss:$0 sm:$0xff] }
 0x177   : > { %v1123_v31 = vmul.f32 %v1122_v26, %v1122_v26 }
 0x178   : > { %v858_v24 = vmul.f32 %v854_v20, %v854_v20  ;;  %v859_v25 = vmul.f32 %v855_v21, %v855_v21  ;;  %v860_v29 = vmul.f32 %v856_v22, %v856_v22  ;;  %v861_v30 = vmul.f32 %v857_v23, %v857_v23 }
 0x179   : > { %v1124_v34 = vsel %vm1116_vm1, %v1123_v31, 0.0 }
 0x17a   : > { %v862_v27 = vsel %vm837_vm0, %v858_v24, 0.0  ;;  %v865_v28 = vsel %vm837_vm0, %v859_v25, 0.0  ;;  %v868_v32 = vsel %vm837_vm0, %v860_v29, 0.0  ;;  %v871_v33 = vsel %vm837_vm0, %v861_v30, 0.0  ;;  %v2269_v24 = vld [vmem:[#allocation11 + $0x1] ss:$0 sm:$0xff] }
 0x17b   : > { %863 = vadd.xlane.f32.xlu1 %v862_v27  ;;  %866 = vadd.xlane.f32.xlu0 %v865_v28 }
 0x17f   : > { %869 = vadd.xlane.f32.xlu1 %v868_v32  ;;  %872 = vadd.xlane.f32.xlu0 %v871_v33  ;;  %v2270_v33 = vld [vmem:[#allocation11 + $0x2] ss:$0 sm:$0xff] }
 0x183   : > { %1125 = vadd.xlane.f32.xlu1 %v1124_v34  ;;  %v2271_v34 = vld [vmem:[#allocation11 + $0x3] ss:$0 sm:$0xff] }
 0x204   : > { %v864_v40 = vpop.xlane.xlu1 %863  ;;  %v867_v41 = vpop.xlane.xlu0 %866 }
 0x205   : > { %v874_v42 = vadd.f32 %v867_v41, %v864_v40  ;;  %v1230_v40 = vsel %vm969_vm2, %v3466_v39, 0  ;;  %v3084_v39 = vmov 0.0  }
 0x206   : > { %2379 = vmatprep.subr.bf16.mxu1 %v3084_v39 }
 0x208   : > { %v870_v43 = vpop.xlane.xlu1 %869  ;;  %v873_v45 = vpop.xlane.xlu0 %872 }
 0x209   : > { %v875_v44 = vadd.f32 %v874_v42, %v870_v43 }
 0x20b   : > { %v876_v46 = vadd.f32 %v875_v44, %v873_v45 }
 0x20c   : > { %v1126_v47 = vpop.xlane.xlu1 %1125 }
 0x20d   : > { %v877_v48 = vmul.f32 0.03125, %v876_v46  ;;  %v1127_v49 = vmul.f32 0.03125, %v1126_v47 }
 0x20f   : > { %v878_v50 = vadd.f32 1e-05, %v877_v48  ;;  %v1128_v51 = vadd.f32 1e-05, %v1127_v49 }
 0x211   : > { %2621 = vrsqrt.f32 %v878_v50 }
 0x212   : > { %2623 = vrsqrt.f32 %v1128_v51 }
 0x21e   : > { %v2622_v58 = vpop.eup %2621 }
 0x21f   : > { %v2624_v3 = vpop.eup %2623  ;;  %v880_v4 = vmul.f32 %v2622_v58, %v854_v20  ;;  %v881_v5 = vmul.f32 %v2622_v58, %v855_v21  ;;  %v882_v6 = vmul.f32 %v2622_v58, %v856_v22  ;;  %v883_v7 = vmul.f32 %v2622_v58, %v857_v23  ;;  %v2268_v23 = vld [vmem:[#allocation11] ss:$0 sm:$0xff] }
 0x220   : > { %v1134_v15 = vmul.f32 %v2624_v3, %v1130_v59  ;;  %v1135_v16 = vmul.f32 %v2624_v3, %v1131_v60  ;;  %v1136_v17 = vmul.f32 %v2624_v3, %v1132_v61  ;;  %v1137_v18 = vmul.f32 %v2624_v3, %v1133_v62 }
 0x221   : > { %v912_v19 = vmul.f32 %v2242_v56, %v880_v4  ;;  %v913_v20 = vmul.f32 %v2243_v57, %v881_v5  ;;  %v914_v21 = vmul.f32 %v2244_v0, %v882_v6  ;;  %v915_v22 = vmul.f32 %v2245_v1, %v883_v7 }
 0x222   : > { %v1166_v25 = vmul.f32 %v2264_v2, %v1134_v15  ;;  %v1167_v26 = vmul.f32 %v2265_v9, %v1135_v16  ;;  %v1168_v27 = vmul.f32 %v2266_v10, %v1136_v17  ;;  %v1169_v28 = vmul.f32 %v2267_v11, %v1137_v18 }
 0x223   : > { %v944_v29 = vadd.f32 %v2246_v63, %v912_v19  ;;  %v945_v30 = vadd.f32 %v2247_v12, %v913_v20  ;;  %v946_v31 = vadd.f32 %v2248_v13, %v914_v21  ;;  %v947_v32 = vadd.f32 %v2249_v14, %v915_v22 }
 0x224   : > { %v1198_v35 = vadd.f32 %v2268_v23, %v1166_v25  ;;  %v1199_v36 = vadd.f32 %v2269_v24, %v1167_v26  ;;  %v1200_v43 = vadd.f32 %v2270_v33, %v1168_v27  ;;  %v1201_v44 = vadd.f32 %v2271_v34, %v1169_v28  ;;  %v1297_v23 = vld [vmem:[%s822_s16] sm:$0x1] }
 0x225   : > { %v2310_v37 = vpack.c.bf16 %v945_v30, %v944_v29  ;;  %v2311_v38 = vpack.c.bf16 %v947_v32, %v946_v31  ;;  %v1301_v22 = vlaneseq  ;;  %vm1298_vm5 = vcmp.eq.f32.partialorder %v1297_v23, 0.0 }
 0x226   : > { %v1202_v41 = vmul.f32 0.17677669, %v1198_v35  ;;  %v1203_v42 = vmul.f32 0.17677669, %v1199_v36  ;;  %v1204_v46 = vmul.f32 0.17677669, %v1200_v43 }
 0x227   : > { %2363 = vmatprep.mubr.msk.bf16.mxu0 %vm837_vm0, %v2310_v37  ;;  %2369 = vmatprep.mubr.msk.bf16.mxu1 %vm837_vm0, %v2310_v37  ;;  %v1205_v47 = vmul.f32 0.17677669, %v1201_v44  ;;  %v1302_v24 = vshrl.u32 %v1301_v22, 7  ;;  %v1299_v26 = vsel %vm1298_vm5, -1e+20, %v3084_v39 }
 0x228   : > { %2364 = vmatmul.mubr.msk.bf16.vlgmr.msra.gmra.mxu0 %vm837_vm0, %v2311_v38  ;;  %2370 = vmatmul.mubr.msk.bf16.vlgmr.msra.gmra.mxu1 %vm837_vm0, %v2311_v38  ;;  %v2320_v45 = vpack.c.bf16 %v1203_v42, %v1202_v41 }
 0x229   : > { %2374 = vmatpush3.bf16.msra.mxu0 %v1230_v40  ;;  %v2321_v48 = vpack.c.bf16 %v1205_v47, %v1204_v46  ;;  %2381 = vmatprep.mubr.msk.bf16.mxu1 %vm3085_vm3, %v3084_v39  ;;  %v1303_v25 = vsub.s32 0, %v1302_v24 }
 0x22a   : > { %2375 = vmatprep.mubr.msk.bf16.mxu0 %vm837_vm0, %v2320_v45  ;;  %2385 = vmatprep.subr.bf16.mxu0 %v3084_v39 }
 0x22b   : > { %v1304_v27 = vrot.slane %v1299_v26, %v1303_v25 }
 0x230   : > { %2376 = vmatmul.mubr.msk.bf16.vlgmr.msra.gmra.mxu0 %vm837_vm0, %v2321_v48 }
 0x231   : > { %2387 = vmatprep.mubr.msk.bf16.mxu0 %vm3085_vm3, %v3084_v39 }
 0x2e8   : > { %v2365_v49 = vpop.f32.mrf.mxu0  ;;  %v2371_v50 = vpop.f32.mrf.mxu1 }
 0x2e9   : > { %v2314_v51 = vpack.c.bf16 %v2365_v49, %v2365_v49  ;;  %v2318_v52 = vpack.c.bf16 %v2371_v50, %v2371_v50 }
 0x2ea   : > { %v1007_v53 = vpop.f32.mrf.mxu0  ;;  %v1081_v54 = vpop.f32.mrf.mxu1 }
 0x2eb   : > { %1041 = vst.msk [vmem:[#allocation2 + $0x8] sm:$0xf] %vm1038_vm4, %v2314_v51  ;;  %1114 = vst.msk [vmem:[#allocation3 + $0x8] sm:$0xf] %vm1038_vm4, %v2318_v52  ;;  %v2312_v55 = vpack.c.bf16 %v1007_v53, %v1007_v53  ;;  %v2316_v56 = vpack.c.bf16 %v1081_v54, %v1081_v54 }
 0x2ec   : > { %v2366_v57 = vpop.f32.mrf.mxu0  ;;  %v2372_v58 = vpop.f32.mrf.mxu1 }
 0x2ed   : > { %1039 = vst.msk [vmem:[#allocation2] sm:$0xf] %vm1038_vm4, %v2312_v55  ;;  %1112 = vst.msk [vmem:[#allocation3] sm:$0xf] %vm1038_vm4, %v2316_v56  ;;  %v2315_v59 = vpack.c.bf16 %v2366_v57, %v2366_v57  ;;  %v2319_v60 = vpack.c.bf16 %v2372_v58, %v2372_v58 }
 0x2ee   : > { %v1010_v61 = vpop.f32.mrf.mxu0  ;;  %v1084_v62 = vpop.f32.mrf.mxu1 }
 0x2ef   : > { %1042 = vst.msk [vmem:[#allocation2 + $0xc] sm:$0xf] %vm1038_vm4, %v2315_v59  ;;  %1115 = vst.msk [vmem:[#allocation3 + $0xc] sm:$0xf] %vm1038_vm4, %v2319_v60  ;;  %v2313_v63 = vpack.c.bf16 %v1010_v61, %v1010_v61  ;;  %v2317_v0 = vpack.c.bf16 %v1084_v62, %v1084_v62 }
 0x2f0   : > { %v2377_v1 = vpop.f32.mrf.mxu0 }
 0x2f1   : > { %1040 = vst.msk [vmem:[#allocation2 + $0x4] sm:$0xf] %vm1038_vm4, %v2313_v63  ;;  %1113 = vst.msk [vmem:[#allocation3 + $0x4] sm:$0xf] %vm1038_vm4, %v2317_v0  ;;  %v2324_v17 = vpack.c.bf16 %v2377_v1, %v2377_v1 }
 0x2f2   : > { %v1266_v2 = vpop.f32.mrf.mxu0  ;;  %v1295_v9 = vld [vmem:[#allocation2 + $0x8] sm:$0xf] }
 0x2f3   : > { %v2322_v10 = vpack.c.bf16 %v1266_v2, %v1266_v2  ;;  %v1402_v12 = vsel %vm837_vm0, %v1295_v9, 0 }
 0x2f4   : > { %v1293_v3 = vld [vmem:[#allocation2] sm:$0xf]  ;;  %v2378_v5 = vpop.f32.mrf.mxu0  ;;  %v1543_v16 = vld [vmem:[#allocation3] sm:$0xf] }
 0x2f5   : > { %v1310_v4 = vsel %vm837_vm0, %v1293_v3, 0  ;;  %v1551_v18 = vsel %vm969_vm2, %v1543_v16, 0  ;;  %v2325_v20 = vpack.c.bf16 %v2378_v5, %v2378_v5  ;;  %v1545_v16 = vld [vmem:[#allocation3 + $0x8] sm:$0xf] }
 0x2f6   : > { %2380 = vmatpush3.bf16.xpose.msra.mxu1 %v1310_v4  ;;  %v1269_v11 = vpop.f32.mrf.mxu0  ;;  %v1296_v13 = vld [vmem:[#allocation2 + $0xc] sm:$0xf] }
 0x2f7   : > { %2391 = vmatprep.subr.bf16.mxu1 %v3084_v39  ;;  %v2323_v14 = vpack.c.bf16 %v1269_v11, %v1269_v11  ;;  %v1448_v15 = vsel %vm837_vm0, %v1296_v13, 0 }
 0x2f8   : > { %v1294_v6 = vld [vmem:[#allocation2 + $0x4] sm:$0xf]  ;;  %v1544_v19 = vld [vmem:[#allocation3 + $0x4] sm:$0xf] }
 0x2f9   : > { %v1356_v7 = vsel %vm837_vm0, %v1294_v6, 0  ;;  %v1597_v21 = vsel %vm969_vm2, %v1544_v19, 0  ;;  %v1643_v19 = vsel %vm969_vm2, %v1545_v16, 0 }
 0x2fa   : > { %2386 = vmatpush3.bf16.xpose.msra.mxu0 %v1356_v7 }
 0x2fb   : > { %2397 = vmatprep.subr.bf16.mxu0 %v3084_v39 }
 0x2fd   : > { %2382 = vmatmul.mubr.msk.bf16.vlgmr.msra.gmra.mxu1 %vm837_vm0, %v2322_v10 }
 0x2fe   : > { %2392 = vmatpush3.bf16.xpose.msra.mxu1 %v1402_v12  ;;  %2393 = vmatprep.mubr.msk.bf16.mxu1 %vm3085_vm3, %v3084_v39 }
 0x2ff   : > { %2403 = vmatprep.subr.bf16.mxu1 %v3084_v39 }
 0x301   : > { %2388 = vmatmul.mubr.msk.bf16.vlgmr.msra.gmra.mxu0 %vm837_vm0, %v2323_v14 }
 0x302   : > { %2398 = vmatpush3.bf16.xpose.msra.mxu0 %v1448_v15  ;;  %2399 = vmatprep.mubr.msk.bf16.mxu0 %vm3085_vm3, %v3084_v39 }
 0x303   : > { %2409 = vmatprep.subr.bf16.mxu0 %v3084_v39 }
 0x305   : > { %2394 = vmatmul.mubr.msk.bf16.vlgmr.msra.gmra.mxu1 %vm837_vm0, %v2324_v17 }
 0x306   : > { %2404 = vmatpush3.bf16.msra.mxu1 %v1551_v18  ;;  %2405 = vmatprep.mubr.msk.bf16.mxu1 %vm3085_vm3, %v3084_v39 }
 0x307   : > { %2415 = vmatprep.subr.bf16.mxu1 %v3084_v39 }
 0x309   : > { %2400 = vmatmul.mubr.msk.bf16.vlgmr.msra.gmra.mxu0 %vm837_vm0, %v2325_v20 }
 0x30a   : > { %2410 = vmatpush3.bf16.msra.mxu0 %v1597_v21  ;;  %2411 = vmatprep.mubr.msk.bf16.mxu0 %vm3085_vm3, %v3084_v39  ;;  %v1546_v21 = vld [vmem:[#allocation3 + $0xc] sm:$0xf] }
 0x30b   : > { %2421 = vmatprep.subr.bf16.mxu0 %v3084_v39  ;;  %v1689_v24 = vsel %vm969_vm2, %v1546_v21, 0 }
 0x3bd   : > { %v1346_v28 = vpop.f32.mrf.mxu1 }
 0x3be   : > { %v1347_v29 = vadd.f32 %v1346_v28, %v1304_v27 }
 0x3bf   : > { %v2383_v30 = vpop.f32.mrf.mxu1 }
 0x3c0   : > { %v1490_v31 = vsel %vm837_vm0, %v1347_v29, -inf }
 0x3c1   : > { %1491 = vmax.xlane.f32.xlu0 %v1490_v31  ;;  %v1349_v32 = vpop.f32.mrf.mxu1  ;;  %v1392_v33 = vpop.f32.mrf.mxu0 }
 0x3c2   : > { %v1393_v34 = vadd.f32 %v1392_v33, %v1304_v27  ;;  %v2617_v33 = vld [vmem:[%s3787_s20 + $0x8] sm:$0xff]  }
 0x3c3   : > { %v2384_v35 = vpop.f32.mrf.mxu1  ;;  %v2389_v36 = vpop.f32.mrf.mxu0 }
 0x3c4   : > { %v1493_v37 = vsel %vm837_vm0, %v1393_v34, -inf  ;;  %v2618_v36 = vld [vmem:[%s3787_s20] sm:$0xff]  }
 0x3c5   : > { %v1438_v38 = vpop.f32.mrf.mxu1  ;;  %1494 = vmax.xlane.f32.xlu1 %v1493_v37  ;;  %v1395_v40 = vpop.f32.mrf.mxu0 }
 0x3c6   : > { %v1439_v41 = vadd.f32 %v1438_v38, %v1304_v27 }
 0x3c7   : > { %v2390_v42 = vpop.f32.mrf.mxu0  ;;  %v2395_v43 = vpop.f32.mrf.mxu1 }
 0x3c8   : > { %v1496_v44 = vsel %vm837_vm0, %v1439_v41, -inf }
 0x3c9   : > { %1497 = vmax.xlane.f32.xlu0 %v1496_v44  ;;  %v1441_v45 = vpop.f32.mrf.mxu1  ;;  %v1484_v46 = vpop.f32.mrf.mxu0 }
 0x3ca   : > { %v1485_v47 = vadd.f32 %v1484_v46, %v1304_v27 }
 0x3cb   : > { %v2396_v48 = vpop.f32.mrf.mxu1  ;;  %v2401_v49 = vpop.f32.mrf.mxu0 }
 0x3cc   : > { %v1499_v50 = vsel %vm837_vm0, %v1485_v47, -inf }
 0x3cd   : > { %1500 = vmax.xlane.f32.xlu1 %v1499_v50  ;;  %v1487_v51 = vpop.f32.mrf.mxu0 }
 0x3cf   : > { %v2402_v52 = vpop.f32.mrf.mxu0 }
 0x44a   : > { %v1492_v53 = vpop.xlane.xlu0 %1491 }
 0x44b   : > { %v1502_v54 = vsub.f32 %v1347_v29, %v1492_v53 }
 0x44d   : > { %v1506_v55 = vmul.f32 1.442695, %v1502_v54 }
 0x44e   : > { %v1495_v56 = vpop.xlane.xlu1 %1494 }
 0x44f   : > { %2625 = vpow2.f32 %v1506_v55  ;;  %v1503_v57 = vsub.f32 %v1393_v34, %v1495_v56 }
 0x451   : > { %v1508_v58 = vmul.f32 1.442695, %v1503_v57  ;;  %v2291_v57 = vld [vmem:[%s3788_s26] ss:$0 sm:$0xff] }
 0x452   : > { %v1498_v59 = vpop.xlane.xlu0 %1497 }
 0x453   : > { %2627 = vpow2.f32 %v1508_v58  ;;  %v1504_v60 = vsub.f32 %v1439_v41, %v1498_v59 }
 0x455   : > { %v1510_v61 = vmul.f32 1.442695, %v1504_v60 }
 0x456   : > { %v1501_v62 = vpop.xlane.xlu1 %1500 }
 0x457   : > { %2629 = vpow2.f32 %v1510_v61  ;;  %v1505_v63 = vsub.f32 %v1485_v47, %v1501_v62 }
 0x459   : > { %v1512_v0 = vmul.f32 1.442695, %v1505_v63 }
 0x45b   : > { %2631 = vpow2.f32 %v1512_v0 }
 0x45c   : > { %v2626_v1 = vpop.eup %2625 }
 0x45d   : > { %v1514_v2 = vsel %vm837_vm0, %v2626_v1, 0.0 }
 0x45e   : > { %1515 = vadd.xlane.f32.xlu0 %v1514_v2 }
 0x460   : > { %v2628_v3 = vpop.eup %2627 }
 0x461   : > { %v1517_v4 = vsel %vm837_vm0, %v2628_v3, 0.0 }
 0x462   : > { %1518 = vadd.xlane.f32.xlu1 %v1517_v4 }
 0x464   : > { %v2630_v5 = vpop.eup %2629 }
 0x465   : > { %v1520_v6 = vsel %vm837_vm0, %v2630_v5, 0.0 }
 0x466   : > { %1521 = vadd.xlane.f32.xlu0 %v1520_v6  ;;  %v2619_v6 = vld [vmem:[#allocation22 + $0x8] sm:$0xff]  }
 0x468   : > { %v2632_v7 = vpop.eup %2631 }
 0x469   : > { %v1523_v9 = vsel %vm837_vm0, %v2632_v7, 0.0 }
 0x46a   : > { %1524 = vadd.xlane.f32.xlu1 %v1523_v9 }
 0x4e7   : > { %v1516_v10 = vpop.xlane.xlu0 %1515 }
 0x4e8   : > { %2633 = vrcp.f32 %v1516_v10 }
 0x4eb   : > { %v1519_v11 = vpop.xlane.xlu1 %1518 }
 0x4ec   : > { %2635 = vrcp.f32 %v1519_v11 }
 0x4ef   : > { %v1522_v12 = vpop.xlane.xlu0 %1521 }
 0x4f0   : > { %2637 = vrcp.f32 %v1522_v12  ;;  %v2295_v12 = vld [vmem:[%s3790_s25] ss:$0 sm:$0xff] }
 0x4f3   : > { %v1525_v13 = vpop.xlane.xlu1 %1524 }
 0x4f4   : > { %2639 = vrcp.f32 %v1525_v13 }
 0x4f5   : > { %v2634_v14 = vpop.eup %2633 }
 0x4f6   : > { %v1530_v15 = vmul.f32 %v2634_v14, %v2626_v1  ;;  %v2296_v14 = vld [vmem:[#allocation16] ss:$0 sm:$0xff] }
 0x4f8   : > { %v1534_v17 = vpack.c.bf16 %v1530_v15, %v1530_v15 }
 0x4f9   : > { %v2636_v18 = vpop.eup %2635 }
 0x4fa   : > { %1539 = vst.msk [vmem:[%s3551_s13] sm:$0xf] %vm1038_vm4, %v1534_v17  ;;  %2406 = vmatmul.mubr.msk.bf16.vlgmr.msra.gmra.mxu1 %vm837_vm0, %v1534_v17  ;;  %v1531_v20 = vmul.f32 %v2636_v18, %v2628_v3 }
 0x4fb   : > { %2416 = vmatpush3.bf16.msra.mxu1 %v1643_v19  ;;  %2417 = vmatprep.mubr.msk.bf16.mxu1 %vm3085_vm3, %v3084_v39 }
 0x4fc   : > { %v1535_v22 = vpack.c.bf16 %v1531_v20, %v1531_v20  ;;  %2427 = vmatprep.subr.bf16.mxu1 %v3084_v39 }
 0x4fd   : > { %v2638_v23 = vpop.eup %2637 }
 0x4fe   : > { %1540 = vst.msk [vmem:[%s3551_s13 + $0x4] sm:$0xf] %vm1038_vm4, %v1535_v22  ;;  %2412 = vmatmul.mubr.msk.bf16.vlgmr.msra.gmra.mxu0 %vm837_vm0, %v1535_v22  ;;  %v1532_v25 = vmul.f32 %v2638_v23, %v2630_v5 }
 0x4ff   : > { %2422 = vmatpush3.bf16.msra.mxu0 %v1689_v24  ;;  %2423 = vmatprep.mubr.msk.bf16.mxu0 %vm3085_vm3, %v3084_v39 }
 0x500   : > { %v1536_v26 = vpack.c.bf16 %v1532_v25, %v1532_v25  ;;  %2435 = vmatprep.subr.bf16.mxu0 %v3084_v39 }
 0x501   : > { %v2640_v27 = vpop.eup %2639 }
 0x502   : > { %1541 = vst.msk [vmem:[%s3551_s13 + $0x8] sm:$0xf] %vm1038_vm4, %v1536_v26  ;;  %2418 = vmatmul.mubr.msk.bf16.vlgmr.msra.gmra.mxu1 %vm837_vm0, %v1536_v26  ;;  %v1533_v28 = vmul.f32 %v2640_v27, %v2632_v7  ;;  %v2620_v7 = vld [vmem:[#allocation22] sm:$0xff]  }
 0x503   : > { %2431 = vmatprep.mubr.msk.bf16.mxu1 %vm3085_vm3, %v3084_v39  ;;  %2428 = vmatpush3.bf16.msra.mxu1 %v2617_v33 }
 0x504   : > { %v1537_v29 = vpack.c.bf16 %v1533_v28, %v1533_v28  ;;  %2429 = vmatprep.subr.bf16.mxu1 %v3084_v39 }
 0x506   : > { %1542 = vst.msk [vmem:[%s3551_s13 + $0xc] sm:$0xf] %vm1038_vm4, %v1537_v29  ;;  %2424 = vmatmul.mubr.msk.bf16.vlgmr.msra.gmra.mxu0 %vm837_vm0, %v1537_v29 }
 0x507   : > { %2439 = vmatprep.mubr.msk.bf16.mxu0 %vm3085_vm3, %v3084_v39  ;;  %2430 = vmatpush3.bf16.msra.mxu1 %v2618_v36 }
 0x508   : > { %2436 = vmatpush3.bf16.msra.mxu0 %v2619_v6 }
 0x509   : > { %2437 = vmatprep.subr.bf16.mxu0 %v3084_v39 }
 0x50c   : > { %2438 = vmatpush3.bf16.msra.mxu0 %v2620_v7 }
 0x5ba   : > { %v1587_v30 = vpop.f32.mrf.mxu1 }
 0x5bb   : > { %v1731_v31 = vpack.c.bf16 %v1587_v30, %v1587_v30 }
 0x5bc   : > { %v2407_v32 = vpop.f32.mrf.mxu1 }
 0x5bd   : > { %1732 = vst.msk [vmem:[#allocation4] sm:$0xf] %vm1038_vm4, %v1731_v31 }
 0x5be   : > { %v1590_v34 = vpop.f32.mrf.mxu1  ;;  %v1633_v35 = vpop.f32.mrf.mxu0 }
 0x5bf   : > { %v2326_v37 = vpack.c.bf16 %v1633_v35, %v1633_v35 }
 0x5c0   : > { %v2408_v38 = vpop.f32.mrf.mxu1  ;;  %v2413_v40 = vpop.f32.mrf.mxu0 }
 0x5c1   : > { %1737 = vrot.lane.b32.xlu0 %v2326_v37, %s3086_s19  ;;  %s2939_s19 = sshll.u32 %s3089_s21, 4  ;;  %s2940_s19 = int_to_ptr.vmem [resolvable:$false] %s2939_s19 }
 0x5c2   : > { %v1636_v41 = vpop.f32.mrf.mxu0  ;;  %v1679_v42 = vpop.f32.mrf.mxu1  ;;  %s2941_s13 = scalar_lea.vmem %s2940_s19, 512  ;;  %p2942_p6 = scmp.lt.s32.totalorder %s3608_s4, %s2940_s19 }
 0x5c3   : > { %v2327_v43 = vpack.c.bf16 %v1679_v42, %v1679_v42  ;;  %p2943_p3 = scmp.lt.s32.totalorder %s2941_s13, %s2935_s18 }
 0x5c4   : > { %v2414_v44 = vpop.f32.mrf.mxu0  ;;  %v2419_v45 = vpop.f32.mrf.mxu1 }
 0x5c5   : > { %1746 = vrot.lane.b32.xlu1 %v2327_v43, %s3087_s1  ;;  %p2944_p5 = por %p2943_p3, %p2942_p6 }
 0x5c6   : > { %v1682_v46 = vpop.f32.mrf.mxu1  ;;  %v1725_v47 = vpop.f32.mrf.mxu0 }
 0x5c7   : > { %v2328_v48 = vpack.c.bf16 %v1725_v47, %v1725_v47  ;;  %p2945_p12 = pnand %p2944_p5, %p2938_p4 }
 0x5c8   : > { %v2420_v49 = vpop.f32.mrf.mxu1  ;;  %v2425_v50 = vpop.f32.mrf.mxu0 }
 0x5c9   : > { %1755 = vrot.lane.b32.xlu1 %v2328_v48, %s3088_s24 }
 0x5ca   : > { %v1728_v51 = vpop.f32.mrf.mxu0 }
 0x5cc   : > { %v2426_v52 = vpop.f32.mrf.mxu0 }
 0x633   : > { %v1738_v53 = vpop.permute.xlu0 %1737 }
 0x634   : > { %1741 = vst.msk [vmem:[#allocation4] sm:$0xf] %vm1740_vm6, %v1738_v53 }
 0x637   : > { %v1747_v54 = vpop.permute.xlu1 %1746 }
 0x638   : > { %1750 = vst.msk [vmem:[#allocation4] sm:$0xf] %vm1749_vm7, %v1747_v54 }
 0x63b   : > { %v1756_v55 = vpop.permute.xlu1 %1755 }
 0x63c   : > { %1759 = vst.msk [vmem:[#allocation4] sm:$0xf] %vm1758_vm8, %v1756_v55 }
 0x643   : > { %v1760_v56 = vld [vmem:[#allocation4] sm:$0xf] }
 0x644   : > { %2432 = vmatmul.mubr.msk.bf16.vlgmr.msra.gmra.mxu1 %vm1116_vm1, %v1760_v56 }
 0x704   : > { %v1821_v58 = vpop.f32.mrf.mxu1 }
 0x705   : > { %v1822_v59 = vadd.f32 %v2291_v57, %v1821_v58 }
 0x706   : > { %v2433_v60 = vpop.f32.mrf.mxu1 }
 0x707   : > { %v3590_v61 = vadd.f32 %v1822_v59, %v3449_v8 }
 0x708   : > { %v1824_v62 = vpop.f32.mrf.mxu1 }
 0x709   : > { %v1828_v63 = vsel %vm1116_vm1, %v3590_v61, 0.0 }
 0x70a   : > { %1829 = vadd.xlane.f32.xlu1 %v1828_v63  ;;  %v2434_v0 = vpop.f32.mrf.mxu1 }
 0x793   : > { %v1830_v1 = vpop.xlane.xlu1 %1829 }
 0x794   : > { %v1831_v2 = vmul.f32 0.03125, %v1830_v1 }
 0x796   : > { %v1832_v3 = vsub.f32 %v3590_v61, %v1831_v2 }
 0x798   : > { %v1833_v4 = vmul.f32 %v1832_v3, %v1832_v3 }
 0x79a   : > { %v1834_v5 = vsel %vm1116_vm1, %v1833_v4, 0.0 }
 0x79b   : > { %1835 = vadd.xlane.f32.xlu0 %v1834_v5 }
 0x824   : > { %v1836_v8 = vpop.xlane.xlu0 %1835 }
 0x825   : > { %v1837_v9 = vmul.f32 0.03125, %v1836_v8 }
 0x827   : > { %v1838_v10 = vadd.f32 1e-05, %v1837_v9 }
 0x829   : > { %2641 = vrsqrt.f32 %v1838_v10 }
 0x836   : > { %v2642_v11 = vpop.eup %2641 }
 0x837   : > { %v1840_v13 = vmul.f32 %v2642_v11, %v1832_v3 }
 0x839   : > { %v1848_v15 = vmul.f32 %v2295_v12, %v1840_v13 }
 0x83b   : > { %v1856_v16 = vadd.f32 %v2296_v14, %v1848_v15 }
 0x83d   : > { %v1857_v17 = vpack.c.bf16 %v1856_v16, %v1856_v16 }
 0x83f   : > { %2440 = vmatmul.mubr.msk.bf16.vlgmr.msra.gmra.mxu0 %vm1116_vm1, %v1857_v17 }
 0x840   : > { %2948 = shalt.err (!%p2945_p12)
}
 0x841   : > { %s2949_s1 = scalar_lea.hbm %s3606_s5, 256  ;;  %s2953_s8 = scalar_lea.hbm %s3791_s22, 512 }
 0x842   : > { %p2950_p10 = scmp.ne.s32.totalorder %s3606_s5, %s2949_s1  ;;  %p2954_p2 = scmp.lt.s32.totalorder %s3606_s5, %s3791_s22 }
 0x843   : > { %p2955_p9 = scmp.lt.s32.totalorder %s2953_s8, %s2949_s1 }
 0x844   : > { %p2951_p11 = pnand %p2950_p10, %p3792_p7 }
 0x845   : > { %p2956_p8 = por %p2955_p9, %p2954_p2 }
 0x846   : > { %p2952_p13 = pneg %p2951_p11 }
 0x848   : > { %p2957_p1 = pnand %p2956_p8, %p2952_p13 }
 0x84a   : > { %2960 = shalt.err (!%p2957_p1)
}
 0x84b   : > { %s3090_s7 = smov 64   ;;  %s3091_s25 = smov 4  }
 0x84c   : > { %2485 = dma.vmem_to_hbm [thread:$0]  (%p3792_p7), %s3608_s4, 256, %s3606_s5, %s1933_s29, %s3090_s7, %s3090_s7, %s3091_s25  }
 0x84d   : > { %s3793_s16 = sld [smem:[#allocation54_spill]]  ;;  %s2303_s18 = sshll.u32 %s3785_s3, 7 }
 0x84e   : > { %s812_s21 = scalar_lea.vmem [#allocation23], %s2229_s17  ;;  %s3794_s24 = sld [smem:[#allocation55_spill]] }
 0x84f   : > { %s1947_s19 = sshll.u32 %s812_s21, 4  ;;  %s1928_s5 = scalar_lea.sflag [#allocation7], %s3411_s10  ;;  %s1948_s19 = int_to_ptr.vmem [resolvable:$true] %s1947_s19 }
 0x850   : > { %s2961_s29 = scalar_lea.vmem %s1948_s19, 128  ;;  %s3092_s17 = smov [#allocation23]  }
 0x851   : > { %p2962_p0 = scmp.ne.s32.totalorder %s1948_s19, %s2961_s29  ;;  %s2965_s3 = sshll.u32 %s3092_s17, 4  ;;  %s2966_s3 = int_to_ptr.vmem [resolvable:$false] %s2965_s3 }
 0x852   : > { %s2967_s23 = scalar_lea.vmem %s2966_s3, 256  ;;  %p2968_p3 = scmp.lt.s32.totalorder %s1948_s19, %s2966_s3 }
 0x853   : > { %v2297_v39 = vld [vmem:[%s3793_s16] ss:$0 sm:$0xff]  ;;  %p2963_p4 = pnand %p2962_p0, %p3792_p7  ;;  %p2969_p5 = scmp.lt.s32.totalorder %s2967_s23, %s2961_s29 }
 0x854   : > { %s3643_s4 = scalar_lea.hbm %s3794_s24, %s2303_s18 }
 0x855   : > { %p2964_p6 = pneg %p2963_p4  ;;  %p2970_p12 = por %p2969_p5, %p2968_p3 }
 0x857   : > { %p2971_p10 = pnand %p2970_p12, %p2964_p6 }
 0x8ff   : > { %v1918_v18 = vpop.f32.mrf.mxu0 }
 0x900   : > { %v1919_v19 = vadd.f32 %v2297_v39, %v1918_v18 }
 0x901   : > { %v2441_v20 = vpop.f32.mrf.mxu0 }
 0x902   : > { %v1924_v21 = vmax.f32 %v1919_v19, 0.0 }
 0x903   : > { %v1921_v22 = vpop.f32.mrf.mxu0 }
 0x904   : > { %v1925_v23 = vadd.f32 %v1924_v21, %v3590_v61 }
 0x905   : > { %v2442_v24 = vpop.f32.mrf.mxu0 }
 0x906   : > { %1926 = vst.msk [vmem:[%s812_s21] sm:$0xff] %vm1116_vm1, %v1925_v23 }
 0x907   : > { %2974 = shalt.err (!%p2971_p10)
}
 0x908   : > { %s2975_s8 = scalar_lea.hbm %s3643_s4, 128  ;;  %s2979_s2 = scalar_lea.hbm %s3794_s24, 256 }
 0x909   : > { %p2976_p11 = scmp.ne.s32.totalorder %s3643_s4, %s2975_s8  ;;  %p2980_p9 = scmp.lt.s32.totalorder %s3643_s4, %s3794_s24 }
 0x90a   : > { %p2981_p8 = scmp.lt.s32.totalorder %s2979_s2, %s2975_s8 }
 0x90b   : > { %p2977_p13 = pnand %p2976_p11, %p3792_p7 }
 0x90c   : > { %p2982_p1 = por %p2981_p8, %p2980_p9 }
 0x90d   : > { %p2978_p2 = pneg %p2977_p13 }
 0x90f   : > { %p2983_p0 = pnand %p2982_p1, %p2978_p2 }
 0x911   : > { %2986 = shalt.err (!%p2983_p0)
}
 0x912   : > { %2484 = dma.vmem_to_hbm [thread:$0]  (%p3792_p7), %s1948_s19, 128, %s3643_s4, %s1928_s5  }
 0x913 PF: > { %s3795_s27 = sld [smem:[#allocation34_spill]] }
 0x914   : > { %s3796_s12 = sld [smem:[#allocation41_spill]] }
 0x915   : > { %s3797_s16 = sld [smem:[#allocation37_spill]] }
 0x919   : > { %s1976_s18 = sand.u32 1, %s3795_s27  }
 0x91a   : > { %p3798_p4 = scmp.ne.s32.totalorder %s3796_s12, 0  ;;  %s1977_s21 = scalar_lea.sflag [#allocation7], %s1976_s18 }
 0x91b   : > { %p3799_p6 = scmp.ge.s32.totalorder %s3797_s16, 2 }
 0x91d   : > { %p2524_p3 = pnand %p3799_p6, %p3798_p4 }
 0x91f   : > { %p2525_p5 = pneg %p2524_p3 }
 0x921   : > { %3036 = dma.done.wait (%p2525_p5), %s1977_s21, 128  }
 0x922   : > { %3038 = vsyncadd (%p2525_p5), %s1977_s21, 4294967168  ;;  %s1986_s13 = scalar_lea.sflag [#allocation25], %s1976_s18 }
 0x923   : > { %3040 = dma.done.wait (%p2525_p5), %s1986_s13, 256  }
 0x924   : > { %3042 = vsyncadd (%p2525_p5), %s1986_s13, 4294967040  ;;  %s45_s19 = sadd.s32 1, %s3797_s16   ;;  %s3800_s30 = sld [smem:[#allocation35_spill]] }
 0x925   : > { %p42_p12 = scmp.ge.s32.totalorder %s45_s19, 4   ;;  %s3801_s29 = sld [smem:[#allocation40_spill]] }
 0x926   : > { %s3802_s1 = sld [smem:[#allocation38_spill]]  ;;  %s3803_s27 = smov %s3049_s28 }
 0x928   :  { %44 = sbr.rel (!%p42_p12) target bundleno = 30 (0x1e), region = 213 }
 0x92a   : > { %s3804_s28 = smov %s3800_s30  ;;  %s3805_s30 = smov %s3061_s0 }
 0x92c   : > { %s3806_s0 = smov %s3802_s1 }
 0x92d   :  { %1991 = vsyncpa [#allocation6], 1 }
 0x92e   :  { %1993 = vsyncpa [#allocation6 + $0x1], 1 }
 0x92f   :  { %1994 = vsyncpa [#allocation9], 1 }
 0x930   :  { %1996 = vsyncpa [#allocation9 + $0x1], 1 }
 0x931   :  { %1997 = vsyncpa [#allocation12], 1 }
 0x932   :  { %1998 = vsyncpa [#allocation15], 1 }
 0x933   :  { %1999 = vsyncpa [#allocation18], 1 }
 0x934   :  { %2000 = vsyncpa [#allocation21], 1 }
 0x935   :  { %2001 = vsyncpa [#allocation7], 1 }
 0x936   :  { %2003 = vsyncpa [#allocation7 + $0x1], 1 }
 0x937   :  { %2004 = vsyncpa [#allocation25], 1 }
 0x938   :  { %2006 = vsyncpa [#allocation25 + $0x1], 1 }

</bundles_post_ra>
